<compile_context>
chip_gen: v7x
topology: tpu7x:2x2x1
jax: 0.10.0
libtpu: 0.0.40
codegen_flags: <defaults>
</compile_context>

<pallas_src>
import functools

import jax
import jax.numpy as jnp
from jax import lax
from jax.experimental import pallas as pl
from jax.experimental.pallas import tpu as pltpu


_VMEM = pl.BlockSpec(memory_space=pltpu.MemorySpace.VMEM)


def _bf16_dot(a, w):
    """MXU dot with bf16 operands and f32 accumulation."""
    return jnp.dot(a.astype(jnp.bfloat16), w.astype(jnp.bfloat16),
                   preferred_element_type=jnp.float32)


# ----------------------------------------------------------------------------
# Kernel 1: fused matmul + bias.  Used for the hoisted LSTM input projection
# (one (T*B, E) @ (E, 4H) matmul, lane-dense 4H output) and the final dense layer.
# ----------------------------------------------------------------------------
def matmul_bias_kernel(x_ref, w_ref, b_ref, o_ref):
    o_ref[...] = _bf16_dot(x_ref[...], w_ref[...]) + b_ref[...]


def run_matmul_bias(x, w, b2d):
    M = x.shape[0]
    N = w.shape[1]
    return pl.pallas_call(
        matmul_bias_kernel,
        out_shape=jax.ShapeDtypeStruct((M, N), jnp.float32),
        in_specs=[_VMEM] * 3,
        out_specs=_VMEM,
    )(x, w, b2d)


# ----------------------------------------------------------------------------
# Kernel 2: LSTM recurrence over precomputed input projections (time-major).
# Outputs at padded timesteps are zeroed, matching
# pack_padded_sequence -> LSTM -> pad_packed_sequence for the emitted outputs
# (the final hidden/cell states are never consumed by the model).
# ----------------------------------------------------------------------------
def lstm_recurrence_kernel(xp_ref, mask_ref, whh_ref, out_ref, h_scr, c_scr):
    # xp_ref: (T, B, 4H) = x@Wih + b, mask_ref: (T, B, 1), whh: (H, 4H),
    # out_ref: (T, B, H), scratch h/c: (B, H)
    T = xp_ref.shape[0]
    H = whh_ref.shape[0]

    h_scr[...] = jnp.zeros_like(h_scr)
    c_scr[...] = jnp.zeros_like(c_scr)
    whh_bf16 = whh_ref[...].astype(jnp.bfloat16)   # loaded/cast once, reused every step

    def step(t, carry):
        h = h_scr[...]
        c = c_scr[...]
        gates = xp_ref[t] + jnp.dot(h.astype(jnp.bfloat16), whh_bf16,
                                    preferred_element_type=jnp.float32)   # (B, 4H)
        i_g = jax.nn.sigmoid(gates[:, 0 * H:1 * H])
        f_g = jax.nn.sigmoid(gates[:, 1 * H:2 * H])
        g_g = jnp.tanh(gates[:, 2 * H:3 * H])
        o_g = jax.nn.sigmoid(gates[:, 3 * H:4 * H])
        c_new = f_g * c + i_g * g_g
        h_new = o_g * jnp.tanh(c_new)
        h_scr[...] = h_new
        c_scr[...] = c_new
        out_ref[t] = h_new * mask_ref[t]           # zero out padded timesteps
        return carry

    lax.fori_loop(0, T, step, 0, unroll=True)


def run_lstm(x_flat, mask_tb, wih, whh, b):
    # x_flat: (T*B, E) embeddings in time-major flat order (row = t*B + b).
    T, B = mask_tb.shape
    H = whh.shape[0]
    # Hoisted input projection: one big (T*B, E) @ (E, 4H) matmul; HBM reshape below is free.
    xp = run_matmul_bias(x_flat, wih, b).reshape(T, B, 4 * H)
    return pl.pallas_call(
        lstm_recurrence_kernel,
        out_shape=jax.ShapeDtypeStruct((T, B, H), jnp.float32),
        in_specs=[_VMEM] * 3,
        out_specs=_VMEM,
        scratch_shapes=[pltpu.VMEM((B, H), jnp.float32),
                        pltpu.VMEM((B, H), jnp.float32)],
    )(xp, mask_tb[:, :, None], whh)


# ----------------------------------------------------------------------------
# Kernel 3: fused mean-pooling + bi_linear attention (both directions), batched
# over B*N.  Reproduces ABSA-PyTorch Attention(score_function='bi_linear', n_head=1):
#   kx = w_k(k); qx = w_q(q); score = softmax((qx @ W) @ kx^T); out = proj(score @ kx)
# ----------------------------------------------------------------------------
def attn_kernel(ctx_ref, tgt_ref, clen_ref, tlen_ref,
                wk_t, wkT_t, bk_t, wq_t, bq_t, bw_t, pw_t, pb_t,
                wk_c, wkT_c, bk_c, wq_c, bq_c, bw_c, pw_c, pb_c,
                out_ref):
    # ctx_ref: (Tc, BN, H) context LSTM outputs (already repeated over topics),
    # tgt_ref: (Tt, BN, H) target LSTM outputs, clen/tlen: (BN, 1),
    # out_ref: (BN, 2H) = [target_final | context_final]
    ctx = ctx_ref[...]
    tgt = tgt_ref[...]
    H = ctx.shape[2]

    # Mean pooling over time (padded outputs are already zero), as in the reference.
    ctx_pool = jnp.sum(ctx, axis=0) / clen_ref[...]      # (BN, H)
    tgt_pool = jnp.sum(tgt, axis=0) / tlen_ref[...]      # (BN, H)

    def attend(keys, q, wk, wkT, bk, wq, bq, bw, pw, pb):
        # keys: (Tk, BN, H), q: (BN, H), q_len == 1.
        # kx is never materialized:  score_t = (qx@W) . (keys_t@Wk + bk)
        #   = keys_t . ((qx@W)@Wk^T) + const  (const dropped: softmax-invariant per key row)
        # and  score@kx = (sum_t p_t keys_t)@Wk + bk   since sum_t p_t == 1.
        qx = _bf16_dot(q, wq[...]) + bq[...]             # (BN, H)
        qw = _bf16_dot(qx, bw[...])                      # (BN, H)  bilinear weight
        u = _bf16_dot(qw, wkT[...])                      # (BN, H)
        s = jnp.sum(keys * u, axis=-1, keepdims=True)    # (Tk, BN, 1) scores
        m = jnp.max(s, axis=0, keepdims=True)
        e = jnp.exp(s - m)
        p = e / jnp.sum(e, axis=0, keepdims=True)        # softmax over keys (time)
        wsum = jnp.sum(p * keys, axis=0)                 # (BN, H)
        kx_out = _bf16_dot(wsum, wk[...]) + bk[...]      # == score @ kx
        return _bf16_dot(kx_out, pw[...]) + pb[...]      # proj

    target_final = attend(tgt, ctx_pool, wk_t, wkT_t, bk_t, wq_t, bq_t, bw_t, pw_t, pb_t)
    context_final = attend(ctx, tgt_pool, wk_c, wkT_c, bk_c, wq_c, bq_c, bw_c, pw_c, pb_c)

    out_ref[:, :H] = target_final
    out_ref[:, H:] = context_final


def run_attention(ctx_bn, tgt_bn, clen_bn, tlen_bn, attn_t, attn_c):
    _, BN, H = ctx_bn.shape
    args = (ctx_bn, tgt_bn, clen_bn[:, None], tlen_bn[:, None]) + attn_t + attn_c
    return pl.pallas_call(
        attn_kernel,
        out_shape=jax.ShapeDtypeStruct((BN, 2 * H), jnp.float32),
        in_specs=[_VMEM] * len(args),
        out_specs=_VMEM,
    )(*args)


# ----------------------------------------------------------------------------
# Full forward pass (glue in plain JAX: embedding gathers, cheap index transposes,
# free HBM reshapes).  Semantics match the PyTorch reference.
# ----------------------------------------------------------------------------
def _attn_kernel_args(p):
    wk, bk, wq, bq, bw, pw, pb = p
    return (wk, wk.T, bk, wq, bq, bw, pw, pb)     # pass Wk^T so the kernel needs no transpose


def ian_btm_forward(text_raw_indices, target_topic_words_indices, params):
    embed = params["embedding"]                                   # (V, E)
    B, Tc = text_raw_indices.shape
    _, N, Tt = target_topic_words_indices.shape
    H = params["lstm_ctx"][1].shape[0]

    # ---- context branch (computed once; the reference recomputes it per topic with identical result)
    ctx_ids_tb = text_raw_indices.T                               # (Tc, B)
    ctx_mask_tb = (ctx_ids_tb != 0).astype(jnp.float32)
    ctx_len = jnp.sum(ctx_mask_tb, axis=0)                        # (B,)
    ctx_emb_flat = embed[ctx_ids_tb.reshape(-1)]                  # (Tc*B, E) time-major flat
    ctx_out = run_lstm(ctx_emb_flat, ctx_mask_tb, *params["lstm_ctx"])    # (Tc, B, H)

    # ---- all N topics folded into the batch: row index j = b*N + n
    BN = B * N
    tgt_ids = target_topic_words_indices.reshape(BN, Tt)
    tgt_ids_tb = tgt_ids.T                                        # (Tt, BN)
    tgt_mask_tb = (tgt_ids_tb != 0).astype(jnp.float32)
    tgt_len = jnp.sum(tgt_mask_tb, axis=0)                        # (BN,)
    tgt_emb_flat = embed[tgt_ids_tb.reshape(-1)]                  # (Tt*BN, E)
    tgt_out = run_lstm(tgt_emb_flat, tgt_mask_tb, *params["lstm_tgt"])    # (Tt, BN, H)

    # broadcast the context results over topics so both attentions run at BN granularity
    ctx_out_bn = jnp.repeat(ctx_out, N, axis=1)                   # (Tc, BN, H)
    ctx_len_bn = jnp.repeat(ctx_len, N, axis=0)                   # (BN,)

    feats = run_attention(ctx_out_bn, tgt_out, ctx_len_bn, tgt_len,
                          _attn_kernel_args(params["attn_target"]),
                          _attn_kernel_args(params["attn_context"]))      # (BN, 2H)

    x = feats.reshape(B, N * 2 * H)                               # == concat of per-topic features
    return run_matmul_bias(x, params["dense_w"], params["dense_b"])       # (B, P)


# ----------------------------------------------------------------------------
# Deterministic parameter construction + example run.
# ----------------------------------------------------------------------------
def make_params(key, vocab, embed_dim, hidden_dim, polarities):
    ks = jax.random.split(key, 32)
    it = iter(ks)

    def nrm(shape, scale=0.1):
        return (scale * jax.random.normal(next(it), shape)).astype(jnp.float32)

    embedding = nrm((vocab, embed_dim))
    embedding = embedding.at[0].set(0.0)                          # padding row

    def lstm_params():
        wih = nrm((embed_dim, 4 * hidden_dim))
        whh = nrm((hidden_dim, 4 * hidden_dim))
        b = nrm((1, 4 * hidden_dim))
        return (wih, whh, b)

    def attn_params():
        wk = nrm((hidden_dim, hidden_dim))
        bk = nrm((1, hidden_dim))
        wq = nrm((hidden_dim, hidden_dim))
        bq = nrm((1, hidden_dim))
        bw = nrm((hidden_dim, hidden_dim))                        # bilinear weight
        pw = nrm((hidden_dim, hidden_dim))                        # proj weight
        pb = nrm((1, hidden_dim))                                 # proj bias
        return (wk, bk, wq, bq, bw, pw, pb)

    return {
        "embedding": embedding,
        "lstm_ctx": lstm_params(),
        "lstm_tgt": lstm_params(),
        "attn_target": attn_params(),
        "attn_context": attn_params(),
        "dense_w": nrm((6 * hidden_dim, polarities)),
        "dense_b": nrm((1, polarities)),
    }


if __name__ == "__main__":
    B, Tc, Tt, N = 2, 8, 4, 3            # N=3 topics -> dense in_dim = hidden*6
    V, E, H, P = 50, 32, 32, 3

    key = jax.random.PRNGKey(0)
    k_txt, k_tgt, k_par = jax.random.split(key, 3)

    # context token ids with variable lengths (lengths 8 and 5)
    text_ids = jax.random.randint(k_txt, (B, Tc), 1, V)
    ctx_lens = jnp.array([8, 5])
    text_ids = text_ids * (jnp.arange(Tc)[None, :] < ctx_lens[:, None])

    # target/topic token ids: (B, N, Tt), lengths >= 1
    tgt_ids = jax.random.randint(k_tgt, (B, N, Tt), 1, V)
    tgt_lens = jnp.array([[4, 2, 3],
                          [3, 4, 1]])
    tgt_ids = tgt_ids * (jnp.arange(Tt)[None, None, :] < tgt_lens[:, :, None])

    params = make_params(k_par, V, E, H, P)

    fwd = jax.jit(functools.partial(ian_btm_forward, params=params))
    out = fwd(text_ids, tgt_ids)
    out = jax.block_until_ready(out)

    assert out.shape == (B, P), out.shape
    assert bool(jnp.all(jnp.isfinite(out)))
    print("KERNEL_OK")
</pallas_src>

<mosaic_0001>
module attributes {stable_mosaic.version = 11 : i64} {
  func.func @matmul_bias_kernel(%arg0: memref<24x32xf32, #tpu.memory_space<vmem>>, %arg1: memref<32x128xf32, #tpu.memory_space<vmem>>, %arg2: memref<1x128xf32, #tpu.memory_space<vmem>>, %arg3: memref<24x128xf32, #tpu.memory_space<vmem>>) attributes {dimension_semantics = [], scalar_prefetch = 0 : i64, scratch_operands = 0 : i64, tpu.core_type = #tpu.core_type<tc>} {
    %c0 = arith.constant 0 : index
    %c0_0 = arith.constant 0 : index
    %0 = vector.load %arg0[%c0, %c0_0] : memref<24x32xf32, #tpu.memory_space<vmem>>, vector<24x32xf32>
    %c0_1 = arith.constant 0 : index
    %c0_2 = arith.constant 0 : index
    %1 = vector.load %arg1[%c0_1, %c0_2] : memref<32x128xf32, #tpu.memory_space<vmem>>, vector<32x128xf32>
    %2 = arith.truncf %0 : vector<24x32xf32> to vector<24x32xbf16>
    %3 = arith.truncf %1 : vector<32x128xf32> to vector<32x128xbf16>
    %cst = arith.constant dense<0.000000e+00> : vector<24x128xf32>
    %4 = tpu.matmul %2, %3, %cst {dimension_numbers = #tpu.dot_dimension_numbers<[1], [0], [0], [1], [0, 0, 1, 1], [], []>} : vector<24x32xbf16>, vector<32x128xbf16>, vector<24x128xf32> -> vector<24x128xf32>
    %c0_3 = arith.constant 0 : index
    %c0_4 = arith.constant 0 : index
    %5 = vector.load %arg2[%c0_3, %c0_4] : memref<1x128xf32, #tpu.memory_space<vmem>>, vector<1x128xf32>
    %6 = vector.broadcast %5 : vector<1x128xf32> to vector<24x128xf32>
    %7 = arith.addf %4, %6 : vector<24x128xf32>
    %c0_5 = arith.constant 0 : index
    %c0_6 = arith.constant 0 : index
    %8 = vector.load %arg3[%c0_5, %c0_6] : memref<24x128xf32, #tpu.memory_space<vmem>>, vector<24x128xf32>
    tpu.vector_store %arg3[%c0_5, %c0_6], %7 {strides = array<i32>} : memref<24x128xf32, #tpu.memory_space<vmem>>, vector<24x128xf32>,
    return
  }
}

module attributes {stable_mosaic.version = 11 : i64} {
  func.func @lstm_recurrence_kernel(%arg0: memref<4x6x128xf32, #tpu.memory_space<vmem>>, %arg1: memref<4x6x1xf32, #tpu.memory_space<vmem>>, %arg2: memref<32x128xf32, #tpu.memory_space<vmem>>, %arg3: memref<4x6x32xf32, #tpu.memory_space<vmem>>, %arg4: memref<6x32xf32, #tpu.memory_space<vmem>>, %arg5: memref<6x32xf32, #tpu.memory_space<vmem>>) attributes {dimension_semantics = [], scalar_prefetch = 0 : i64, scratch_operands = 2 : i64, tpu.core_type = #tpu.core_type<tc>} {
    %cst = arith.constant 0.000000e+00 : f32
    %0 = vector.broadcast %cst : f32 to vector<6x32xf32>
    %c0 = arith.constant 0 : index
    %c0_0 = arith.constant 0 : index
    %1 = vector.load %arg4[%c0, %c0_0] : memref<6x32xf32, #tpu.memory_space<vmem>>, vector<6x32xf32>
    tpu.vector_store %arg4[%c0, %c0_0], %0 {strides = array<i32>} : memref<6x32xf32, #tpu.memory_space<vmem>>, vector<6x32xf32>,
    %cst_1 = arith.constant 0.000000e+00 : f32
    %2 = vector.broadcast %cst_1 : f32 to vector<6x32xf32>
    %c0_2 = arith.constant 0 : index
    %c0_3 = arith.constant 0 : index
    %3 = vector.load %arg5[%c0_2, %c0_3] : memref<6x32xf32, #tpu.memory_space<vmem>>, vector<6x32xf32>
    tpu.vector_store %arg5[%c0_2, %c0_3], %2 {strides = array<i32>} : memref<6x32xf32, #tpu.memory_space<vmem>>, vector<6x32xf32>,
    %c0_4 = arith.constant 0 : index
    %c0_5 = arith.constant 0 : index
    %4 = vector.load %arg2[%c0_4, %c0_5] : memref<32x128xf32, #tpu.memory_space<vmem>>, vector<32x128xf32>
    %5 = arith.truncf %4 : vector<32x128xf32> to vector<32x128xbf16>
    %c0_i32 = arith.constant 0 : i32
    %c0_6 = arith.constant 0 : index
    %c0_7 = arith.constant 0 : index
    %6 = vector.load %arg4[%c0_6, %c0_7] : memref<6x32xf32, #tpu.memory_space<vmem>>, vector<6x32xf32>
    %c0_8 = arith.constant 0 : index
    %c0_9 = arith.constant 0 : index
    %7 = vector.load %arg5[%c0_8, %c0_9] : memref<6x32xf32, #tpu.memory_space<vmem>>, vector<6x32xf32>
    %8 = arith.index_cast %c0_i32 : i32 to index
    %c0_10 = arith.constant 0 : index
    %c0_11 = arith.constant 0 : index
    %9 = vector.load %arg0[%8, %c0_10, %c0_11] : memref<4x6x128xf32, #tpu.memory_space<vmem>>, vector<1x6x128xf32>
    %10 = vector.shape_cast %9 : vector<1x6x128xf32> to vector<6x128xf32>
    %11 = arith.truncf %6 : vector<6x32xf32> to vector<6x32xbf16>
    %cst_12 = arith.constant dense<0.000000e+00> : vector<6x128xf32>
    %12 = tpu.matmul %11, %5, %cst_12 {dimension_numbers = #tpu.dot_dimension_numbers<[1], [0], [0], [1], [0, 0, 1, 1], [], []>} : vector<6x32xbf16>, vector<32x128xbf16>, vector<6x128xf32> -> vector<6x128xf32>
    %13 = arith.addf %10, %12 : vector<6x128xf32>
    %14 = vector.extract_strided_slice %13 {offsets = [0, 0], sizes = [6, 32], strides = [1, 1]} : vector<6x128xf32> to vector<6x32xf32>
    %15 = arith.negf %14 : vector<6x32xf32>
    %16 = math.exp %15 : vector<6x32xf32>
    %cst_13 = arith.constant 1.000000e+00 : f32
    %17 = vector.broadcast %cst_13 : f32 to vector<6x32xf32>
    %18 = arith.addf %17, %16 : vector<6x32xf32>
    %19 = arith.divf %17, %18 : vector<6x32xf32>
    %20 = vector.extract_strided_slice %13 {offsets = [0, 32], sizes = [6, 32], strides = [1, 1]} : vector<6x128xf32> to vector<6x32xf32>
    %21 = arith.negf %20 : vector<6x32xf32>
    %22 = math.exp %21 : vector<6x32xf32>
    %cst_14 = arith.constant 1.000000e+00 : f32
    %23 = vector.broadcast %cst_14 : f32 to vector<6x32xf32>
    %24 = arith.addf %23, %22 : vector<6x32xf32>
    %25 = arith.divf %23, %24 : vector<6x32xf32>
    %26 = vector.extract_strided_slice %13 {offsets = [0, 64], sizes = [6, 32], strides = [1, 1]} : vector<6x128xf32> to vector<6x32xf32>
    %27 = math.tanh %26 : vector<6x32xf32>
    %28 = vector.extract_strided_slice %13 {offsets = [0, 96], sizes = [6, 32], strides = [1, 1]} : vector<6x128xf32> to vector<6x32xf32>
    %29 = arith.negf %28 : vector<6x32xf32>
    %30 = math.exp %29 : vector<6x32xf32>
    %cst_15 = arith.constant 1.000000e+00 : f32
    %31 = vector.broadcast %cst_15 : f32 to vector<6x32xf32>
    %32 = arith.addf %31, %30 : vector<6x32xf32>
    %33 = arith.divf %31, %32 : vector<6x32xf32>
    %34 = arith.mulf %25, %7 : vector<6x32xf32>
    %35 = arith.mulf %19, %27 : vector<6x32xf32>
    %36 = arith.addf %34, %35 : vector<6x32xf32>
    %37 = math.tanh %36 : vector<6x32xf32>
    %38 = arith.mulf %33, %37 : vector<6x32xf32>
    %c0_16 = arith.constant 0 : index
    %c0_17 = arith.constant 0 : index
    %39 = vector.load %arg4[%c0_16, %c0_17] : memref<6x32xf32, #tpu.memory_space<vmem>>, vector<6x32xf32>
    tpu.vector_store %arg4[%c0_16, %c0_17], %38 {strides = array<i32>} : memref<6x32xf32, #tpu.memory_space<vmem>>, vector<6x32xf32>,
    %c0_18 = arith.constant 0 : index
    %c0_19 = arith.constant 0 : index
    %40 = vector.load %arg5[%c0_18, %c0_19] : memref<6x32xf32, #tpu.memory_space<vmem>>, vector<6x32xf32>
    tpu.vector_store %arg5[%c0_18, %c0_19], %36 {strides = array<i32>} : memref<6x32xf32, #tpu.memory_space<vmem>>, vector<6x32xf32>,
    %41 = arith.index_cast %c0_i32 : i32 to index
    %c0_20 = arith.constant 0 : index
    %c0_21 = arith.constant 0 : index
    %42 = vector.load %arg1[%41, %c0_20, %c0_21] : memref<4x6x1xf32, #tpu.memory_space<vmem>>, vector<1x6x1xf32>
    %43 = vector.shape_cast %42 : vector<1x6x1xf32> to vector<6x1xf32>
    %44 = vector.broadcast %43 : vector<6x1xf32> to vector<6x32xf32>
    %45 = arith.mulf %38, %44 : vector<6x32xf32>
    %46 = arith.index_cast %c0_i32 : i32 to index
    %c0_22 = arith.constant 0 : index
    %c0_23 = arith.constant 0 : index
    %47 = vector.load %arg3[%46, %c0_22, %c0_23] : memref<4x6x32xf32, #tpu.memory_space<vmem>>, vector<1x6x32xf32>
    %48 = vector.shape_cast %47 : vector<1x6x32xf32> to vector<6x32xf32>
    %49 = vector.shape_cast %45 : vector<6x32xf32> to vector<1x6x32xf32>
    tpu.vector_store %arg3[%46, %c0_22, %c0_23], %49 {strides = array<i32>} : memref<4x6x32xf32, #tpu.memory_space<vmem>>, vector<1x6x32xf32>,
    %c1_i32 = arith.constant 1 : i32
    %c0_24 = arith.constant 0 : index
    %c0_25 = arith.constant 0 : index
    %50 = vector.load %arg4[%c0_24, %c0_25] : memref<6x32xf32, #tpu.memory_space<vmem>>, vector<6x32xf32>
    %c0_26 = arith.constant 0 : index
    %c0_27 = arith.constant 0 : index
    %51 = vector.load %arg5[%c0_26, %c0_27] : memref<6x32xf32, #tpu.memory_space<vmem>>, vector<6x32xf32>
    %52 = arith.index_cast %c1_i32 : i32 to index
    %c0_28 = arith.constant 0 : index
    %c0_29 = arith.constant 0 : index
    %53 = vector.load %arg0[%52, %c0_28, %c0_29] : memref<4x6x128xf32, #tpu.memory_space<vmem>>, vector<1x6x128xf32>
    %54 = vector.shape_cast %53 : vector<1x6x128xf32> to vector<6x128xf32>
    %55 = arith.truncf %50 : vector<6x32xf32> to vector<6x32xbf16>
    %cst_30 = arith.constant dense<0.000000e+00> : vector<6x128xf32>
    %56 = tpu.matmul %55, %5, %cst_30 {dimension_numbers = #tpu.dot_dimension_numbers<[1], [0], [0], [1], [0, 0, 1, 1], [], []>} : vector<6x32xbf16>, vector<32x128xbf16>, vector<6x128xf32> -> vector<6x128xf32>
    %57 = arith.addf %54, %56 : vector<6x128xf32>
    %58 = vector.extract_strided_slice %57 {offsets = [0, 0], sizes = [6, 32], strides = [1, 1]} : vector<6x128xf32> to vector<6x32xf32>
    %59 = arith.negf %58 : vector<6x32xf32>
    %60 = math.exp %59 : vector<6x32xf32>
    %cst_31 = arith.constant 1.000000e+00 : f32
    %61 = vector.broadcast %cst_31 : f32 to vector<6x32xf32>
    %62 = arith.addf %61, %60 : vector<6x32xf32>
    %63 = arith.divf %61, %62 : vector<6x32xf32>
    %64 = vector.extract_strided_slice %57 {offsets = [0, 32], sizes = [6, 32], strides = [1, 1]} : vector<6x128xf32> to vector<6x32xf32>
    %65 = arith.negf %64 : vector<6x32xf32>
    %66 = math.exp %65 : vector<6x32xf32>
    %cst_32 = arith.constant 1.000000e+00 : f32
    %67 = vector.broadcast %cst_32 : f32 to vector<6x32xf32>
    %68 = arith.addf %67, %66 : vector<6x32xf32>
    %69 = arith.divf %67, %68 : vector<6x32xf32>
    %70 = vector.extract_strided_slice %57 {offsets = [0, 64], sizes = [6, 32], strides = [1, 1]} : vector<6x128xf32> to vector<6x32xf32>
    %71 = math.tanh %70 : vector<6x32xf32>
    %72 = vector.extract_strided_slice %57 {offsets = [0, 96], sizes = [6, 32], strides = [1, 1]} : vector<6x128xf32> to vector<6x32xf32>
    %73 = arith.negf %72 : vector<6x32xf32>
    %74 = math.exp %73 : vector<6x32xf32>
    %cst_33 = arith.constant 1.000000e+00 : f32
    %75 = vector.broadcast %cst_33 : f32 to vector<6x32xf32>
    %76 = arith.addf %75, %74 : vector<6x32xf32>
    %77 = arith.divf %75, %76 : vector<6x32xf32>
    %78 = arith.mulf %69, %51 : vector<6x32xf32>
    %79 = arith.mulf %63, %71 : vector<6x32xf32>
    %80 = arith.addf %78, %79 : vector<6x32xf32>
    %81 = math.tanh %80 : vector<6x32xf32>
    %82 = arith.mulf %77, %81 : vector<6x32xf32>
    %c0_34 = arith.constant 0 : index
    %c0_35 = arith.constant 0 : index
    %83 = vector.load %arg4[%c0_34, %c0_35] : memref<6x32xf32, #tpu.memory_space<vmem>>, vector<6x32xf32>
    tpu.vector_store %arg4[%c0_34, %c0_35], %82 {strides = array<i32>} : memref<6x32xf32, #tpu.memory_space<vmem>>, vector<6x32xf32>,
    %c0_36 = arith.constant 0 : index
    %c0_37 = arith.constant 0 : index
    %84 = vector.load %arg5[%c0_36, %c0_37] : memref<6x32xf32, #tpu.memory_space<vmem>>, vector<6x32xf32>
    tpu.vector_store %arg5[%c0_36, %c0_37], %80 {strides = array<i32>} : memref<6x32xf32, #tpu.memory_space<vmem>>, vector<6x32xf32>,
    %85 = arith.index_cast %c1_i32 : i32 to index
    %c0_38 = arith.constant 0 : index
    %c0_39 = arith.constant 0 : index
    %86 = vector.load %arg1[%85, %c0_38, %c0_39] : memref<4x6x1xf32, #tpu.memory_space<vmem>>, vector<1x6x1xf32>
    %87 = vector.shape_cast %86 : vector<1x6x1xf32> to vector<6x1xf32>
    %88 = vector.broadcast %87 : vector<6x1xf32> to vector<6x32xf32>
    %89 = arith.mulf %82, %88 : vector<6x32xf32>
    %90 = arith.index_cast %c1_i32 : i32 to index
    %c0_40 = arith.constant 0 : index
    %c0_41 = arith.constant 0 : index
    %91 = vector.load %arg3[%90, %c0_40, %c0_41] : memref<4x6x32xf32, #tpu.memory_space<vmem>>, vector<1x6x32xf32>
    %92 = vector.shape_cast %91 : vector<1x6x32xf32> to vector<6x32xf32>
    %93 = vector.shape_cast %89 : vector<6x32xf32> to vector<1x6x32xf32>
    tpu.vector_store %arg3[%90, %c0_40, %c0_41], %93 {strides = array<i32>} : memref<4x6x32xf32, #tpu.memory_space<vmem>>, vector<1x6x32xf32>,
    %c2_i32 = arith.constant 2 : i32
    %c0_42 = arith.constant 0 : index
    %c0_43 = arith.constant 0 : index
    %94 = vector.load %arg4[%c0_42, %c0_43] : memref<6x32xf32, #tpu.memory_space<vmem>>, vector<6x32xf32>
    %c0_44 = arith.constant 0 : index
    %c0_45 = arith.constant 0 : index
    %95 = vector.load %arg5[%c0_44, %c0_45] : memref<6x32xf32, #tpu.memory_space<vmem>>, vector<6x32xf32>
    %96 = arith.index_cast %c2_i32 : i32 to index
    %c0_46 = arith.constant 0 : index
    %c0_47 = arith.constant 0 : index
    %97 = vector.load %arg0[%96, %c0_46, %c0_47] : memref<4x6x128xf32, #tpu.memory_space<vmem>>, vector<1x6x128xf32>
    %98 = vector.shape_cast %97 : vector<1x6x128xf32> to vector<6x128xf32>
    %99 = arith.truncf %94 : vector<6x32xf32> to vector<6x32xbf16>
    %cst_48 = arith.constant dense<0.000000e+00> : vector<6x128xf32>
    %100 = tpu.matmul %99, %5, %cst_48 {dimension_numbers = #tpu.dot_dimension_numbers<[1], [0], [0], [1], [0, 0, 1, 1], [], []>} : vector<6x32xbf16>, vector<32x128xbf16>, vector<6x128xf32> -> vector<6x128xf32>
    %101 = arith.addf %98, %100 : vector<6x128xf32>
    %102 = vector.extract_strided_slice %101 {offsets = [0, 0], sizes = [6, 32], strides = [1, 1]} : vector<6x128xf32> to vector<6x32xf32>
    %103 = arith.negf %102 : vector<6x32xf32>
    %104 = math.exp %103 : vector<6x32xf32>
    %cst_49 = arith.constant 1.000000e+00 : f32
    %105 = vector.broadcast %cst_49 : f32 to vector<6x32xf32>
    %106 = arith.addf %105, %104 : vector<6x32xf32>
    %107 = arith.divf %105, %106 : vector<6x32xf32>
    %108 = vector.extract_strided_slice %101 {offsets = [0, 32], sizes = [6, 32], strides = [1, 1]} : vector<6x128xf32> to vector<6x32xf32>
    %109 = arith.negf %108 : vector<6x32xf32>
    %110 = math.exp %109 : vector<6x32xf32>
    %cst_50 = arith.constant 1.000000e+00 : f32
    %111 = vector.broadcast %cst_50 : f32 to vector<6x32xf32>
    %112 = arith.addf %111, %110 : vector<6x32xf32>
    %113 = arith.divf %111, %112 : vector<6x32xf32>
    %114 = vector.extract_strided_slice %101 {offsets = [0, 64], sizes = [6, 32], strides = [1, 1]} : vector<6x128xf32> to vector<6x32xf32>
    %115 = math.tanh %114 : vector<6x32xf32>
    %116 = vector.extract_strided_slice %101 {offsets = [0, 96], sizes = [6, 32], strides = [1, 1]} : vector<6x128xf32> to vector<6x32xf32>
    %117 = arith.negf %116 : vector<6x32xf32>
    %118 = math.exp %117 : vector<6x32xf32>
    %cst_51 = arith.constant 1.000000e+00 : f32
    %119 = vector.broadcast %cst_51 : f32 to vector<6x32xf32>
    %120 = arith.addf %119, %118 : vector<6x32xf32>
    %121 = arith.divf %119, %120 : vector<6x32xf32>
    %122 = arith.mulf %113, %95 : vector<6x32xf32>
    %123 = arith.mulf %107, %115 : vector<6x32xf32>
    %124 = arith.addf %122, %123 : vector<6x32xf32>
    %125 = math.tanh %124 : vector<6x32xf32>
    %126 = arith.mulf %121, %125 : vector<6x32xf32>
    %c0_52 = arith.constant 0 : index
    %c0_53 = arith.constant 0 : index
    %127 = vector.load %arg4[%c0_52, %c0_53] : memref<6x32xf32, #tpu.memory_space<vmem>>, vector<6x32xf32>
    tpu.vector_store %arg4[%c0_52, %c0_53], %126 {strides = array<i32>} : memref<6x32xf32, #tpu.memory_space<vmem>>, vector<6x32xf32>,
    %c0_54 = arith.constant 0 : index
    %c0_55 = arith.constant 0 : index
    %128 = vector.load %arg5[%c0_54, %c0_55] : memref<6x32xf32, #tpu.memory_space<vmem>>, vector<6x32xf32>
    tpu.vector_store %arg5[%c0_54, %c0_55], %124 {strides = array<i32>} : memref<6x32xf32, #tpu.memory_space<vmem>>, vector<6x32xf32>,
    %129 = arith.index_cast %c2_i32 : i32 to index
    %c0_56 = arith.constant 0 : index
    %c0_57 = arith.constant 0 : index
    %130 = vector.load %arg1[%129, %c0_56, %c0_57] : memref<4x6x1xf32, #tpu.memory_space<vmem>>, vector<1x6x1xf32>
    %131 = vector.shape_cast %130 : vector<1x6x1xf32> to vector<6x1xf32>
    %132 = vector.broadcast %131 : vector<6x1xf32> to vector<6x32xf32>
    %133 = arith.mulf %126, %132 : vector<6x32xf32>
    %134 = arith.index_cast %c2_i32 : i32 to index
    %c0_58 = arith.constant 0 : index
    %c0_59 = arith.constant 0 : index
    %135 = vector.load %arg3[%134, %c0_58, %c0_59] : memref<4x6x32xf32, #tpu.memory_space<vmem>>, vector<1x6x32xf32>
    %136 = vector.shape_cast %135 : vector<1x6x32xf32> to vector<6x32xf32>
    %137 = vector.shape_cast %133 : vector<6x32xf32> to vector<1x6x32xf32>
    tpu.vector_store %arg3[%134, %c0_58, %c0_59], %137 {strides = array<i32>} : memref<4x6x32xf32, #tpu.memory_space<vmem>>, vector<1x6x32xf32>,
    %c3_i32 = arith.constant 3 : i32
    %c0_60 = arith.constant 0 : index
    %c0_61 = arith.constant 0 : index
    %138 = vector.load %arg4[%c0_60, %c0_61] : memref<6x32xf32, #tpu.memory_space<vmem>>, vector<6x32xf32>
    %c0_62 = arith.constant 0 : index
    %c0_63 = arith.constant 0 : index
    %139 = vector.load %arg5[%c0_62, %c0_63] : memref<6x32xf32, #tpu.memory_space<vmem>>, vector<6x32xf32>
    %140 = arith.index_cast %c3_i32 : i32 to index
    %c0_64 = arith.constant 0 : index
    %c0_65 = arith.constant 0 : index
    %141 = vector.load %arg0[%140, %c0_64, %c0_65] : memref<4x6x128xf32, #tpu.memory_space<vmem>>, vector<1x6x128xf32>
    %142 = vector.shape_cast %141 : vector<1x6x128xf32> to vector<6x128xf32>
    %143 = arith.truncf %138 : vector<6x32xf32> to vector<6x32xbf16>
    %cst_66 = arith.constant dense<0.000000e+00> : vector<6x128xf32>
    %144 = tpu.matmul %143, %5, %cst_66 {dimension_numbers = #tpu.dot_dimension_numbers<[1], [0], [0], [1], [0, 0, 1, 1], [], []>} : vector<6x32xbf16>, vector<32x128xbf16>, vector<6x128xf32> -> vector<6x128xf32>
    %145 = arith.addf %142, %144 : vector<6x128xf32>
    %146 = vector.extract_strided_slice %145 {offsets = [0, 0], sizes = [6, 32], strides = [1, 1]} : vector<6x128xf32> to vector<6x32xf32>
    %147 = arith.negf %146 : vector<6x32xf32>
    %148 = math.exp %147 : vector<6x32xf32>
    %cst_67 = arith.constant 1.000000e+00 : f32
    %149 = vector.broadcast %cst_67 : f32 to vector<6x32xf32>
    %150 = arith.addf %149, %148 : vector<6x32xf32>
    %151 = arith.divf %149, %150 : vector<6x32xf32>
    %152 = vector.extract_strided_slice %145 {offsets = [0, 32], sizes = [6, 32], strides = [1, 1]} : vector<6x128xf32> to vector<6x32xf32>
    %153 = arith.negf %152 : vector<6x32xf32>
    %154 = math.exp %153 : vector<6x32xf32>
    %cst_68 = arith.constant 1.000000e+00 : f32
    %155 = vector.broadcast %cst_68 : f32 to vector<6x32xf32>
    %156 = arith.addf %155, %154 : vector<6x32xf32>
    %157 = arith.divf %155, %156 : vector<6x32xf32>
    %158 = vector.extract_strided_slice %145 {offsets = [0, 64], sizes = [6, 32], strides = [1, 1]} : vector<6x128xf32> to vector<6x32xf32>
    %159 = math.tanh %158 : vector<6x32xf32>
    %160 = vector.extract_strided_slice %145 {offsets = [0, 96], sizes = [6, 32], strides = [1, 1]} : vector<6x128xf32> to vector<6x32xf32>
    %161 = arith.negf %160 : vector<6x32xf32>
    %162 = math.exp %161 : vector<6x32xf32>
    %cst_69 = arith.constant 1.000000e+00 : f32
    %163 = vector.broadcast %cst_69 : f32 to vector<6x32xf32>
    %164 = arith.addf %163, %162 : vector<6x32xf32>
    %165 = arith.divf %163, %164 : vector<6x32xf32>
    %166 = arith.mulf %157, %139 : vector<6x32xf32>
    %167 = arith.mulf %151, %159 : vector<6x32xf32>
    %168 = arith.addf %166, %167 : vector<6x32xf32>
    %169 = math.tanh %168 : vector<6x32xf32>
    %170 = arith.mulf %165, %169 : vector<6x32xf32>
    %c0_70 = arith.constant 0 : index
    %c0_71 = arith.constant 0 : index
    %171 = vector.load %arg4[%c0_70, %c0_71] : memref<6x32xf32, #tpu.memory_space<vmem>>, vector<6x32xf32>
    tpu.vector_store %arg4[%c0_70, %c0_71], %170 {strides = array<i32>} : memref<6x32xf32, #tpu.memory_space<vmem>>, vector<6x32xf32>,
    %c0_72 = arith.constant 0 : index
    %c0_73 = arith.constant 0 : index
    %172 = vector.load %arg5[%c0_72, %c0_73] : memref<6x32xf32, #tpu.memory_space<vmem>>, vector<6x32xf32>
    tpu.vector_store %arg5[%c0_72, %c0_73], %168 {strides = array<i32>} : memref<6x32xf32, #tpu.memory_space<vmem>>, vector<6x32xf32>,
    %173 = arith.index_cast %c3_i32 : i32 to index
    %c0_74 = arith.constant 0 : index
    %c0_75 = arith.constant 0 : index
    %174 = vector.load %arg1[%173, %c0_74, %c0_75] : memref<4x6x1xf32, #tpu.memory_space<vmem>>, vector<1x6x1xf32>
    %175 = vector.shape_cast %174 : vector<1x6x1xf32> to vector<6x1xf32>
    %176 = vector.broadcast %175 : vector<6x1xf32> to vector<6x32xf32>
    %177 = arith.mulf %170, %176 : vector<6x32xf32>
    %178 = arith.index_cast %c3_i32 : i32 to index
    %c0_76 = arith.constant 0 : index
    %c0_77 = arith.constant 0 : index
    %179 = vector.load %arg3[%178, %c0_76, %c0_77] : memref<4x6x32xf32, #tpu.memory_space<vmem>>, vector<1x6x32xf32>
    %180 = vector.shape_cast %179 : vector<1x6x32xf32> to vector<6x32xf32>
    %181 = vector.shape_cast %177 : vector<6x32xf32> to vector<1x6x32xf32>
    tpu.vector_store %arg3[%178, %c0_76, %c0_77], %181 {strides = array<i32>} : memref<4x6x32xf32, #tpu.memory_space<vmem>>, vector<1x6x32xf32>,
    %c4_i32 = arith.constant 4 : i32
    return
  }
}

module attributes {stable_mosaic.version = 11 : i64} {
  func.func @matmul_bias_kernel(%arg0: memref<16x32xf32, #tpu.memory_space<vmem>>, %arg1: memref<32x128xf32, #tpu.memory_space<vmem>>, %arg2: memref<1x128xf32, #tpu.memory_space<vmem>>, %arg3: memref<16x128xf32, #tpu.memory_space<vmem>>) attributes {dimension_semantics = [], scalar_prefetch = 0 : i64, scratch_operands = 0 : i64, tpu.core_type = #tpu.core_type<tc>} {
    %c0 = arith.constant 0 : index
    %c0_0 = arith.constant 0 : index
    %0 = vector.load %arg0[%c0, %c0_0] : memref<16x32xf32, #tpu.memory_space<vmem>>, vector<16x32xf32>
    %c0_1 = arith.constant 0 : index
    %c0_2 = arith.constant 0 : index
    %1 = vector.load %arg1[%c0_1, %c0_2] : memref<32x128xf32, #tpu.memory_space<vmem>>, vector<32x128xf32>
    %2 = arith.truncf %0 : vector<16x32xf32> to vector<16x32xbf16>
    %3 = arith.truncf %1 : vector<32x128xf32> to vector<32x128xbf16>
    %cst = arith.constant dense<0.000000e+00> : vector<16x128xf32>
    %4 = tpu.matmul %2, %3, %cst {dimension_numbers = #tpu.dot_dimension_numbers<[1], [0], [0], [1], [0, 0, 1, 1], [], []>} : vector<16x32xbf16>, vector<32x128xbf16>, vector<16x128xf32> -> vector<16x128xf32>
    %c0_3 = arith.constant 0 : index
    %c0_4 = arith.constant 0 : index
    %5 = vector.load %arg2[%c0_3, %c0_4] : memref<1x128xf32, #tpu.memory_space<vmem>>, vector<1x128xf32>
    %6 = vector.broadcast %5 : vector<1x128xf32> to vector<16x128xf32>
    %7 = arith.addf %4, %6 : vector<16x128xf32>
    %c0_5 = arith.constant 0 : index
    %c0_6 = arith.constant 0 : index
    %8 = vector.load %arg3[%c0_5, %c0_6] : memref<16x128xf32, #tpu.memory_space<vmem>>, vector<16x128xf32>
    tpu.vector_store %arg3[%c0_5, %c0_6], %7 {strides = array<i32>} : memref<16x128xf32, #tpu.memory_space<vmem>>, vector<16x128xf32>,
    return
  }
}

module attributes {stable_mosaic.version = 11 : i64} {
  func.func @lstm_recurrence_kernel(%arg0: memref<8x2x128xf32, #tpu.memory_space<vmem>>, %arg1: memref<8x2x1xf32, #tpu.memory_space<vmem>>, %arg2: memref<32x128xf32, #tpu.memory_space<vmem>>, %arg3: memref<8x2x32xf32, #tpu.memory_space<vmem>>, %arg4: memref<2x32xf32, #tpu.memory_space<vmem>>, %arg5: memref<2x32xf32, #tpu.memory_space<vmem>>) attributes {dimension_semantics = [], scalar_prefetch = 0 : i64, scratch_operands = 2 : i64, tpu.core_type = #tpu.core_type<tc>} {
    %cst = arith.constant 0.000000e+00 : f32
    %0 = vector.broadcast %cst : f32 to vector<2x32xf32>
    %c0 = arith.constant 0 : index
    %c0_0 = arith.constant 0 : index
    %1 = vector.load %arg4[%c0, %c0_0] : memref<2x32xf32, #tpu.memory_space<vmem>>, vector<2x32xf32>
    tpu.vector_store %arg4[%c0, %c0_0], %0 {strides = array<i32>} : memref<2x32xf32, #tpu.memory_space<vmem>>, vector<2x32xf32>,
    %cst_1 = arith.constant 0.000000e+00 : f32
    %2 = vector.broadcast %cst_1 : f32 to vector<2x32xf32>
    %c0_2 = arith.constant 0 : index
    %c0_3 = arith.constant 0 : index
    %3 = vector.load %arg5[%c0_2, %c0_3] : memref<2x32xf32, #tpu.memory_space<vmem>>, vector<2x32xf32>
    tpu.vector_store %arg5[%c0_2, %c0_3], %2 {strides = array<i32>} : memref<2x32xf32, #tpu.memory_space<vmem>>, vector<2x32xf32>,
    %c0_4 = arith.constant 0 : index
    %c0_5 = arith.constant 0 : index
    %4 = vector.load %arg2[%c0_4, %c0_5] : memref<32x128xf32, #tpu.memory_space<vmem>>, vector<32x128xf32>
    %5 = arith.truncf %4 : vector<32x128xf32> to vector<32x128xbf16>
    %c0_i32 = arith.constant 0 : i32
    %c0_6 = arith.constant 0 : index
    %c0_7 = arith.constant 0 : index
    %6 = vector.load %arg4[%c0_6, %c0_7] : memref<2x32xf32, #tpu.memory_space<vmem>>, vector<2x32xf32>
    %c0_8 = arith.constant 0 : index
    %c0_9 = arith.constant 0 : index
    %7 = vector.load %arg5[%c0_8, %c0_9] : memref<2x32xf32, #tpu.memory_space<vmem>>, vector<2x32xf32>
    %8 = arith.index_cast %c0_i32 : i32 to index
    %c0_10 = arith.constant 0 : index
    %c0_11 = arith.constant 0 : index
    %9 = vector.load %arg0[%8, %c0_10, %c0_11] : memref<8x2x128xf32, #tpu.memory_space<vmem>>, vector<1x2x128xf32>
    %10 = vector.shape_cast %9 : vector<1x2x128xf32> to vector<2x128xf32>
    %11 = arith.truncf %6 : vector<2x32xf32> to vector<2x32xbf16>
    %cst_12 = arith.constant dense<0.000000e+00> : vector<2x128xf32>
    %12 = tpu.matmul %11, %5, %cst_12 {dimension_numbers = #tpu.dot_dimension_numbers<[1], [0], [0], [1], [0, 0, 1, 1], [], []>} : vector<2x32xbf16>, vector<32x128xbf16>, vector<2x128xf32> -> vector<2x128xf32>
    %13 = arith.addf %10, %12 : vector<2x128xf32>
    %14 = vector.extract_strided_slice %13 {offsets = [0, 0], sizes = [2, 32], strides = [1, 1]} : vector<2x128xf32> to vector<2x32xf32>
    %15 = arith.negf %14 : vector<2x32xf32>
    %16 = math.exp %15 : vector<2x32xf32>
    %cst_13 = arith.constant 1.000000e+00 : f32
    %17 = vector.broadcast %cst_13 : f32 to vector<2x32xf32>
    %18 = arith.addf %17, %16 : vector<2x32xf32>
    %19 = arith.divf %17, %18 : vector<2x32xf32>
    %20 = vector.extract_strided_slice %13 {offsets = [0, 32], sizes = [2, 32], strides = [1, 1]} : vector<2x128xf32> to vector<2x32xf32>
    %21 = arith.negf %20 : vector<2x32xf32>
    %22 = math.exp %21 : vector<2x32xf32>
    %cst_14 = arith.constant 1.000000e+00 : f32
    %23 = vector.broadcast %cst_14 : f32 to vector<2x32xf32>
    %24 = arith.addf %23, %22 : vector<2x32xf32>
    %25 = arith.divf %23, %24 : vector<2x32xf32>
    %26 = vector.extract_strided_slice %13 {offsets = [0, 64], sizes = [2, 32], strides = [1, 1]} : vector<2x128xf32> to vector<2x32xf32>
    %27 = math.tanh %26 : vector<2x32xf32>
    %28 = vector.extract_strided_slice %13 {offsets = [0, 96], sizes = [2, 32], strides = [1, 1]} : vector<2x128xf32> to vector<2x32xf32>
    %29 = arith.negf %28 : vector<2x32xf32>
    %30 = math.exp %29 : vector<2x32xf32>
    %cst_15 = arith.constant 1.000000e+00 : f32
    %31 = vector.broadcast %cst_15 : f32 to vector<2x32xf32>
    %32 = arith.addf %31, %30 : vector<2x32xf32>
    %33 = arith.divf %31, %32 : vector<2x32xf32>
    %34 = arith.mulf %25, %7 : vector<2x32xf32>
    %35 = arith.mulf %19, %27 : vector<2x32xf32>
    %36 = arith.addf %34, %35 : vector<2x32xf32>
    %37 = math.tanh %36 : vector<2x32xf32>
    %38 = arith.mulf %33, %37 : vector<2x32xf32>
    %c0_16 = arith.constant 0 : index
    %c0_17 = arith.constant 0 : index
    %39 = vector.load %arg4[%c0_16, %c0_17] : memref<2x32xf32, #tpu.memory_space<vmem>>, vector<2x32xf32>
    tpu.vector_store %arg4[%c0_16, %c0_17], %38 {strides = array<i32>} : memref<2x32xf32, #tpu.memory_space<vmem>>, vector<2x32xf32>,
    %c0_18 = arith.constant 0 : index
    %c0_19 = arith.constant 0 : index
    %40 = vector.load %arg5[%c0_18, %c0_19] : memref<2x32xf32, #tpu.memory_space<vmem>>, vector<2x32xf32>
    tpu.vector_store %arg5[%c0_18, %c0_19], %36 {strides = array<i32>} : memref<2x32xf32, #tpu.memory_space<vmem>>, vector<2x32xf32>,
    %41 = arith.index_cast %c0_i32 : i32 to index
    %c0_20 = arith.constant 0 : index
    %c0_21 = arith.constant 0 : index
    %42 = vector.load %arg1[%41, %c0_20, %c0_21] : memref<8x2x1xf32, #tpu.memory_space<vmem>>, vector<1x2x1xf32>
    %43 = vector.shape_cast %42 : vector<1x2x1xf32> to vector<2x1xf32>
    %44 = vector.broadcast %43 : vector<2x1xf32> to vector<2x32xf32>
    %45 = arith.mulf %38, %44 : vector<2x32xf32>
    %46 = arith.index_cast %c0_i32 : i32 to index
    %c0_22 = arith.constant 0 : index
    %c0_23 = arith.constant 0 : index
    %47 = vector.load %arg3[%46, %c0_22, %c0_23] : memref<8x2x32xf32, #tpu.memory_space<vmem>>, vector<1x2x32xf32>
    %48 = vector.shape_cast %47 : vector<1x2x32xf32> to vector<2x32xf32>
    %49 = vector.shape_cast %45 : vector<2x32xf32> to vector<1x2x32xf32>
    tpu.vector_store %arg3[%46, %c0_22, %c0_23], %49 {strides = array<i32>} : memref<8x2x32xf32, #tpu.memory_space<vmem>>, vector<1x2x32xf32>,
    %c1_i32 = arith.constant 1 : i32
    %c0_24 = arith.constant 0 : index
    %c0_25 = arith.constant 0 : index
    %50 = vector.load %arg4[%c0_24, %c0_25] : memref<2x32xf32, #tpu.memory_space<vmem>>, vector<2x32xf32>
    %c0_26 = arith.constant 0 : index
    %c0_27 = arith.constant 0 : index
    %51 = vector.load %arg5[%c0_26, %c0_27] : memref<2x32xf32, #tpu.memory_space<vmem>>, vector<2x32xf32>
    %52 = arith.index_cast %c1_i32 : i32 to index
    %c0_28 = arith.constant 0 : index
    %c0_29 = arith.constant 0 : index
    %53 = vector.load %arg0[%52, %c0_28, %c0_29] : memref<8x2x128xf32, #tpu.memory_space<vmem>>, vector<1x2x128xf32>
    %54 = vector.shape_cast %53 : vector<1x2x128xf32> to vector<2x128xf32>
    %55 = arith.truncf %50 : vector<2x32xf32> to vector<2x32xbf16>
    %cst_30 = arith.constant dense<0.000000e+00> : vector<2x128xf32>
    %56 = tpu.matmul %55, %5, %cst_30 {dimension_numbers = #tpu.dot_dimension_numbers<[1], [0], [0], [1], [0, 0, 1, 1], [], []>} : vector<2x32xbf16>, vector<32x128xbf16>, vector<2x128xf32> -> vector<2x128xf32>
    %57 = arith.addf %54, %56 : vector<2x128xf32>
    %58 = vector.extract_strided_slice %57 {offsets = [0, 0], sizes = [2, 32], strides = [1, 1]} : vector<2x128xf32> to vector<2x32xf32>
    %59 = arith.negf %58 : vector<2x32xf32>
    %60 = math.exp %59 : vector<2x32xf32>
    %cst_31 = arith.constant 1.000000e+00 : f32
    %61 = vector.broadcast %cst_31 : f32 to vector<2x32xf32>
    %62 = arith.addf %61, %60 : vector<2x32xf32>
    %63 = arith.divf %61, %62 : vector<2x32xf32>
    %64 = vector.extract_strided_slice %57 {offsets = [0, 32], sizes = [2, 32], strides = [1, 1]} : vector<2x128xf32> to vector<2x32xf32>
    %65 = arith.negf %64 : vector<2x32xf32>
    %66 = math.exp %65 : vector<2x32xf32>
    %cst_32 = arith.constant 1.000000e+00 : f32
    %67 = vector.broadcast %cst_32 : f32 to vector<2x32xf32>
    %68 = arith.addf %67, %66 : vector<2x32xf32>
    %69 = arith.divf %67, %68 : vector<2x32xf32>
    %70 = vector.extract_strided_slice %57 {offsets = [0, 64], sizes = [2, 32], strides = [1, 1]} : vector<2x128xf32> to vector<2x32xf32>
    %71 = math.tanh %70 : vector<2x32xf32>
    %72 = vector.extract_strided_slice %57 {offsets = [0, 96], sizes = [2, 32], strides = [1, 1]} : vector<2x128xf32> to vector<2x32xf32>
    %73 = arith.negf %72 : vector<2x32xf32>
    %74 = math.exp %73 : vector<2x32xf32>
    %cst_33 = arith.constant 1.000000e+00 : f32
    %75 = vector.broadcast %cst_33 : f32 to vector<2x32xf32>
    %76 = arith.addf %75, %74 : vector<2x32xf32>
    %77 = arith.divf %75, %76 : vector<2x32xf32>
    %78 = arith.mulf %69, %51 : vector<2x32xf32>
    %79 = arith.mulf %63, %71 : vector<2x32xf32>
    %80 = arith.addf %78, %79 : vector<2x32xf32>
    %81 = math.tanh %80 : vector<2x32xf32>
    %82 = arith.mulf %77, %81 : vector<2x32xf32>
    %c0_34 = arith.constant 0 : index
    %c0_35 = arith.constant 0 : index
    %83 = vector.load %arg4[%c0_34, %c0_35] : memref<2x32xf32, #tpu.memory_space<vmem>>, vector<2x32xf32>
    tpu.vector_store %arg4[%c0_34, %c0_35], %82 {strides = array<i32>} : memref<2x32xf32, #tpu.memory_space<vmem>>, vector<2x32xf32>,
    %c0_36 = arith.constant 0 : index
    %c0_37 = arith.constant 0 : index
    %84 = vector.load %arg5[%c0_36, %c0_37] : memref<2x32xf32, #tpu.memory_space<vmem>>, vector<2x32xf32>
    tpu.vector_store %arg5[%c0_36, %c0_37], %80 {strides = array<i32>} : memref<2x32xf32, #tpu.memory_space<vmem>>, vector<2x32xf32>,
    %85 = arith.index_cast %c1_i32 : i32 to index
    %c0_38 = arith.constant 0 : index
    %c0_39 = arith.constant 0 : index
    %86 = vector.load %arg1[%85, %c0_38, %c0_39] : memref<8x2x1xf32, #tpu.memory_space<vmem>>, vector<1x2x1xf32>
    %87 = vector.shape_cast %86 : vector<1x2x1xf32> to vector<2x1xf32>
    %88 = vector.broadcast %87 : vector<2x1xf32> to vector<2x32xf32>
    %89 = arith.mulf %82, %88 : vector<2x32xf32>
    %90 = arith.index_cast %c1_i32 : i32 to index
    %c0_40 = arith.constant 0 : index
    %c0_41 = arith.constant 0 : index
    %91 = vector.load %arg3[%90, %c0_40, %c0_41] : memref<8x2x32xf32, #tpu.memory_space<vmem>>, vector<1x2x32xf32>
    %92 = vector.shape_cast %91 : vector<1x2x32xf32> to vector<2x32xf32>
    %93 = vector.shape_cast %89 : vector<2x32xf32> to vector<1x2x32xf32>
    tpu.vector_store %arg3[%90, %c0_40, %c0_41], %93 {strides = array<i32>} : memref<8x2x32xf32, #tpu.memory_space<vmem>>, vector<1x2x32xf32>,
    %c2_i32 = arith.constant 2 : i32
    %c0_42 = arith.constant 0 : index
    %c0_43 = arith.constant 0 : index
    %94 = vector.load %arg4[%c0_42, %c0_43] : memref<2x32xf32, #tpu.memory_space<vmem>>, vector<2x32xf32>
    %c0_44 = arith.constant 0 : index
    %c0_45 = arith.constant 0 : index
    %95 = vector.load %arg5[%c0_44, %c0_45] : memref<2x32xf32, #tpu.memory_space<vmem>>, vector<2x32xf32>
    %96 = arith.index_cast %c2_i32 : i32 to index
    %c0_46 = arith.constant 0 : index
    %c0_47 = arith.constant 0 : index
    %97 = vector.load %arg0[%96, %c0_46, %c0_47] : memref<8x2x128xf32, #tpu.memory_space<vmem>>, vector<1x2x128xf32>
    %98 = vector.shape_cast %97 : vector<1x2x128xf32> to vector<2x128xf32>
    %99 = arith.truncf %94 : vector<2x32xf32> to vector<2x32xbf16>
    %cst_48 = arith.constant dense<0.000000e+00> : vector<2x128xf32>
    %100 = tpu.matmul %99, %5, %cst_48 {dimension_numbers = #tpu.dot_dimension_numbers<[1], [0], [0], [1], [0, 0, 1, 1], [], []>} : vector<2x32xbf16>, vector<32x128xbf16>, vector<2x128xf32> -> vector<2x128xf32>
    %101 = arith.addf %98, %100 : vector<2x128xf32>
    %102 = vector.extract_strided_slice %101 {offsets = [0, 0], sizes = [2, 32], strides = [1, 1]} : vector<2x128xf32> to vector<2x32xf32>
    %103 = arith.negf %102 : vector<2x32xf32>
    %104 = math.exp %103 : vector<2x32xf32>
    %cst_49 = arith.constant 1.000000e+00 : f32
    %105 = vector.broadcast %cst_49 : f32 to vector<2x32xf32>
    %106 = arith.addf %105, %104 : vector<2x32xf32>
    %107 = arith.divf %105, %106 : vector<2x32xf32>
    %108 = vector.extract_strided_slice %101 {offsets = [0, 32], sizes = [2, 32], strides = [1, 1]} : vector<2x128xf32> to vector<2x32xf32>
    %109 = arith.negf %108 : vector<2x32xf32>
    %110 = math.exp %109 : vector<2x32xf32>
    %cst_50 = arith.constant 1.000000e+00 : f32
    %111 = vector.broadcast %cst_50 : f32 to vector<2x32xf32>
    %112 = arith.addf %111, %110 : vector<2x32xf32>
    %113 = arith.divf %111, %112 : vector<2x32xf32>
    %114 = vector.extract_strided_slice %101 {offsets = [0, 64], sizes = [2, 32], strides = [1, 1]} : vector<2x128xf32> to vector<2x32xf32>
    %115 = math.tanh %114 : vector<2x32xf32>
    %116 = vector.extract_strided_slice %101 {offsets = [0, 96], sizes = [2, 32], strides = [1, 1]} : vector<2x128xf32> to vector<2x32xf32>
    %117 = arith.negf %116 : vector<2x32xf32>
    %118 = math.exp %117 : vector<2x32xf32>
    %cst_51 = arith.constant 1.000000e+00 : f32
    %119 = vector.broadcast %cst_51 : f32 to vector<2x32xf32>
    %120 = arith.addf %119, %118 : vector<2x32xf32>
    %121 = arith.divf %119, %120 : vector<2x32xf32>
    %122 = arith.mulf %113, %95 : vector<2x32xf32>
    %123 = arith.mulf %107, %115 : vector<2x32xf32>
    %124 = arith.addf %122, %123 : vector<2x32xf32>
    %125 = math.tanh %124 : vector<2x32xf32>
    %126 = arith.mulf %121, %125 : vector<2x32xf32>
    %c0_52 = arith.constant 0 : index
    %c0_53 = arith.constant 0 : index
    %127 = vector.load %arg4[%c0_52, %c0_53] : memref<2x32xf32, #tpu.memory_space<vmem>>, vector<2x32xf32>
    tpu.vector_store %arg4[%c0_52, %c0_53], %126 {strides = array<i32>} : memref<2x32xf32, #tpu.memory_space<vmem>>, vector<2x32xf32>,
    %c0_54 = arith.constant 0 : index
    %c0_55 = arith.constant 0 : index
    %128 = vector.load %arg5[%c0_54, %c0_55] : memref<2x32xf32, #tpu.memory_space<vmem>>, vector<2x32xf32>
    tpu.vector_store %arg5[%c0_54, %c0_55], %124 {strides = array<i32>} : memref<2x32xf32, #tpu.memory_space<vmem>>, vector<2x32xf32>,
    %129 = arith.index_cast %c2_i32 : i32 to index
    %c0_56 = arith.constant 0 : index
    %c0_57 = arith.constant 0 : index
    %130 = vector.load %arg1[%129, %c0_56, %c0_57] : memref<8x2x1xf32, #tpu.memory_space<vmem>>, vector<1x2x1xf32>
    %131 = vector.shape_cast %130 : vector<1x2x1xf32> to vector<2x1xf32>
    %132 = vector.broadcast %131 : vector<2x1xf32> to vector<2x32xf32>
    %133 = arith.mulf %126, %132 : vector<2x32xf32>
    %134 = arith.index_cast %c2_i32 : i32 to index
    %c0_58 = arith.constant 0 : index
    %c0_59 = arith.constant 0 : index
    %135 = vector.load %arg3[%134, %c0_58, %c0_59] : memref<8x2x32xf32, #tpu.memory_space<vmem>>, vector<1x2x32xf32>
    %136 = vector.shape_cast %135 : vector<1x2x32xf32> to vector<2x32xf32>
    %137 = vector.shape_cast %133 : vector<2x32xf32> to vector<1x2x32xf32>
    tpu.vector_store %arg3[%134, %c0_58, %c0_59], %137 {strides = array<i32>} : memref<8x2x32xf32, #tpu.memory_space<vmem>>, vector<1x2x32xf32>,
    %c3_i32 = arith.constant 3 : i32
    %c0_60 = arith.constant 0 : index
    %c0_61 = arith.constant 0 : index
    %138 = vector.load %arg4[%c0_60, %c0_61] : memref<2x32xf32, #tpu.memory_space<vmem>>, vector<2x32xf32>
    %c0_62 = arith.constant 0 : index
    %c0_63 = arith.constant 0 : index
    %139 = vector.load %arg5[%c0_62, %c0_63] : memref<2x32xf32, #tpu.memory_space<vmem>>, vector<2x32xf32>
    %140 = arith.index_cast %c3_i32 : i32 to index
    %c0_64 = arith.constant 0 : index
    %c0_65 = arith.constant 0 : index
    %141 = vector.load %arg0[%140, %c0_64, %c0_65] : memref<8x2x128xf32, #tpu.memory_space<vmem>>, vector<1x2x128xf32>
    %142 = vector.shape_cast %141 : vector<1x2x128xf32> to vector<2x128xf32>
    %143 = arith.truncf %138 : vector<2x32xf32> to vector<2x32xbf16>
    %cst_66 = arith.constant dense<0.000000e+00> : vector<2x128xf32>
    %144 = tpu.matmul %143, %5, %cst_66 {dimension_numbers = #tpu.dot_dimension_numbers<[1], [0], [0], [1], [0, 0, 1, 1], [], []>} : vector<2x32xbf16>, vector<32x128xbf16>, vector<2x128xf32> -> vector<2x128xf32>
    %145 = arith.addf %142, %144 : vector<2x128xf32>
    %146 = vector.extract_strided_slice %145 {offsets = [0, 0], sizes = [2, 32], strides = [1, 1]} : vector<2x128xf32> to vector<2x32xf32>
    %147 = arith.negf %146 : vector<2x32xf32>
    %148 = math.exp %147 : vector<2x32xf32>
    %cst_67 = arith.constant 1.000000e+00 : f32
    %149 = vector.broadcast %cst_67 : f32 to vector<2x32xf32>
    %150 = arith.addf %149, %148 : vector<2x32xf32>
    %151 = arith.divf %149, %150 : vector<2x32xf32>
    %152 = vector.extract_strided_slice %145 {offsets = [0, 32], sizes = [2, 32], strides = [1, 1]} : vector<2x128xf32> to vector<2x32xf32>
    %153 = arith.negf %152 : vector<2x32xf32>
    %154 = math.exp %153 : vector<2x32xf32>
    %cst_68 = arith.constant 1.000000e+00 : f32
    %155 = vector.broadcast %cst_68 : f32 to vector<2x32xf32>
    %156 = arith.addf %155, %154 : vector<2x32xf32>
    %157 = arith.divf %155, %156 : vector<2x32xf32>
    %158 = vector.extract_strided_slice %145 {offsets = [0, 64], sizes = [2, 32], strides = [1, 1]} : vector<2x128xf32> to vector<2x32xf32>
    %159 = math.tanh %158 : vector<2x32xf32>
    %160 = vector.extract_strided_slice %145 {offsets = [0, 96], sizes = [2, 32], strides = [1, 1]} : vector<2x128xf32> to vector<2x32xf32>
    %161 = arith.negf %160 : vector<2x32xf32>
    %162 = math.exp %161 : vector<2x32xf32>
    %cst_69 = arith.constant 1.000000e+00 : f32
    %163 = vector.broadcast %cst_69 : f32 to vector<2x32xf32>
    %164 = arith.addf %163, %162 : vector<2x32xf32>
    %165 = arith.divf %163, %164 : vector<2x32xf32>
    %166 = arith.mulf %157, %139 : vector<2x32xf32>
    %167 = arith.mulf %151, %159 : vector<2x32xf32>
    %168 = arith.addf %166, %167 : vector<2x32xf32>
    %169 = math.tanh %168 : vector<2x32xf32>
    %170 = arith.mulf %165, %169 : vector<2x32xf32>
    %c0_70 = arith.constant 0 : index
    %c0_71 = arith.constant 0 : index
    %171 = vector.load %arg4[%c0_70, %c0_71] : memref<2x32xf32, #tpu.memory_space<vmem>>, vector<2x32xf32>
    tpu.vector_store %arg4[%c0_70, %c0_71], %170 {strides = array<i32>} : memref<2x32xf32, #tpu.memory_space<vmem>>, vector<2x32xf32>,
    %c0_72 = arith.constant 0 : index
    %c0_73 = arith.constant 0 : index
    %172 = vector.load %arg5[%c0_72, %c0_73] : memref<2x32xf32, #tpu.memory_space<vmem>>, vector<2x32xf32>
    tpu.vector_store %arg5[%c0_72, %c0_73], %168 {strides = array<i32>} : memref<2x32xf32, #tpu.memory_space<vmem>>, vector<2x32xf32>,
    %173 = arith.index_cast %c3_i32 : i32 to index
    %c0_74 = arith.constant 0 : index
    %c0_75 = arith.constant 0 : index
    %174 = vector.load %arg1[%173, %c0_74, %c0_75] : memref<8x2x1xf32, #tpu.memory_space<vmem>>, vector<1x2x1xf32>
    %175 = vector.shape_cast %174 : vector<1x2x1xf32> to vector<2x1xf32>
    %176 = vector.broadcast %175 : vector<2x1xf32> to vector<2x32xf32>
    %177 = arith.mulf %170, %176 : vector<2x32xf32>
    %178 = arith.index_cast %c3_i32 : i32 to index
    %c0_76 = arith.constant 0 : index
    %c0_77 = arith.constant 0 : index
    %179 = vector.load %arg3[%178, %c0_76, %c0_77] : memref<8x2x32xf32, #tpu.memory_space<vmem>>, vector<1x2x32xf32>
    %180 = vector.shape_cast %179 : vector<1x2x32xf32> to vector<2x32xf32>
    %181 = vector.shape_cast %177 : vector<2x32xf32> to vector<1x2x32xf32>
    tpu.vector_store %arg3[%178, %c0_76, %c0_77], %181 {strides = array<i32>} : memref<8x2x32xf32, #tpu.memory_space<vmem>>, vector<1x2x32xf32>,
    %c4_i32 = arith.constant 4 : i32
    %c0_78 = arith.constant 0 : index
    %c0_79 = arith.constant 0 : index
    %182 = vector.load %arg4[%c0_78, %c0_79] : memref<2x32xf32, #tpu.memory_space<vmem>>, vector<2x32xf32>
    %c0_80 = arith.constant 0 : index
    %c0_81 = arith.constant 0 : index
    %183 = vector.load %arg5[%c0_80, %c0_81] : memref<2x32xf32, #tpu.memory_space<vmem>>, vector<2x32xf32>
    %184 = arith.index_cast %c4_i32 : i32 to index
    %c0_82 = arith.constant 0 : index
    %c0_83 = arith.constant 0 : index
    %185 = vector.load %arg0[%184, %c0_82, %c0_83] : memref<8x2x128xf32, #tpu.memory_space<vmem>>, vector<1x2x128xf32>
    %186 = vector.shape_cast %185 : vector<1x2x128xf32> to vector<2x128xf32>
    %187 = arith.truncf %182 : vector<2x32xf32> to vector<2x32xbf16>
    %cst_84 = arith.constant dense<0.000000e+00> : vector<2x128xf32>
    %188 = tpu.matmul %187, %5, %cst_84 {dimension_numbers = #tpu.dot_dimension_numbers<[1], [0], [0], [1], [0, 0, 1, 1], [], []>} : vector<2x32xbf16>, vector<32x128xbf16>, vector<2x128xf32> -> vector<2x128xf32>
    %189 = arith.addf %186, %188 : vector<2x128xf32>
    %190 = vector.extract_strided_slice %189 {offsets = [0, 0], sizes = [2, 32], strides = [1, 1]} : vector<2x128xf32> to vector<2x32xf32>
    %191 = arith.negf %190 : vector<2x32xf32>
    %192 = math.exp %191 : vector<2x32xf32>
    %cst_85 = arith.constant 1.000000e+00 : f32
    %193 = vector.broadcast %cst_85 : f32 to vector<2x32xf32>
    %194 = arith.addf %193, %192 : vector<2x32xf32>
    %195 = arith.divf %193, %194 : vector<2x32xf32>
    %196 = vector.extract_strided_slice %189 {offsets = [0, 32], sizes = [2, 32], strides = [1, 1]} : vector<2x128xf32> to vector<2x32xf32>
    %197 = arith.negf %196 : vector<2x32xf32>
    %198 = math.exp %197 : vector<2x32xf32>
    %cst_86 = arith.constant 1.000000e+00 : f32
    %199 = vector.broadcast %cst_86 : f32 to vector<2x32xf32>
    %200 = arith.addf %199, %198 : vector<2x32xf32>
    %201 = arith.divf %199, %200 : vector<2x32xf32>
    %202 = vector.extract_strided_slice %189 {offsets = [0, 64], sizes = [2, 32], strides = [1, 1]} : vector<2x128xf32> to vector<2x32xf32>
    %203 = math.tanh %202 : vector<2x32xf32>
    %204 = vector.extract_strided_slice %189 {offsets = [0, 96], sizes = [2, 32], strides = [1, 1]} : vector<2x128xf32> to vector<2x32xf32>
    %205 = arith.negf %204 : vector<2x32xf32>
    %206 = math.exp %205 : vector<2x32xf32>
    %cst_87 = arith.constant 1.000000e+00 : f32
    %207 = vector.broadcast %cst_87 : f32 to vector<2x32xf32>
    %208 = arith.addf %207, %206 : vector<2x32xf32>
    %209 = arith.divf %207, %208 : vector<2x32xf32>
    %210 = arith.mulf %201, %183 : vector<2x32xf32>
    %211 = arith.mulf %195, %203 : vector<2x32xf32>
    %212 = arith.addf %210, %211 : vector<2x32xf32>
    %213 = math.tanh %212 : vector<2x32xf32>
    %214 = arith.mulf %209, %213 : vector<2x32xf32>
    %c0_88 = arith.constant 0 : index
    %c0_89 = arith.constant 0 : index
    %215 = vector.load %arg4[%c0_88, %c0_89] : memref<2x32xf32, #tpu.memory_space<vmem>>, vector<2x32xf32>
    tpu.vector_store %arg4[%c0_88, %c0_89], %214 {strides = array<i32>} : memref<2x32xf32, #tpu.memory_space<vmem>>, vector<2x32xf32>,
    %c0_90 = arith.constant 0 : index
    %c0_91 = arith.constant 0 : index
    %216 = vector.load %arg5[%c0_90, %c0_91] : memref<2x32xf32, #tpu.memory_space<vmem>>, vector<2x32xf32>
    tpu.vector_store %arg5[%c0_90, %c0_91], %212 {strides = array<i32>} : memref<2x32xf32, #tpu.memory_space<vmem>>, vector<2x32xf32>,
    %217 = arith.index_cast %c4_i32 : i32 to index
    %c0_92 = arith.constant 0 : index
    %c0_93 = arith.constant 0 : index
    %218 = vector.load %arg1[%217, %c0_92, %c0_93] : memref<8x2x1xf32, #tpu.memory_space<vmem>>, vector<1x2x1xf32>
    %219 = vector.shape_cast %218 : vector<1x2x1xf32> to vector<2x1xf32>
    %220 = vector.broadcast %219 : vector<2x1xf32> to vector<2x32xf32>
    %221 = arith.mulf %214, %220 : vector<2x32xf32>
    %222 = arith.index_cast %c4_i32 : i32 to index
    %c0_94 = arith.constant 0 : index
    %c0_95 = arith.constant 0 : index
    %223 = vector.load %arg3[%222, %c0_94, %c0_95] : memref<8x2x32xf32, #tpu.memory_space<vmem>>, vector<1x2x32xf32>
    %224 = vector.shape_cast %223 : vector<1x2x32xf32> to vector<2x32xf32>
    %225 = vector.shape_cast %221 : vector<2x32xf32> to vector<1x2x32xf32>
    tpu.vector_store %arg3[%222, %c0_94, %c0_95], %225 {strides = array<i32>} : memref<8x2x32xf32, #tpu.memory_space<vmem>>, vector<1x2x32xf32>,
    %c5_i32 = arith.constant 5 : i32
    %c0_96 = arith.constant 0 : index
    %c0_97 = arith.constant 0 : index
    %226 = vector.load %arg4[%c0_96, %c0_97] : memref<2x32xf32, #tpu.memory_space<vmem>>, vector<2x32xf32>
    %c0_98 = arith.constant 0 : index
    %c0_99 = arith.constant 0 : index
    %227 = vector.load %arg5[%c0_98, %c0_99] : memref<2x32xf32, #tpu.memory_space<vmem>>, vector<2x32xf32>
    %228 = arith.index_cast %c5_i32 : i32 to index
    %c0_100 = arith.constant 0 : index
    %c0_101 = arith.constant 0 : index
    %229 = vector.load %arg0[%228, %c0_100, %c0_101] : memref<8x2x128xf32, #tpu.memory_space<vmem>>, vector<1x2x128xf32>
    %230 = vector.shape_cast %229 : vector<1x2x128xf32> to vector<2x128xf32>
    %231 = arith.truncf %226 : vector<2x32xf32> to vector<2x32xbf16>
    %cst_102 = arith.constant dense<0.000000e+00> : vector<2x128xf32>
    %232 = tpu.matmul %231, %5, %cst_102 {dimension_numbers = #tpu.dot_dimension_numbers<[1], [0], [0], [1], [0, 0, 1, 1], [], []>} : vector<2x32xbf16>, vector<32x128xbf16>, vector<2x128xf32> -> vector<2x128xf32>
    %233 = arith.addf %230, %232 : vector<2x128xf32>
    %234 = vector.extract_strided_slice %233 {offsets = [0, 0], sizes = [2, 32], strides = [1, 1]} : vector<2x128xf32> to vector<2x32xf32>
    %235 = arith.negf %234 : vector<2x32xf32>
    %236 = math.exp %235 : vector<2x32xf32>
    %cst_103 = arith.constant 1.000000e+00 : f32
    %237 = vector.broadcast %cst_103 : f32 to vector<2x32xf32>
    %238 = arith.addf %237, %236 : vector<2x32xf32>
    %239 = arith.divf %237, %238 : vector<2x32xf32>
    %240 = vector.extract_strided_slice %233 {offsets = [0, 32], sizes = [2, 32], strides = [1, 1]} : vector<2x128xf32> to vector<2x32xf32>
    %241 = arith.negf %240 : vector<2x32xf32>
    %242 = math.exp %241 : vector<2x32xf32>
    %cst_104 = arith.constant 1.000000e+00 : f32
    %243 = vector.broadcast %cst_104 : f32 to vector<2x32xf32>
    %244 = arith.addf %243, %242 : vector<2x32xf32>
    %245 = arith.divf %243, %244 : vector<2x32xf32>
    %246 = vector.extract_strided_slice %233 {offsets = [0, 64], sizes = [2, 32], strides = [1, 1]} : vector<2x128xf32> to vector<2x32xf32>
    %247 = math.tanh %246 : vector<2x32xf32>
    %248 = vector.extract_strided_slice %233 {offsets = [0, 96], sizes = [2, 32], strides = [1, 1]} : vector<2x128xf32> to vector<2x32xf32>
    %249 = arith.negf %248 : vector<2x32xf32>
    %250 = math.exp %249 : vector<2x32xf32>
    %cst_105 = arith.constant 1.000000e+00 : f32
    %251 = vector.broadcast %cst_105 : f32 to vector<2x32xf32>
    %252 = arith.addf %251, %250 : vector<2x32xf32>
    %253 = arith.divf %251, %252 : vector<2x32xf32>
    %254 = arith.mulf %245, %227 : vector<2x32xf32>
    %255 = arith.mulf %239, %247 : vector<2x32xf32>
    %256 = arith.addf %254, %255 : vector<2x32xf32>
    %257 = math.tanh %256 : vector<2x32xf32>
    %258 = arith.mulf %253, %257 : vector<2x32xf32>
    %c0_106 = arith.constant 0 : index
    %c0_107 = arith.constant 0 : index
    %259 = vector.load %arg4[%c0_106, %c0_107] : memref<2x32xf32, #tpu.memory_space<vmem>>, vector<2x32xf32>
    tpu.vector_store %arg4[%c0_106, %c0_107], %258 {strides = array<i32>} : memref<2x32xf32, #tpu.memory_space<vmem>>, vector<2x32xf32>,
    %c0_108 = arith.constant 0 : index
    %c0_109 = arith.constant 0 : index
    %260 = vector.load %arg5[%c0_108, %c0_109] : memref<2x32xf32, #tpu.memory_space<vmem>>, vector<2x32xf32>
    tpu.vector_store %arg5[%c0_108, %c0_109], %256 {strides = array<i32>} : memref<2x32xf32, #tpu.memory_space<vmem>>, vector<2x32xf32>,
    %261 = arith.index_cast %c5_i32 : i32 to index
    %c0_110 = arith.constant 0 : index
    %c0_111 = arith.constant 0 : index
    %262 = vector.load %arg1[%261, %c0_110, %c0_111] : memref<8x2x1xf32, #tpu.memory_space<vmem>>, vector<1x2x1xf32>
    %263 = vector.shape_cast %262 : vector<1x2x1xf32> to vector<2x1xf32>
    %264 = vector.broadcast %263 : vector<2x1xf32> to vector<2x32xf32>
    %265 = arith.mulf %258, %264 : vector<2x32xf32>
    %266 = arith.index_cast %c5_i32 : i32 to index
    %c0_112 = arith.constant 0 : index
    %c0_113 = arith.constant 0 : index
    %267 = vector.load %arg3[%266, %c0_112, %c0_113] : memref<8x2x32xf32, #tpu.memory_space<vmem>>, vector<1x2x32xf32>
    %268 = vector.shape_cast %267 : vector<1x2x32xf32> to vector<2x32xf32>
    %269 = vector.shape_cast %265 : vector<2x32xf32> to vector<1x2x32xf32>
    tpu.vector_store %arg3[%266, %c0_112, %c0_113], %269 {strides = array<i32>} : memref<8x2x32xf32, #tpu.memory_space<vmem>>, vector<1x2x32xf32>,
    %c6_i32 = arith.constant 6 : i32
    %c0_114 = arith.constant 0 : index
    %c0_115 = arith.constant 0 : index
    %270 = vector.load %arg4[%c0_114, %c0_115] : memref<2x32xf32, #tpu.memory_space<vmem>>, vector<2x32xf32>
    %c0_116 = arith.constant 0 : index
    %c0_117 = arith.constant 0 : index
    %271 = vector.load %arg5[%c0_116, %c0_117] : memref<2x32xf32, #tpu.memory_space<vmem>>, vector<2x32xf32>
    %272 = arith.index_cast %c6_i32 : i32 to index
    %c0_118 = arith.constant 0 : index
    %c0_119 = arith.constant 0 : index
    %273 = vector.load %arg0[%272, %c0_118, %c0_119] : memref<8x2x128xf32, #tpu.memory_space<vmem>>, vector<1x2x128xf32>
    %274 = vector.shape_cast %273 : vector<1x2x128xf32> to vector<2x128xf32>
    %275 = arith.truncf %270 : vector<2x32xf32> to vector<2x32xbf16>
    %cst_120 = arith.constant dense<0.000000e+00> : vector<2x128xf32>
    %276 = tpu.matmul %275, %5, %cst_120 {dimension_numbers = #tpu.dot_dimension_numbers<[1], [0], [0], [1], [0, 0, 1, 1], [], []>} : vector<2x32xbf16>, vector<32x128xbf16>, vector<2x128xf32> -> vector<2x128xf32>
    %277 = arith.addf %274, %276 : vector<2x128xf32>
    %278 = vector.extract_strided_slice %277 {offsets = [0, 0], sizes = [2, 32], strides = [1, 1]} : vector<2x128xf32> to vector<2x32xf32>
    %279 = arith.negf %278 : vector<2x32xf32>
    %280 = math.exp %279 : vector<2x32xf32>
    %cst_121 = arith.constant 1.000000e+00 : f32
    %281 = vector.broadcast %cst_121 : f32 to vector<2x32xf32>
    %282 = arith.addf %281, %280 : vector<2x32xf32>
    %283 = arith.divf %281, %282 : vector<2x32xf32>
    %284 = vector.extract_strided_slice %277 {offsets = [0, 32], sizes = [2, 32], strides = [1, 1]} : vector<2x128xf32> to vector<2x32xf32>
    %285 = arith.negf %284 : vector<2x32xf32>
    %286 = math.exp %285 : vector<2x32xf32>
    %cst_122 = arith.constant 1.000000e+00 : f32
    %287 = vector.broadcast %cst_122 : f32 to vector<2x32xf32>
    %288 = arith.addf %287, %286 : vector<2x32xf32>
    %289 = arith.divf %287, %288 : vector<2x32xf32>
    %290 = vector.extract_strided_slice %277 {offsets = [0, 64], sizes = [2, 32], strides = [1, 1]} : vector<2x128xf32> to vector<2x32xf32>
    %291 = math.tanh %290 : vector<2x32xf32>
    %292 = vector.extract_strided_slice %277 {offsets = [0, 96], sizes = [2, 32], strides = [1, 1]} : vector<2x128xf32> to vector<2x32xf32>
    %293 = arith.negf %292 : vector<2x32xf32>
    %294 = math.exp %293 : vector<2x32xf32>
    %cst_123 = arith.constant 1.000000e+00 : f32
    %295 = vector.broadcast %cst_123 : f32 to vector<2x32xf32>
    %296 = arith.addf %295, %294 : vector<2x32xf32>
    %297 = arith.divf %295, %296 : vector<2x32xf32>
    %298 = arith.mulf %289, %271 : vector<2x32xf32>
    %299 = arith.mulf %283, %291 : vector<2x32xf32>
    %300 = arith.addf %298, %299 : vector<2x32xf32>
    %301 = math.tanh %300 : vector<2x32xf32>
    %302 = arith.mulf %297, %301 : vector<2x32xf32>
    %c0_124 = arith.constant 0 : index
    %c0_125 = arith.constant 0 : index
    %303 = vector.load %arg4[%c0_124, %c0_125] : memref<2x32xf32, #tpu.memory_space<vmem>>, vector<2x32xf32>
    tpu.vector_store %arg4[%c0_124, %c0_125], %302 {strides = array<i32>} : memref<2x32xf32, #tpu.memory_space<vmem>>, vector<2x32xf32>,
    %c0_126 = arith.constant 0 : index
    %c0_127 = arith.constant 0 : index
    %304 = vector.load %arg5[%c0_126, %c0_127] : memref<2x32xf32, #tpu.memory_space<vmem>>, vector<2x32xf32>
    tpu.vector_store %arg5[%c0_126, %c0_127], %300 {strides = array<i32>} : memref<2x32xf32, #tpu.memory_space<vmem>>, vector<2x32xf32>,
    %305 = arith.index_cast %c6_i32 : i32 to index
    %c0_128 = arith.constant 0 : index
    %c0_129 = arith.constant 0 : index
    %306 = vector.load %arg1[%305, %c0_128, %c0_129] : memref<8x2x1xf32, #tpu.memory_space<vmem>>, vector<1x2x1xf32>
    %307 = vector.shape_cast %306 : vector<1x2x1xf32> to vector<2x1xf32>
    %308 = vector.broadcast %307 : vector<2x1xf32> to vector<2x32xf32>
    %309 = arith.mulf %302, %308 : vector<2x32xf32>
    %310 = arith.index_cast %c6_i32 : i32 to index
    %c0_130 = arith.constant 0 : index
    %c0_131 = arith.constant 0 : index
    %311 = vector.load %arg3[%310, %c0_130, %c0_131] : memref<8x2x32xf32, #tpu.memory_space<vmem>>, vector<1x2x32xf32>
    %312 = vector.shape_cast %311 : vector<1x2x32xf32> to vector<2x32xf32>
    %313 = vector.shape_cast %309 : vector<2x32xf32> to vector<1x2x32xf32>
    tpu.vector_store %arg3[%310, %c0_130, %c0_131], %313 {strides = array<i32>} : memref<8x2x32xf32, #tpu.memory_space<vmem>>, vector<1x2x32xf32>,
    %c7_i32 = arith.constant 7 : i32
    %c0_132 = arith.constant 0 : index
    %c0_133 = arith.constant 0 : index
    %314 = vector.load %arg4[%c0_132, %c0_133] : memref<2x32xf32, #tpu.memory_space<vmem>>, vector<2x32xf32>
    %c0_134 = arith.constant 0 : index
    %c0_135 = arith.constant 0 : index
    %315 = vector.load %arg5[%c0_134, %c0_135] : memref<2x32xf32, #tpu.memory_space<vmem>>, vector<2x32xf32>
    %316 = arith.index_cast %c7_i32 : i32 to index
    %c0_136 = arith.constant 0 : index
    %c0_137 = arith.constant 0 : index
    %317 = vector.load %arg0[%316, %c0_136, %c0_137] : memref<8x2x128xf32, #tpu.memory_space<vmem>>, vector<1x2x128xf32>
    %318 = vector.shape_cast %317 : vector<1x2x128xf32> to vector<2x128xf32>
    %319 = arith.truncf %314 : vector<2x32xf32> to vector<2x32xbf16>
    %cst_138 = arith.constant dense<0.000000e+00> : vector<2x128xf32>
    %320 = tpu.matmul %319, %5, %cst_138 {dimension_numbers = #tpu.dot_dimension_numbers<[1], [0], [0], [1], [0, 0, 1, 1], [], []>} : vector<2x32xbf16>, vector<32x128xbf16>, vector<2x128xf32> -> vector<2x128xf32>
    %321 = arith.addf %318, %320 : vector<2x128xf32>
    %322 = vector.extract_strided_slice %321 {offsets = [0, 0], sizes = [2, 32], strides = [1, 1]} : vector<2x128xf32> to vector<2x32xf32>
    %323 = arith.negf %322 : vector<2x32xf32>
    %324 = math.exp %323 : vector<2x32xf32>
    %cst_139 = arith.constant 1.000000e+00 : f32
    %325 = vector.broadcast %cst_139 : f32 to vector<2x32xf32>
    %326 = arith.addf %325, %324 : vector<2x32xf32>
    %327 = arith.divf %325, %326 : vector<2x32xf32>
    %328 = vector.extract_strided_slice %321 {offsets = [0, 32], sizes = [2, 32], strides = [1, 1]} : vector<2x128xf32> to vector<2x32xf32>
    %329 = arith.negf %328 : vector<2x32xf32>
    %330 = math.exp %329 : vector<2x32xf32>
    %cst_140 = arith.constant 1.000000e+00 : f32
    %331 = vector.broadcast %cst_140 : f32 to vector<2x32xf32>
    %332 = arith.addf %331, %330 : vector<2x32xf32>
    %333 = arith.divf %331, %332 : vector<2x32xf32>
    %334 = vector.extract_strided_slice %321 {offsets = [0, 64], sizes = [2, 32], strides = [1, 1]} : vector<2x128xf32> to vector<2x32xf32>
    %335 = math.tanh %334 : vector<2x32xf32>
    %336 = vector.extract_strided_slice %321 {offsets = [0, 96], sizes = [2, 32], strides = [1, 1]} : vector<2x128xf32> to vector<2x32xf32>
    %337 = arith.negf %336 : vector<2x32xf32>
    %338 = math.exp %337 : vector<2x32xf32>
    %cst_141 = arith.constant 1.000000e+00 : f32
    %339 = vector.broadcast %cst_141 : f32 to vector<2x32xf32>
    %340 = arith.addf %339, %338 : vector<2x32xf32>
    %341 = arith.divf %339, %340 : vector<2x32xf32>
    %342 = arith.mulf %333, %315 : vector<2x32xf32>
    %343 = arith.mulf %327, %335 : vector<2x32xf32>
    %344 = arith.addf %342, %343 : vector<2x32xf32>
    %345 = math.tanh %344 : vector<2x32xf32>
    %346 = arith.mulf %341, %345 : vector<2x32xf32>
    %c0_142 = arith.constant 0 : index
    %c0_143 = arith.constant 0 : index
    %347 = vector.load %arg4[%c0_142, %c0_143] : memref<2x32xf32, #tpu.memory_space<vmem>>, vector<2x32xf32>
    tpu.vector_store %arg4[%c0_142, %c0_143], %346 {strides = array<i32>} : memref<2x32xf32, #tpu.memory_space<vmem>>, vector<2x32xf32>,
    %c0_144 = arith.constant 0 : index
    %c0_145 = arith.constant 0 : index
    %348 = vector.load %arg5[%c0_144, %c0_145] : memref<2x32xf32, #tpu.memory_space<vmem>>, vector<2x32xf32>
    tpu.vector_store %arg5[%c0_144, %c0_145], %344 {strides = array<i32>} : memref<2x32xf32, #tpu.memory_space<vmem>>, vector<2x32xf32>,
    %349 = arith.index_cast %c7_i32 : i32 to index
    %c0_146 = arith.constant 0 : index
    %c0_147 = arith.constant 0 : index
    %350 = vector.load %arg1[%349, %c0_146, %c0_147] : memref<8x2x1xf32, #tpu.memory_space<vmem>>, vector<1x2x1xf32>
    %351 = vector.shape_cast %350 : vector<1x2x1xf32> to vector<2x1xf32>
    %352 = vector.broadcast %351 : vector<2x1xf32> to vector<2x32xf32>
    %353 = arith.mulf %346, %352 : vector<2x32xf32>
    %354 = arith.index_cast %c7_i32 : i32 to index
    %c0_148 = arith.constant 0 : index
    %c0_149 = arith.constant 0 : index
    %355 = vector.load %arg3[%354, %c0_148, %c0_149] : memref<8x2x32xf32, #tpu.memory_space<vmem>>, vector<1x2x32xf32>
    %356 = vector.shape_cast %355 : vector<1x2x32xf32> to vector<2x32xf32>
    %357 = vector.shape_cast %353 : vector<2x32xf32> to vector<1x2x32xf32>
    tpu.vector_store %arg3[%354, %c0_148, %c0_149], %357 {strides = array<i32>} : memref<8x2x32xf32, #tpu.memory_space<vmem>>, vector<1x2x32xf32>,
    %c8_i32 = arith.constant 8 : i32
    return
  }
}

module attributes {stable_mosaic.version = 11 : i64} {
  func.func @matmul_bias_kernel(%arg0: memref<2x192xf32, #tpu.memory_space<vmem>>, %arg1: memref<192x3xf32, #tpu.memory_space<vmem>>, %arg2: memref<1x3xf32, #tpu.memory_space<vmem>>, %arg3: memref<2x3xf32, #tpu.memory_space<vmem>>) attributes {dimension_semantics = [], scalar_prefetch = 0 : i64, scratch_operands = 0 : i64, tpu.core_type = #tpu.core_type<tc>} {
    %c0 = arith.constant 0 : index
    %c0_0 = arith.constant 0 : index
    %0 = vector.load %arg0[%c0, %c0_0] : memref<2x192xf32, #tpu.memory_space<vmem>>, vector<2x192xf32>
    %c0_1 = arith.constant 0 : index
    %c0_2 = arith.constant 0 : index
    %1 = vector.load %arg1[%c0_1, %c0_2] : memref<192x3xf32, #tpu.memory_space<vmem>>, vector<192x3xf32>
    %2 = arith.truncf %0 : vector<2x192xf32> to vector<2x192xbf16>
    %3 = arith.truncf %1 : vector<192x3xf32> to vector<192x3xbf16>
    %cst = arith.constant dense<0.000000e+00> : vector<2x3xf32>
    %4 = tpu.matmul %2, %3, %cst {dimension_numbers = #tpu.dot_dimension_numbers<[1], [0], [0], [1], [0, 0, 1, 1], [], []>} : vector<2x192xbf16>, vector<192x3xbf16>, vector<2x3xf32> -> vector<2x3xf32>
    %c0_3 = arith.constant 0 : index
    %c0_4 = arith.constant 0 : index
    %5 = vector.load %arg2[%c0_3, %c0_4] : memref<1x3xf32, #tpu.memory_space<vmem>>, vector<1x3xf32>
    %6 = vector.broadcast %5 : vector<1x3xf32> to vector<2x3xf32>
    %7 = arith.addf %4, %6 : vector<2x3xf32>
    %c0_5 = arith.constant 0 : index
    %c0_6 = arith.constant 0 : index
    %8 = vector.load %arg3[%c0_5, %c0_6] : memref<2x3xf32, #tpu.memory_space<vmem>>, vector<2x3xf32>
    tpu.vector_store %arg3[%c0_5, %c0_6], %7 {strides = array<i32>} : memref<2x3xf32, #tpu.memory_space<vmem>>, vector<2x3xf32>,
    return
  }
}

module attributes {stable_mosaic.version = 11 : i64} {
  func.func @attn_kernel(%arg0: memref<8x6x32xf32, #tpu.memory_space<vmem>>, %arg1: memref<4x6x32xf32, #tpu.memory_space<vmem>>, %arg2: memref<6x1xf32, #tpu.memory_space<vmem>>, %arg3: memref<6x1xf32, #tpu.memory_space<vmem>>, %arg4: memref<32x32xf32, #tpu.memory_space<vmem>>, %arg5: memref<32x32xf32, #tpu.memory_space<vmem>>, %arg6: memref<1x32xf32, #tpu.memory_space<vmem>>, %arg7: memref<32x32xf32, #tpu.memory_space<vmem>>, %arg8: memref<1x32xf32, #tpu.memory_space<vmem>>, %arg9: memref<32x32xf32, #tpu.memory_space<vmem>>, %arg10: memref<32x32xf32, #tpu.memory_space<vmem>>, %arg11: memref<1x32xf32, #tpu.memory_space<vmem>>, %arg12: memref<32x32xf32, #tpu.memory_space<vmem>>, %arg13: memref<32x32xf32, #tpu.memory_space<vmem>>, %arg14: memref<1x32xf32, #tpu.memory_space<vmem>>, %arg15: memref<32x32xf32, #tpu.memory_space<vmem>>, %arg16: memref<1x32xf32, #tpu.memory_space<vmem>>, %arg17: memref<32x32xf32, #tpu.memory_space<vmem>>, %arg18: memref<32x32xf32, #tpu.memory_space<vmem>>, %arg19: memref<1x32xf32, #tpu.memory_space<vmem>>, %arg20: memref<6x64xf32, #tpu.memory_space<vmem>>) attributes {dimension_semantics = [], scalar_prefetch = 0 : i64, scratch_operands = 0 : i64, tpu.core_type = #tpu.core_type<tc>} {
    %c0 = arith.constant 0 : index
    %c0_0 = arith.constant 0 : index
    %c0_1 = arith.constant 0 : index
    %0 = vector.load %arg0[%c0, %c0_0, %c0_1] : memref<8x6x32xf32, #tpu.memory_space<vmem>>, vector<8x6x32xf32>
    %c0_2 = arith.constant 0 : index
    %c0_3 = arith.constant 0 : index
    %c0_4 = arith.constant 0 : index
    %1 = vector.load %arg1[%c0_2, %c0_3, %c0_4] : memref<4x6x32xf32, #tpu.memory_space<vmem>>, vector<4x6x32xf32>
    %cst = arith.constant dense<0.000000e+00> : vector<6x32xf32>
    %2 = vector.multi_reduction <add>, %0, %cst [0] : vector<8x6x32xf32> to vector<6x32xf32>
    %c0_5 = arith.constant 0 : index
    %c0_6 = arith.constant 0 : index
    %3 = vector.load %arg2[%c0_5, %c0_6] : memref<6x1xf32, #tpu.memory_space<vmem>>, vector<6x1xf32>
    %4 = vector.broadcast %3 : vector<6x1xf32> to vector<6x32xf32>
    %5 = arith.divf %2, %4 : vector<6x32xf32>
    %cst_7 = arith.constant dense<0.000000e+00> : vector<6x32xf32>
    %6 = vector.multi_reduction <add>, %1, %cst_7 [0] : vector<4x6x32xf32> to vector<6x32xf32>
    %c0_8 = arith.constant 0 : index
    %c0_9 = arith.constant 0 : index
    %7 = vector.load %arg3[%c0_8, %c0_9] : memref<6x1xf32, #tpu.memory_space<vmem>>, vector<6x1xf32>
    %8 = vector.broadcast %7 : vector<6x1xf32> to vector<6x32xf32>
    %9 = arith.divf %6, %8 : vector<6x32xf32>
    %c0_10 = arith.constant 0 : index
    %c0_11 = arith.constant 0 : index
    %10 = vector.load %arg7[%c0_10, %c0_11] : memref<32x32xf32, #tpu.memory_space<vmem>>, vector<32x32xf32>
    %11 = arith.truncf %5 : vector<6x32xf32> to vector<6x32xbf16>
    %12 = arith.truncf %10 : vector<32x32xf32> to vector<32x32xbf16>
    %cst_12 = arith.constant dense<0.000000e+00> : vector<6x32xf32>
    %13 = tpu.matmul %11, %12, %cst_12 {dimension_numbers = #tpu.dot_dimension_numbers<[1], [0], [0], [1], [0, 0, 1, 1], [], []>} : vector<6x32xbf16>, vector<32x32xbf16>, vector<6x32xf32> -> vector<6x32xf32>
    %c0_13 = arith.constant 0 : index
    %c0_14 = arith.constant 0 : index
    %14 = vector.load %arg8[%c0_13, %c0_14] : memref<1x32xf32, #tpu.memory_space<vmem>>, vector<1x32xf32>
    %15 = vector.broadcast %14 : vector<1x32xf32> to vector<6x32xf32>
    %16 = arith.addf %13, %15 : vector<6x32xf32>
    %c0_15 = arith.constant 0 : index
    %c0_16 = arith.constant 0 : index
    %17 = vector.load %arg9[%c0_15, %c0_16] : memref<32x32xf32, #tpu.memory_space<vmem>>, vector<32x32xf32>
    %18 = arith.truncf %16 : vector<6x32xf32> to vector<6x32xbf16>
    %19 = arith.truncf %17 : vector<32x32xf32> to vector<32x32xbf16>
    %cst_17 = arith.constant dense<0.000000e+00> : vector<6x32xf32>
    %20 = tpu.matmul %18, %19, %cst_17 {dimension_numbers = #tpu.dot_dimension_numbers<[1], [0], [0], [1], [0, 0, 1, 1], [], []>} : vector<6x32xbf16>, vector<32x32xbf16>, vector<6x32xf32> -> vector<6x32xf32>
    %c0_18 = arith.constant 0 : index
    %c0_19 = arith.constant 0 : index
    %21 = vector.load %arg5[%c0_18, %c0_19] : memref<32x32xf32, #tpu.memory_space<vmem>>, vector<32x32xf32>
    %22 = arith.truncf %20 : vector<6x32xf32> to vector<6x32xbf16>
    %23 = arith.truncf %21 : vector<32x32xf32> to vector<32x32xbf16>
    %cst_20 = arith.constant dense<0.000000e+00> : vector<6x32xf32>
    %24 = tpu.matmul %22, %23, %cst_20 {dimension_numbers = #tpu.dot_dimension_numbers<[1], [0], [0], [1], [0, 0, 1, 1], [], []>} : vector<6x32xbf16>, vector<32x32xbf16>, vector<6x32xf32> -> vector<6x32xf32>
    %25 = vector.shape_cast %24 : vector<6x32xf32> to vector<1x6x32xf32>
    %26 = vector.broadcast %25 : vector<1x6x32xf32> to vector<4x6x32xf32>
    %27 = arith.mulf %1, %26 : vector<4x6x32xf32>
    %cst_21 = arith.constant dense<0.000000e+00> : vector<4x6xf32>
    %28 = vector.multi_reduction <add>, %27, %cst_21 [2] : vector<4x6x32xf32> to vector<4x6xf32>
    %29 = vector.shape_cast %28 : vector<4x6xf32> to vector<4x6x1xf32>
    %cst_22 = arith.constant dense<0xFF800000> : vector<6x1xf32>
    %30 = vector.multi_reduction <maximumf>, %29, %cst_22 [0] : vector<4x6x1xf32> to vector<6x1xf32>
    %31 = vector.shape_cast %30 : vector<6x1xf32> to vector<1x6x1xf32>
    %32 = vector.broadcast %31 : vector<1x6x1xf32> to vector<4x6x1xf32>
    %33 = arith.subf %29, %32 : vector<4x6x1xf32>
    %34 = math.exp %33 : vector<4x6x1xf32>
    %cst_23 = arith.constant dense<0.000000e+00> : vector<6x1xf32>
    %35 = vector.multi_reduction <add>, %34, %cst_23 [0] : vector<4x6x1xf32> to vector<6x1xf32>
    %36 = vector.shape_cast %35 : vector<6x1xf32> to vector<1x6x1xf32>
    %37 = vector.broadcast %36 : vector<1x6x1xf32> to vector<4x6x1xf32>
    %38 = arith.divf %34, %37 : vector<4x6x1xf32>
    %39 = vector.broadcast %38 : vector<4x6x1xf32> to vector<4x6x32xf32>
    %40 = arith.mulf %39, %1 : vector<4x6x32xf32>
    %cst_24 = arith.constant dense<0.000000e+00> : vector<6x32xf32>
    %41 = vector.multi_reduction <add>, %40, %cst_24 [0] : vector<4x6x32xf32> to vector<6x32xf32>
    %c0_25 = arith.constant 0 : index
    %c0_26 = arith.constant 0 : index
    %42 = vector.load %arg4[%c0_25, %c0_26] : memref<32x32xf32, #tpu.memory_space<vmem>>, vector<32x32xf32>
    %43 = arith.truncf %41 : vector<6x32xf32> to vector<6x32xbf16>
    %44 = arith.truncf %42 : vector<32x32xf32> to vector<32x32xbf16>
    %cst_27 = arith.constant dense<0.000000e+00> : vector<6x32xf32>
    %45 = tpu.matmul %43, %44, %cst_27 {dimension_numbers = #tpu.dot_dimension_numbers<[1], [0], [0], [1], [0, 0, 1, 1], [], []>} : vector<6x32xbf16>, vector<32x32xbf16>, vector<6x32xf32> -> vector<6x32xf32>
    %c0_28 = arith.constant 0 : index
    %c0_29 = arith.constant 0 : index
    %46 = vector.load %arg6[%c0_28, %c0_29] : memref<1x32xf32, #tpu.memory_space<vmem>>, vector<1x32xf32>
    %47 = vector.broadcast %46 : vector<1x32xf32> to vector<6x32xf32>
    %48 = arith.addf %45, %47 : vector<6x32xf32>
    %c0_30 = arith.constant 0 : index
    %c0_31 = arith.constant 0 : index
    %49 = vector.load %arg10[%c0_30, %c0_31] : memref<32x32xf32, #tpu.memory_space<vmem>>, vector<32x32xf32>
    %50 = arith.truncf %48 : vector<6x32xf32> to vector<6x32xbf16>
    %51 = arith.truncf %49 : vector<32x32xf32> to vector<32x32xbf16>
    %cst_32 = arith.constant dense<0.000000e+00> : vector<6x32xf32>
    %52 = tpu.matmul %50, %51, %cst_32 {dimension_numbers = #tpu.dot_dimension_numbers<[1], [0], [0], [1], [0, 0, 1, 1], [], []>} : vector<6x32xbf16>, vector<32x32xbf16>, vector<6x32xf32> -> vector<6x32xf32>
    %c0_33 = arith.constant 0 : index
    %c0_34 = arith.constant 0 : index
    %53 = vector.load %arg11[%c0_33, %c0_34] : memref<1x32xf32, #tpu.memory_space<vmem>>, vector<1x32xf32>
    %54 = vector.broadcast %53 : vector<1x32xf32> to vector<6x32xf32>
    %55 = arith.addf %52, %54 : vector<6x32xf32>
    %c0_35 = arith.constant 0 : index
    %c0_36 = arith.constant 0 : index
    %56 = vector.load %arg15[%c0_35, %c0_36] : memref<32x32xf32, #tpu.memory_space<vmem>>, vector<32x32xf32>
    %57 = arith.truncf %9 : vector<6x32xf32> to vector<6x32xbf16>
    %58 = arith.truncf %56 : vector<32x32xf32> to vector<32x32xbf16>
    %cst_37 = arith.constant dense<0.000000e+00> : vector<6x32xf32>
    %59 = tpu.matmul %57, %58, %cst_37 {dimension_numbers = #tpu.dot_dimension_numbers<[1], [0], [0], [1], [0, 0, 1, 1], [], []>} : vector<6x32xbf16>, vector<32x32xbf16>, vector<6x32xf32> -> vector<6x32xf32>
    %c0_38 = arith.constant 0 : index
    %c0_39 = arith.constant 0 : index
    %60 = vector.load %arg16[%c0_38, %c0_39] : memref<1x32xf32, #tpu.memory_space<vmem>>, vector<1x32xf32>
    %61 = vector.broadcast %60 : vector<1x32xf32> to vector<6x32xf32>
    %62 = arith.addf %59, %61 : vector<6x32xf32>
    %c0_40 = arith.constant 0 : index
    %c0_41 = arith.constant 0 : index
    %63 = vector.load %arg17[%c0_40, %c0_41] : memref<32x32xf32, #tpu.memory_space<vmem>>, vector<32x32xf32>
    %64 = arith.truncf %62 : vector<6x32xf32> to vector<6x32xbf16>
    %65 = arith.truncf %63 : vector<32x32xf32> to vector<32x32xbf16>
    %cst_42 = arith.constant dense<0.000000e+00> : vector<6x32xf32>
    %66 = tpu.matmul %64, %65, %cst_42 {dimension_numbers = #tpu.dot_dimension_numbers<[1], [0], [0], [1], [0, 0, 1, 1], [], []>} : vector<6x32xbf16>, vector<32x32xbf16>, vector<6x32xf32> -> vector<6x32xf32>
    %c0_43 = arith.constant 0 : index
    %c0_44 = arith.constant 0 : index
    %67 = vector.load %arg13[%c0_43, %c0_44] : memref<32x32xf32, #tpu.memory_space<vmem>>, vector<32x32xf32>
    %68 = arith.truncf %66 : vector<6x32xf32> to vector<6x32xbf16>
    %69 = arith.truncf %67 : vector<32x32xf32> to vector<32x32xbf16>
    %cst_45 = arith.constant dense<0.000000e+00> : vector<6x32xf32>
    %70 = tpu.matmul %68, %69, %cst_45 {dimension_numbers = #tpu.dot_dimension_numbers<[1], [0], [0], [1], [0, 0, 1, 1], [], []>} : vector<6x32xbf16>, vector<32x32xbf16>, vector<6x32xf32> -> vector<6x32xf32>
    %71 = vector.shape_cast %70 : vector<6x32xf32> to vector<1x6x32xf32>
    %72 = vector.broadcast %71 : vector<1x6x32xf32> to vector<8x6x32xf32>
    %73 = arith.mulf %0, %72 : vector<8x6x32xf32>
    %cst_46 = arith.constant dense<0.000000e+00> : vector<8x6xf32>
    %74 = vector.multi_reduction <add>, %73, %cst_46 [2] : vector<8x6x32xf32> to vector<8x6xf32>
    %75 = vector.shape_cast %74 : vector<8x6xf32> to vector<8x6x1xf32>
    %cst_47 = arith.constant dense<0xFF800000> : vector<6x1xf32>
    %76 = vector.multi_reduction <maximumf>, %75, %cst_47 [0] : vector<8x6x1xf32> to vector<6x1xf32>
    %77 = vector.shape_cast %76 : vector<6x1xf32> to vector<1x6x1xf32>
    %78 = vector.broadcast %77 : vector<1x6x1xf32> to vector<8x6x1xf32>
    %79 = arith.subf %75, %78 : vector<8x6x1xf32>
    %80 = math.exp %79 : vector<8x6x1xf32>
    %cst_48 = arith.constant dense<0.000000e+00> : vector<6x1xf32>
    %81 = vector.multi_reduction <add>, %80, %cst_48 [0] : vector<8x6x1xf32> to vector<6x1xf32>
    %82 = vector.shape_cast %81 : vector<6x1xf32> to vector<1x6x1xf32>
    %83 = vector.broadcast %82 : vector<1x6x1xf32> to vector<8x6x1xf32>
    %84 = arith.divf %80, %83 : vector<8x6x1xf32>
    %85 = vector.broadcast %84 : vector<8x6x1xf32> to vector<8x6x32xf32>
    %86 = arith.mulf %85, %0 : vector<8x6x32xf32>
    %cst_49 = arith.constant dense<0.000000e+00> : vector<6x32xf32>
    %87 = vector.multi_reduction <add>, %86, %cst_49 [0] : vector<8x6x32xf32> to vector<6x32xf32>
    %c0_50 = arith.constant 0 : index
    %c0_51 = arith.constant 0 : index
    %88 = vector.load %arg12[%c0_50, %c0_51] : memref<32x32xf32, #tpu.memory_space<vmem>>, vector<32x32xf32>
    %89 = arith.truncf %87 : vector<6x32xf32> to vector<6x32xbf16>
    %90 = arith.truncf %88 : vector<32x32xf32> to vector<32x32xbf16>
    %cst_52 = arith.constant dense<0.000000e+00> : vector<6x32xf32>
    %91 = tpu.matmul %89, %90, %cst_52 {dimension_numbers = #tpu.dot_dimension_numbers<[1], [0], [0], [1], [0, 0, 1, 1], [], []>} : vector<6x32xbf16>, vector<32x32xbf16>, vector<6x32xf32> -> vector<6x32xf32>
    %c0_53 = arith.constant 0 : index
    %c0_54 = arith.constant 0 : index
    %92 = vector.load %arg14[%c0_53, %c0_54] : memref<1x32xf32, #tpu.memory_space<vmem>>, vector<1x32xf32>
    %93 = vector.broadcast %92 : vector<1x32xf32> to vector<6x32xf32>
    %94 = arith.addf %91, %93 : vector<6x32xf32>
    %c0_55 = arith.constant 0 : index
    %c0_56 = arith.constant 0 : index
    %95 = vector.load %arg18[%c0_55, %c0_56] : memref<32x32xf32, #tpu.memory_space<vmem>>, vector<32x32xf32>
    %96 = arith.truncf %94 : vector<6x32xf32> to vector<6x32xbf16>
    %97 = arith.truncf %95 : vector<32x32xf32> to vector<32x32xbf16>
    %cst_57 = arith.constant dense<0.000000e+00> : vector<6x32xf32>
    %98 = tpu.matmul %96, %97, %cst_57 {dimension_numbers = #tpu.dot_dimension_numbers<[1], [0], [0], [1], [0, 0, 1, 1], [], []>} : vector<6x32xbf16>, vector<32x32xbf16>, vector<6x32xf32> -> vector<6x32xf32>
    %c0_58 = arith.constant 0 : index
    %c0_59 = arith.constant 0 : index
    %99 = vector.load %arg19[%c0_58, %c0_59] : memref<1x32xf32, #tpu.memory_space<vmem>>, vector<1x32xf32>
    %100 = vector.broadcast %99 : vector<1x32xf32> to vector<6x32xf32>
    %101 = arith.addf %98, %100 : vector<6x32xf32>
    %c0_60 = arith.constant 0 : index
    %c0_61 = arith.constant 0 : index
    %102 = vector.load %arg20[%c0_60, %c0_61] : memref<6x64xf32, #tpu.memory_space<vmem>>, vector<6x32xf32>
    tpu.vector_store %arg20[%c0_60, %c0_61], %55 {strides = array<i32>} : memref<6x64xf32, #tpu.memory_space<vmem>>, vector<6x32xf32>,
    %c0_62 = arith.constant 0 : index
    %c32 = arith.constant 32 : index
    %103 = vector.load %arg20[%c0_62, %c32] : memref<6x64xf32, #tpu.memory_space<vmem>>, vector<6x32xf32>
    tpu.vector_store %arg20[%c0_62, %c32], %101 {strides = array<i32>} : memref<6x64xf32, #tpu.memory_space<vmem>>, vector<6x32xf32>,
    return
  }
}

</mosaic_0001>

<bundles_post_ra>
// kernel: ian_btm_forward.8
= control target key start
LH: loop header
LB: loop body
LE: loop exit
PB: predicated region body
PF: predicated region fallthrough
CT: control target
= control target key end

     0   :  { %vm33_vm0 = vcmask 261120   ;;  %s163_s1 = inlined_call_operand.vmem [shape: f32[32,128], index: 1, kind: input, shape index: {}]   ;;  %s164_s0 = inlined_call_operand.vmem [shape: f32[24,32], index: 0, kind: input, shape index: {}]   ;;  %s165_s2 = inlined_call_operand.vmem [shape: f32[1,128], index: 2, kind: input, shape index: {}]   ;;  %s166_s3 = inlined_call_operand.vmem [shape: f32[24,128], index: 3, kind: output, shape index: {}]  }
   0x1   :  { %v18_v0 = vld [vmem:[%s163_s1] sm:$0xff]  ;;  %v19_v1 = vld [vmem:[%s163_s1 + $0x8] sm:$0xff]  ;;  %v20_v2 = vld [vmem:[%s163_s1 + $0x10] sm:$0xff] }
   0x2   :  { %v24_v3 = vpack.c.bf16 %v19_v1, %v18_v0  ;;  %v21_v4 = vld [vmem:[%s163_s1 + $0x18] sm:$0xff]  ;;  %v15_v5 = vld [vmem:[%s164_s0] sm:$0xff]  ;;  %v16_v6 = vld [vmem:[%s164_s0 + $0x8] sm:$0xff] }
   0x3   :  { %v25_v7 = vpack.c.bf16 %v21_v4, %v20_v2  ;;  %v22_v8 = vpack.c.bf16 %v16_v6, %v15_v5  ;;  %v17_v9 = vld [vmem:[%s164_s0 + $0x10] sm:$0xff]  ;;  %v95_v11 = vld [vmem:[%s165_s2] ss:$0 sm:$0xff] }
   0x4   :  { %102 = vmatprep.subr.bf16.mxu0 %v24_v3  ;;  %v23_v10 = vpack.c.bf16 %v17_v9, %v17_v9 }
   0x5   :  { %103 = vmatpush3.bf16.msra.mxu0 %v24_v3  ;;  %106 = vmatprep.mubr.msk.bf16.mxu0 %vm33_vm0, %v22_v8 }
   0x6   :  { %104 = vmatprep.subr.bf16.mxu0 %v25_v7 }
   0x9   :  { %105 = vmatpush3.bf16.msra.mxu0 %v25_v7 }
   0xc   :  { %107 = vmatmul.mubr.msk.bf16.vlgmr.msra.gmra.mrb[0].mxu0 %vm33_vm0, %v23_v10 }
  0xdf   :  { %v108_v12 = vpop.f32.mrb[0].mxu0 }
  0xe0   :  { %v83_v13 = vadd.f32 %v108_v12, %v95_v11  ;;  %v74_v14 = vpop.f32.mrb[1].mxu0 }
  0xe1   :  { %v75_v15 = vadd.f32 %v95_v11, %v74_v14  ;;  %v109_v16 = vpop.f32.mrb[2].mxu0 }
  0xe2   :  { %90 = vst [vmem:[%s166_s3 + $0x10] sm:$0xff] %v83_v13  ;;  %v77_v17 = vpop.f32.mrb[3].mxu0 }
  0xe3   :  { %88 = vst [vmem:[%s166_s3] sm:$0xff] %v75_v15  ;;  %v78_v18 = vadd.f32 %v95_v11, %v77_v17 }
  0xe5   :  { %89 = vst [vmem:[%s166_s3 + $0x8] sm:$0xff] %v78_v18 }

// kernel: ian_btm_forward.6
= control target key start
LH: loop header
LB: loop body
LE: loop exit
PB: predicated region body
PF: predicated region fallthrough
CT: control target
= control target key end

     0   :  { %v97_v0 = vmov 0.0   ;;  %vm98_vm0 = vmmov 0   ;;  %vm31_vm1 = vcmask 261120   ;;  %s146_s1 = inlined_call_operand.vmem [shape: f32[32,128], index: 1, kind: input, shape index: {}]   ;;  %s147_s0 = inlined_call_operand.vmem [shape: f32[16,32], index: 0, kind: input, shape index: {}]   ;;  %s148_s2 = inlined_call_operand.vmem [shape: f32[1,128], index: 2, kind: input, shape index: {}]   ;;  %s149_s3 = inlined_call_operand.vmem [shape: f32[16,128], index: 3, kind: output, shape index: {}]  }
   0x1   :  { %87 = vmatprep.subr.bf16.mxu0 %v97_v0  ;;  %v17_v1 = vld [vmem:[%s146_s1] sm:$0xff]  ;;  %v18_v2 = vld [vmem:[%s146_s1 + $0x8] sm:$0xff]  ;;  %v19_v3 = vld [vmem:[%s146_s1 + $0x10] sm:$0xff]  ;;  %91 = vmatprep.mubr.msk.bf16.mxu0 %vm98_vm0, %v97_v0 }
   0x2   :  { %v22_v4 = vpack.c.bf16 %v18_v2, %v17_v1  ;;  %v20_v5 = vld [vmem:[%s146_s1 + $0x18] sm:$0xff]  ;;  %v15_v7 = vld [vmem:[%s147_s0] sm:$0xff]  ;;  %v16_v8 = vld [vmem:[%s147_s0 + $0x8] sm:$0xff] }
   0x3   :  { %v23_v6 = vpack.c.bf16 %v20_v5, %v19_v3  ;;  %v21_v9 = vpack.c.bf16 %v16_v8, %v15_v7  ;;  %v82_v10 = vld [vmem:[%s148_s2] ss:$0 sm:$0xff] }
   0x4   :  { %88 = vmatpush3.bf16.msra.mxu0 %v22_v4 }
   0x5   :  { %89 = vmatprep.subr.bf16.mxu0 %v97_v0 }
   0x8   :  { %90 = vmatpush3.bf16.msra.mxu0 %v23_v6 }
   0xb   :  { %92 = vmatmul.mubr.msk.bf16.vlgmr.msra.gmra.mrb[0].mxu0 %vm31_vm1, %v21_v9 }
  0xde   :  { %v69_v11 = vpop.f32.mrb[0].mxu0 }
  0xdf   :  { %v70_v12 = vadd.f32 %v82_v10, %v69_v11  ;;  %v93_v13 = vpop.f32.mrb[1].mxu0 }
  0xe0   :  { %v72_v14 = vpop.f32.mrb[2].mxu0 }
  0xe1   :  { %76 = vst [vmem:[%s149_s3] sm:$0xff] %v70_v12  ;;  %v73_v15 = vadd.f32 %v82_v10, %v72_v14  ;;  %v94_v16 = vpop.f32.mrb[3].mxu0 }
  0xe3   :  { %77 = vst [vmem:[%s149_s3 + $0x8] sm:$0xff] %v73_v15 }

// kernel: ian_btm_forward.9
= control target key start
LH: loop header
LB: loop body
LE: loop exit
PB: predicated region body
PF: predicated region fallthrough
CT: control target
= control target key end

     0   :  { %vm15_vm0 = vcmask 259072   ;;  %v531_v0 = vmov 0.0   ;;  %vm532_vm1 = vmmov 0   ;;  %vm28_vm2 = vcmask 261120   ;;  %s533_s21 = smov 64   ;;  %s534_s22 = smov 32   ;;  %s683_s2 = inlined_call_operand.vmem [shape: f32[32,128], index: 2, kind: input, shape index: {}]   ;;  %s684_s0 = inlined_call_operand.vmem [shape: f32[4,6,128], index: 0, kind: input, shape index: {}]   ;;  %s685_s1 = inlined_call_operand.vmem [shape: f32[4,6,1], index: 1, kind: input, shape index: {}]   ;;  %s686_s3 = inlined_call_operand.vmem [shape: f32[4,6,32], index: 3, kind: output, shape index: {}]  }
   0x1   :  { %459 = vmatprep.subr.bf16.mxu0 %v531_v0  ;;  %v18_v1 = vld [vmem:[%s683_s2] sm:$0xff]  ;;  %v19_v2 = vld [vmem:[%s683_s2 + $0x8] sm:$0xff]  ;;  %v20_v3 = vld [vmem:[%s683_s2 + $0x10] sm:$0xff]  ;;  %463 = vmatprep.mubr.msk.bf16.mxu0 %vm532_vm1, %v531_v0  ;;  %16 = vst.msk [vmem:[#allocation2] sm:$0x3f] %vm15_vm0, %v531_v0  ;;  %s535_s23 = smov 96  }
   0x2   :  { %17 = vst.msk [vmem:[#allocation3] sm:$0x3f] %vm15_vm0, %v531_v0  ;;  %v573_v4 = vpack.c.bf16 %v19_v2, %v18_v1  ;;  %v21_v5 = vld [vmem:[%s683_s2 + $0x18] sm:$0xff]  ;;  %467 = vmatprep.subr.bf16.mxu1 %v531_v0  ;;  %471 = vmatprep.mubr.msk.bf16.mxu1 %vm532_vm1, %v531_v0  ;;  %v26_v9 = vld [vmem:[%s684_s0] sm:$0x3f] }
   0x3   :  { %v23_v6 = vpack.c.bf16 %v21_v5, %v20_v3  ;;  %v432_v35 = vld [vmem:[%s684_s0 + $0x8] sm:$0x3f]  ;;  %v437_v60 = vld [vmem:[%s684_s0 + $0x10] sm:$0x3f] }
   0x4   :  { %460 = vmatpush3.bf16.msra.mxu0 %v573_v4  ;;  %468 = vmatpush3.bf16.msra.mxu1 %v573_v4 }
   0x5   :  { %461 = vmatprep.subr.bf16.mxu0 %v531_v0  ;;  %469 = vmatprep.subr.bf16.mxu1 %v531_v0 }
   0x8   :  { %462 = vmatpush3.bf16.msra.mxu0 %v23_v6  ;;  %v24_v7 = vld [vmem:[#allocation2] sm:$0x3f]  ;;  %470 = vmatpush3.bf16.msra.mxu1 %v23_v6 }
   0x9   :  { %v27_v8 = vpack.c.bf16 %v24_v7, %v24_v7  ;;  %475 = vmatprep.subr.bf16.mxu0 %v531_v0  ;;  %483 = vmatprep.subr.bf16.mxu1 %v531_v0  ;;  %v25_v16 = vld [vmem:[#allocation3] sm:$0x3f] }
   0xb   :  { %464 = vmatmul.mubr.msk.bf16.vlgmr.msra.gmra.mrb[0].mxu0 %vm28_vm2, %v27_v8 }
   0xc   :  { %476 = vmatpush3.bf16.msra.mxu0 %v573_v4  ;;  %479 = vmatprep.mubr.msk.bf16.mxu0 %vm532_vm1, %v531_v0 }
   0xd   :  { %477 = vmatprep.subr.bf16.mxu0 %v531_v0 }
  0x10   :  { %478 = vmatpush3.bf16.msra.mxu0 %v23_v6 }
  0xde   :  { %v66_v10 = vpop.f32.mrb[0].mxu0 }
  0xdf   :  { %v72_v11 = vadd.f32 %v66_v10, %v26_v9  ;;  %v465_v12 = vpop.f32.mrb[1].mxu0 }
  0xe0   :  { %v69_v13 = vpop.f32.mrb[2].mxu0 }
  0xe1   :  { %499 = vtanh.f32 %v72_v11  ;;  %v466_v14 = vpop.f32.mrb[3].mxu0  ;;  %v431_v17 = vmul.f32 -1.442695, %v72_v11 }
  0xe2   :  { %v536_v14 = vmov 0  }
  0xe3   :  { %501 = vpow2.f32 %v431_v17  ;;  %498 = vset.pattern.permute.xlu0 %v536_v14  ;;  %497 = vset.pattern.permute.xlu1 %v536_v14 }
  0xeb   :  { %v500_v15 = vpop.eup %499 }
  0xec   :  { %86 = vrot.lane.b32.xlu0 %v500_v15, %s533_s21 }
  0xed   :  { %v502_v18 = vpop.eup %501 }
  0xee   :  { %v76_v19 = vadd.f32 1.0, %v502_v18 }
  0xf0   :  { %81 = vrot.lane.b32.xlu0 %v25_v16, %s534_s22  ;;  %503 = vrcp.f32 %v76_v19  ;;  %v111_v19 = vld [vmem:[%s685_s1] sm:$0x3f] }
  0xfa   :  { %v504_v20 = vpop.eup %503 }
 0x15e   :  { %v87_v21 = vpop.permute.xlu0 %86 }
 0x15f   :  { %v89_v22 = vmul.f32 %v504_v20, %v87_v21  ;;  %v445_v21 = vld [vmem:[%s685_s1 + $0x18] sm:$0x3f] }
 0x161   :  { %91 = vrot.lane.b32.xlu1 %v89_v22, %s534_s22 }
 0x162   :  { %v82_v23 = vpop.permute.xlu0 %81 }
 0x163   :  { %v84_v24 = vmul.f32 %v504_v20, %v82_v23 }
 0x1d3   :  { %v92_v25 = vpop.permute.xlu1 %91 }
 0x1d4   :  { %v94_v26 = vadd.f32 %v92_v25, %v84_v24 }
 0x1d6   :  { %505 = vtanh.f32 %v94_v26 }
 0x1e0   :  { %v506_v27 = vpop.eup %505 }
 0x1e1   :  { %97 = vrot.lane.b32.xlu1 %v506_v27, %s533_s21 }
 0x1e5   :  { %107 = vrot.lane.b32.xlu1 %v94_v26, %s535_s23 }
 0x253   :  { %v98_v28 = vpop.permute.xlu1 %97 }
 0x254   :  { %v600_v29 = vmul.f32 %v504_v20, %v98_v28  ;;  %v440_v20 = vld [vmem:[%s685_s1 + $0x10] sm:$0x3f] }
 0x256   :  { %102 = vrot.lane.b32.xlu0 %v600_v29, %s534_s22 }
 0x257   :  { %v108_v30 = vpop.permute.xlu1 %107 }
 0x258   :  { %110 = vst.msk [vmem:[#allocation3] sm:$0x3f] %vm15_vm0, %v108_v30 }
 0x25f   :  { %v124_v31 = vld [vmem:[#allocation3] sm:$0x3f] }
 0x260   :  { %180 = vrot.lane.b32.xlu1 %v124_v31, %s534_s22 }
 0x2c8   :  { %v103_v32 = vpop.permute.xlu0 %102 }
 0x2c9   :  { %105 = vst.msk [vmem:[#allocation2] sm:$0x3f] %vm15_vm0, %v103_v32 }
 0x2d0   :  { %v123_v33 = vld [vmem:[#allocation2] sm:$0x3f] }
 0x2d1   :  { %v127_v34 = vpack.c.bf16 %v123_v33, %v123_v33 }
 0x2d2   :  { %v181_v48 = vpop.permute.xlu1 %180 }
 0x2d3   :  { %472 = vmatmul.mubr.msk.bf16.vlgmr.msra.gmra.mrb[0].mxu1 %vm28_vm2, %v127_v34 }
 0x2d4   :  { %484 = vmatpush3.bf16.msra.mxu1 %v573_v4  ;;  %487 = vmatprep.mubr.msk.bf16.mxu1 %vm532_vm1, %v531_v0 }
 0x2d5   :  { %485 = vmatprep.subr.bf16.mxu1 %v531_v0 }
 0x2d8   :  { %486 = vmatpush3.bf16.msra.mxu1 %v23_v6 }
 0x3a6   :  { %v165_v36 = vpop.f32.mrb[0].mxu1 }
 0x3a7   :  { %v171_v37 = vadd.f32 %v432_v35, %v165_v36  ;;  %v473_v38 = vpop.f32.mrb[1].mxu1 }
 0x3a8   :  { %v168_v39 = vpop.f32.mrb[2].mxu1 }
 0x3a9   :  { %507 = vtanh.f32 %v171_v37  ;;  %v474_v40 = vpop.f32.mrb[3].mxu1  ;;  %v434_v42 = vmul.f32 -1.442695, %v171_v37 }
 0x3ab   :  { %509 = vpow2.f32 %v434_v42 }
 0x3b3   :  { %v508_v41 = vpop.eup %507 }
 0x3b4   :  { %185 = vrot.lane.b32.xlu0 %v508_v41, %s533_s21 }
 0x3b5   :  { %v510_v43 = vpop.eup %509 }
 0x3b6   :  { %v175_v44 = vadd.f32 1.0, %v510_v43 }
 0x3b8   :  { %511 = vrcp.f32 %v175_v44 }
 0x3c2   :  { %v512_v45 = vpop.eup %511 }
 0x3c3   :  { %v183_v49 = vmul.f32 %v512_v45, %v181_v48 }
 0x426   :  { %v186_v46 = vpop.permute.xlu0 %185 }
 0x427   :  { %v188_v47 = vmul.f32 %v512_v45, %v186_v46  ;;  %v435_v46 = vld [vmem:[%s685_s1 + $0x8] sm:$0x3f] }
 0x429   :  { %190 = vrot.lane.b32.xlu0 %v188_v47, %s534_s22 }
 0x49b   :  { %v191_v50 = vpop.permute.xlu0 %190 }
 0x49c   :  { %v193_v51 = vadd.f32 %v191_v50, %v183_v49 }
 0x49e   :  { %513 = vtanh.f32 %v193_v51 }
 0x4a8   :  { %v514_v52 = vpop.eup %513 }
 0x4a9   :  { %196 = vrot.lane.b32.xlu1 %v514_v52, %s533_s21 }
 0x4ad   :  { %206 = vrot.lane.b32.xlu1 %v193_v51, %s535_s23 }
 0x51b   :  { %v197_v53 = vpop.permute.xlu1 %196 }
 0x51c   :  { %v619_v54 = vmul.f32 %v512_v45, %v197_v53 }
 0x51e   :  { %201 = vrot.lane.b32.xlu0 %v619_v54, %s534_s22 }
 0x51f   :  { %v207_v55 = vpop.permute.xlu1 %206 }
 0x520   :  { %209 = vst.msk [vmem:[#allocation3] sm:$0x3f] %vm15_vm0, %v207_v55 }
 0x527   :  { %v225_v56 = vld [vmem:[#allocation3] sm:$0x3f] }
 0x528   :  { %281 = vrot.lane.b32.xlu1 %v225_v56, %s534_s22 }
 0x590   :  { %v202_v57 = vpop.permute.xlu0 %201 }
 0x591   :  { %204 = vst.msk [vmem:[#allocation2] sm:$0x3f] %vm15_vm0, %v202_v57 }
 0x598   :  { %v224_v58 = vld [vmem:[#allocation2] sm:$0x3f] }
 0x599   :  { %v228_v59 = vpack.c.bf16 %v224_v58, %v224_v58 }
 0x59a   :  { %v282_v9 = vpop.permute.xlu1 %281 }
 0x59b   :  { %480 = vmatmul.mubr.msk.bf16.vlgmr.msra.gmra.mrb[4].mxu0 %vm28_vm2, %v228_v59 }
 0x66e   :  { %v266_v61 = vpop.f32.mrb[4].mxu0 }
 0x66f   :  { %v272_v62 = vadd.f32 %v437_v60, %v266_v61  ;;  %v481_v63 = vpop.f32.mrb[5].mxu0 }
 0x670   :  { %v269_v0 = vpop.f32.mrb[6].mxu0 }
 0x671   :  { %515 = vtanh.f32 %v272_v62  ;;  %v482_v1 = vpop.f32.mrb[7].mxu0  ;;  %v439_v3 = vmul.f32 -1.442695, %v272_v62 }
 0x673   :  { %517 = vpow2.f32 %v439_v3 }
 0x67b   :  { %v516_v2 = vpop.eup %515 }
 0x67c   :  { %286 = vrot.lane.b32.xlu0 %v516_v2, %s533_s21 }
 0x67d   :  { %v518_v4 = vpop.eup %517 }
 0x67e   :  { %v276_v5 = vadd.f32 1.0, %v518_v4 }
 0x680   :  { %519 = vrcp.f32 %v276_v5 }
 0x68a   :  { %v520_v6 = vpop.eup %519 }
 0x68b   :  { %v284_v10 = vmul.f32 %v520_v6, %v282_v9 }
 0x6ee   :  { %v287_v7 = vpop.permute.xlu0 %286 }
 0x6ef   :  { %v289_v8 = vmul.f32 %v520_v6, %v287_v7 }
 0x6f1   :  { %291 = vrot.lane.b32.xlu0 %v289_v8, %s534_s22 }
 0x763   :  { %v292_v11 = vpop.permute.xlu0 %291 }
 0x764   :  { %v294_v12 = vadd.f32 %v292_v11, %v284_v10 }
 0x766   :  { %521 = vtanh.f32 %v294_v12 }
 0x770   :  { %v522_v13 = vpop.eup %521 }
 0x771   :  { %297 = vrot.lane.b32.xlu1 %v522_v13, %s533_s21 }
 0x775   :  { %307 = vrot.lane.b32.xlu1 %v294_v12, %s535_s23 }
 0x7e3   :  { %v298_v15 = vpop.permute.xlu1 %297 }
 0x7e4   :  { %v300_v16 = vmul.f32 %v520_v6, %v298_v15 }
 0x7e6   :  { %302 = vrot.lane.b32.xlu0 %v300_v16, %s534_s22 }
 0x7e7   :  { %v308_v17 = vpop.permute.xlu1 %307 }
 0x7e8   :  { %310 = vst.msk [vmem:[#allocation3] sm:$0x3f] %vm15_vm0, %v308_v17 }
 0x7ef   :  { %v326_v18 = vld [vmem:[#allocation3] sm:$0x3f] }
 0x7f0   :  { %382 = vrot.lane.b32.xlu1 %v326_v18, %s534_s22 }
 0x7f4   :  { %114 = vperm.xlu1 %497, %v111_v19  }
 0x7f8   :  { %315 = vperm.xlu1 %497, %v440_v20  }
 0x7fc   :  { %416 = vperm.xlu1 %497, %v445_v21  }
 0x858   :  { %v303_v22 = vpop.permute.xlu0 %302 }
 0x859   :  { %305 = vst.msk [vmem:[#allocation2] sm:$0x3f] %vm15_vm0, %v303_v22 }
 0x860   :  { %v325_v23 = vld [vmem:[#allocation2] sm:$0x3f] }
 0x861   :  { %v329_v24 = vpack.c.bf16 %v325_v23, %v325_v23 }
 0x862   :  { %v383_v25 = vpop.permute.xlu1 %382 }
 0x863   :  { %488 = vmatmul.mubr.msk.bf16.vlgmr.msra.gmra.mrb[4].mxu1 %vm28_vm2, %v329_v24 }
 0x873   :  { %v115_v26 = vpop.permute.xlu1 %114 }
 0x874   :  { %v117_v27 = vmul.f32 %v115_v26, %v600_v29  ;;  %v442_v29 = vld [vmem:[%s684_s0 + $0x18] sm:$0x3f] }
 0x876   :  { %119 = vrot.lane.b32.xlu1 %v117_v27, %s534_s22 }
 0x877   :  { %v316_v28 = vpop.permute.xlu1 %315 }
 0x878   :  { %v318_v30 = vmul.f32 %v316_v28, %v300_v16 }
 0x87a   :  { %320 = vrot.lane.b32.xlu1 %v318_v30, %s534_s22 }
 0x87b   :  { %v417_v31 = vpop.permute.xlu1 %416 }
 0x8e8   :  { %v120_v32 = vpop.permute.xlu1 %119 }
 0x8e9   :  { %122 = vst.msk [vmem:[%s686_s3] sm:$0x3f] %vm15_vm0, %v120_v32 }
 0x8ec   :  { %v321_v33 = vpop.permute.xlu1 %320 }
 0x8ed   :  { %441 = vst.msk [vmem:[%s686_s3 + $0x10] sm:$0x3f] %vm15_vm0, %v321_v33 }
 0x936   :  { %v367_v34 = vpop.f32.mrb[4].mxu1 }
 0x937   :  { %v373_v35 = vadd.f32 %v442_v29, %v367_v34  ;;  %v489_v36 = vpop.f32.mrb[5].mxu1 }
 0x938   :  { %v370_v37 = vpop.f32.mrb[6].mxu1 }
 0x939   :  { %523 = vtanh.f32 %v373_v35  ;;  %v490_v38 = vpop.f32.mrb[7].mxu1  ;;  %v444_v40 = vmul.f32 -1.442695, %v373_v35 }
 0x93b   :  { %525 = vpow2.f32 %v444_v40 }
 0x943   :  { %v524_v39 = vpop.eup %523 }
 0x944   :  { %387 = vrot.lane.b32.xlu0 %v524_v39, %s533_s21 }
 0x945   :  { %v526_v41 = vpop.eup %525 }
 0x946   :  { %v377_v42 = vadd.f32 1.0, %v526_v41 }
 0x948   :  { %527 = vrcp.f32 %v377_v42 }
 0x952   :  { %v528_v43 = vpop.eup %527 }
 0x953   :  { %v385_v47 = vmul.f32 %v528_v43, %v383_v25 }
 0x9b6   :  { %v388_v44 = vpop.permute.xlu0 %387 }
 0x9b7   :  { %v390_v45 = vmul.f32 %v528_v43, %v388_v44 }
 0x9b9   :  { %392 = vrot.lane.b32.xlu0 %v390_v45, %s534_s22 }
 0x9bd   :  { %214 = vperm.xlu0 %498, %v435_v46  }
 0xa2b   :  { %v393_v48 = vpop.permute.xlu0 %392 }
 0xa2c   :  { %v395_v49 = vadd.f32 %v393_v48, %v385_v47 }
 0xa2e   :  { %529 = vtanh.f32 %v395_v49  ;;  %408 = vrot.lane.b32.xlu1 %v395_v49, %s535_s23 }
 0xa38   :  { %v530_v50 = vpop.eup %529 }
 0xa39   :  { %398 = vrot.lane.b32.xlu0 %v530_v50, %s533_s21 }
 0xa3c   :  { %v215_v51 = vpop.permute.xlu0 %214 }
 0xa3d   :  { %v217_v52 = vmul.f32 %v215_v51, %v619_v54 }
 0xa3f   :  { %219 = vrot.lane.b32.xlu0 %v217_v52, %s534_s22 }
 0xaa0   :  { %v409_v53 = vpop.permute.xlu1 %408 }
 0xaa1   :  { %411 = vst.msk [vmem:[#allocation3] sm:$0x3f] %vm15_vm0, %v409_v53 }
 0xaab   :  { %v399_v55 = vpop.permute.xlu0 %398 }
 0xaac   :  { %v401_v56 = vmul.f32 %v528_v43, %v399_v55 }
 0xaae   :  { %403 = vrot.lane.b32.xlu0 %v401_v56, %s534_s22  ;;  %v419_v57 = vmul.f32 %v417_v31, %v401_v56 }
 0xab1   :  { %v220_v58 = vpop.permute.xlu0 %219 }
 0xab2   :  { %436 = vst.msk [vmem:[%s686_s3 + $0x8] sm:$0x3f] %vm15_vm0, %v220_v58  ;;  %421 = vrot.lane.b32.xlu0 %v419_v57, %s534_s22 }
 0xb20   :  { %v404_v59 = vpop.permute.xlu0 %403 }
 0xb21   :  { %406 = vst.msk [vmem:[#allocation2] sm:$0x3f] %vm15_vm0, %v404_v59 }
 0xb24   :  { %v422_v54 = vpop.permute.xlu0 %421 }
 0xb25   :  { %446 = vst.msk [vmem:[%s686_s3 + $0x18] sm:$0x3f] %vm15_vm0, %v422_v54 }

// kernel: ian_btm_forward.11
= control target key start
LH: loop header
LB: loop body
LE: loop exit
PB: predicated region body
PF: predicated region fallthrough
CT: control target
= control target key end

     0   :  { %v162_v3 = vmov 0   ;;  %s274_s0 = inlined_call_operand.vmem [shape: f32[2,192], index: 0, kind: input, shape index: {}]   ;;  %s275_s1 = inlined_call_operand.vmem [shape: f32[192,3], index: 1, kind: input, shape index: {}]   ;;  %s276_s2 = inlined_call_operand.vmem [shape: f32[1,3], index: 2, kind: input, shape index: {}]   ;;  %s277_s3 = inlined_call_operand.hbm [shape: f32[2,3], index: 3, kind: output, shape index: {}]  }
   0x1   :  { %v17_v0 = vld [vmem:[%s275_s1] sm:$0xff]  ;;  %v18_v1 = vld [vmem:[%s275_s1 + $0x8] sm:$0xff]  ;;  %v19_v2 = vld [vmem:[%s275_s1 + $0x10] sm:$0xff]  ;;  %77 = vmatprep.subr.bf16.mxu0 %v162_v3 }
   0x2   :  { %v54_v4 = vpack.c.bf16 %v18_v1, %v17_v0  ;;  %v20_v5 = vld [vmem:[%s275_s1 + $0x18] sm:$0xff]  ;;  %v21_v7 = vld [vmem:[%s275_s1 + $0x20] sm:$0xff]  ;;  %v22_v8 = vld [vmem:[%s275_s1 + $0x28] sm:$0xff] }
   0x3   :  { %v55_v6 = vpack.c.bf16 %v20_v5, %v19_v2  ;;  %v56_v9 = vpack.c.bf16 %v22_v8, %v21_v7  ;;  %v23_v10 = vld [vmem:[%s275_s1 + $0x30] sm:$0xff]  ;;  %v24_v11 = vld [vmem:[%s275_s1 + $0x38] sm:$0xff]  ;;  %v133_v12 = vld.sshfl [vmem:[%s274_s0] sm:$0x33 pattern:$0x76325410] }
   0x4   :  { %78 = vmatpush1.bf16.msra.mxu0 %v54_v4  ;;  %v49_v13 = vcombine.high %v133_v12, %v133_v12 }
   0x5   :  { %79 = vmatprep.subr.bf16.mxu0 %v162_v3 }
   0x8   :  { %80 = vmatpush1.bf16.msra.mxu0 %v55_v6 }
   0x9   :  { %81 = vmatprep.subr.bf16.mxu0 %v162_v3 }
   0xa   :  { %8 = vsyncpa [#allocation3], 0  ;;  %vm73_vm0 = vcmask 523264   ;;  %v57_v14 = vpack.c.bf16 %v24_v11, %v23_v10  ;;  %v53_v15 = vpack.c.bf16 %v49_v13, %v49_v13  ;;  %v25_v16 = vld [vmem:[%s275_s1 + $0x40] sm:$0xff]  ;;  %v26_v17 = vld [vmem:[%s275_s1 + $0x48] sm:$0xff]  ;;  %v52_v40 = vpack.c.bf16 %v133_v12, %v133_v12  ;;  %s163_s8 = smov [#allocation2]  }
   0xb   :  { %v58_v18 = vpack.c.bf16 %v26_v17, %v25_v16  ;;  %v27_v19 = vld [vmem:[%s275_s1 + $0x50] sm:$0xff]  ;;  %v28_v20 = vld [vmem:[%s275_s1 + $0x58] sm:$0xff]  ;;  %v29_v22 = vld [vmem:[%s275_s1 + $0x60] sm:$0xff]  ;;  %s125_s9 = sshll.u32 %s163_s8, 4  ;;  %vm117_vm1 = vcmask 17408   ;;  %s126_s9 = int_to_ptr.vmem [resolvable:$true] %s125_s9 }
   0xc   :  { %82 = vmatpush1.bf16.msra.mxu0 %v56_v9  ;;  %135 = vmatprep.mubr.msk.bf16.mxu0 %vm73_vm0, %v53_v15  ;;  %v59_v21 = vpack.c.bf16 %v28_v20, %v27_v19  ;;  %v30_v23 = vld [vmem:[%s275_s1 + $0x68] sm:$0xff]  ;;  %v31_v25 = vld [vmem:[%s275_s1 + $0x70] sm:$0xff]  ;;  %v32_v26 = vld [vmem:[%s275_s1 + $0x78] sm:$0xff]  ;;  %p143_p1 = scmp.lt.s32.totalorder %s126_s9, %s126_s9 }
   0xd   :  { %83 = vmatprep.subr.bf16.mxu0 %v162_v3  ;;  %v60_v24 = vpack.c.bf16 %v30_v23, %v29_v22  ;;  %v61_v27 = vpack.c.bf16 %v32_v26, %v31_v25  ;;  %v33_v28 = vld [vmem:[%s275_s1 + $0x80] sm:$0xff]  ;;  %v34_v29 = vld [vmem:[%s275_s1 + $0x88] sm:$0xff]  ;;  %v35_v31 = vld [vmem:[%s275_s1 + $0x90] sm:$0xff] }
   0xe   :  { %v62_v30 = vpack.c.bf16 %v34_v29, %v33_v28  ;;  %v36_v32 = vld [vmem:[%s275_s1 + $0x98] sm:$0xff]  ;;  %v37_v34 = vld [vmem:[%s275_s1 + $0xa0] sm:$0xff]  ;;  %v38_v35 = vld [vmem:[%s275_s1 + $0xa8] sm:$0xff] }
   0xf   :  { %v63_v33 = vpack.c.bf16 %v36_v32, %v35_v31  ;;  %v64_v36 = vpack.c.bf16 %v38_v35, %v37_v34  ;;  %v39_v37 = vld [vmem:[%s275_s1 + $0xb0] sm:$0xff]  ;;  %v40_v38 = vld [vmem:[%s275_s1 + $0xb8] sm:$0xff]  ;;  %v134_v41 = vld [vmem:[%s276_s2] ss:$0 sm:$0xff]  ;;  %s138_s1 = scalar_lea.vmem %s126_s9, 32 }
  0x10   :  { %84 = vmatpush1.bf16.msra.mxu0 %v57_v14  ;;  %v65_v39 = vpack.c.bf16 %v40_v38, %v39_v37  ;;  %p139_p0 = scmp.ne.s32.totalorder %s126_s9, %s138_s1  ;;  %p144_p2 = scmp.lt.s32.totalorder %s138_s1, %s138_s1 }
  0x11   :  { %85 = vmatprep.subr.bf16.mxu0 %v162_v3 }
  0x12   :  { %p145_p3 = por %p144_p2, %p143_p1 }
  0x14   :  { %86 = vmatpush1.bf16.msra.mxu0 %v58_v18  ;;  %p146_p4 = pnand %p145_p3, %p139_p0 }
  0x15   :  { %87 = vmatprep.subr.bf16.mxu0 %v162_v3 }
  0x18   :  { %88 = vmatpush1.bf16.msra.mxu0 %v59_v21 }
  0x19   :  { %89 = vmatprep.subr.bf16.mxu0 %v162_v3 }
  0x1c   :  { %90 = vmatpush1.bf16.msra.mxu0 %v60_v24 }
  0x1d   :  { %91 = vmatprep.subr.bf16.mxu0 %v162_v3 }
  0x20   :  { %92 = vmatpush1.bf16.msra.mxu0 %v61_v27 }
  0x21   :  { %93 = vmatprep.subr.bf16.mxu0 %v162_v3 }
  0x24   :  { %94 = vmatpush1.bf16.msra.mxu0 %v62_v30 }
  0x25   :  { %95 = vmatprep.subr.bf16.mxu0 %v162_v3 }
  0x28   :  { %96 = vmatpush1.bf16.msra.mxu0 %v63_v33 }
  0x29   :  { %97 = vmatprep.subr.bf16.mxu0 %v162_v3 }
  0x2c   :  { %98 = vmatpush1.bf16.msra.mxu0 %v64_v36 }
  0x2d   :  { %99 = vmatprep.subr.bf16.mxu0 %v162_v3 }
  0x30   :  { %100 = vmatpush1.bf16.msra.mxu0 %v65_v39 }
  0x33   :  { %110 = vmatmul.mubr.bf16.vlgmr.msra.gmra.mrb[0].mxu0 %v52_v40 }
 0x106   :  { %v111_v42 = vpop.f32.mrb[0].mxu0 }
 0x107   :  { %v112_v43 = vadd.f32 %v134_v41, %v111_v42  ;;  %v113_v44 = vpop.f32.mrb[1].mxu0 }
 0x108   :  { %v114_v45 = vpop.f32.mrb[2].mxu0 }
 0x109   :  { %v115_v46 = vpop.f32.mrb[3].mxu0  ;;  %118 = vst.msk [vmem:[#allocation2] sm:$0x3] %vm117_vm1, %v112_v43 }
 0x10a   :  { %149 = shalt.err (!%p146_p4)
}
 0x10b   :  { %s150_s2 = scalar_lea.hbm %s277_s3, 32 }
 0x10c   :  { %p151_p5 = scmp.ne.s32.totalorder %s277_s3, %s150_s2  ;;  %p154_p6 = scmp.lt.u32.totalorder %s150_s2, %s277_s3 }
 0x10e   :  { %p156_p7 = pnand %p154_p6, %p151_p5 }
 0x110   :  { %159 = shalt.err (!%p156_p7)
}
 0x111   :  { %128 = dma.vmem_to_hbm [thread:$0]  %s126_s9, 32, %s277_s3, [#allocation3]  }
 0x112   :  { %160 = dma.done.wait [#allocation3], 32  }
 0x113   :  { %161 = vsyncadd [#allocation3], 4294967264 }
 0x114   :  { %132 = vsyncpa [#allocation3], 1 }

// kernel: ian_btm_forward.7
= control target key start
LH: loop header
LB: loop body
LE: loop exit
PB: predicated region body
PF: predicated region fallthrough
CT: control target
= control target key end

     0   :  { %vm15_vm0 = vcmask 254976   ;;  %v1031_v0 = vmov 0.0   ;;  %vm1032_vm1 = vmmov 0   ;;  %vm28_vm2 = vcmask 261120   ;;  %s1033_s21 = smov 64   ;;  %s1034_s22 = smov 32   ;;  %s1313_s2 = inlined_call_operand.vmem [shape: f32[32,128], index: 2, kind: input, shape index: {}]   ;;  %s1314_s0 = inlined_call_operand.vmem [shape: f32[8,2,128], index: 0, kind: input, shape index: {}]   ;;  %s1315_s1 = inlined_call_operand.vmem [shape: f32[8,2,1], index: 1, kind: input, shape index: {}]   ;;  %s1316_s3 = inlined_call_operand.vmem [shape: f32[8,2,32], index: 3, kind: output, shape index: {}]  }
   0x1   :  { %895 = vmatprep.subr.bf16.mxu0 %v1031_v0  ;;  %v18_v1 = vld [vmem:[%s1313_s2] sm:$0xff]  ;;  %v19_v2 = vld [vmem:[%s1313_s2 + $0x8] sm:$0xff]  ;;  %v20_v3 = vld [vmem:[%s1313_s2 + $0x10] sm:$0xff]  ;;  %899 = vmatprep.mubr.msk.bf16.mxu0 %vm1032_vm1, %v1031_v0  ;;  %16 = vst.msk [vmem:[#allocation2] sm:$0x3] %vm15_vm0, %v1031_v0  ;;  %s1035_s23 = smov 96  }
   0x2   :  { %17 = vst.msk [vmem:[#allocation3] sm:$0x3] %vm15_vm0, %v1031_v0  ;;  %v1073_v4 = vpack.c.bf16 %v19_v2, %v18_v1  ;;  %v21_v5 = vld [vmem:[%s1313_s2 + $0x18] sm:$0xff]  ;;  %903 = vmatprep.subr.bf16.mxu1 %v1031_v0  ;;  %907 = vmatprep.mubr.msk.bf16.mxu1 %vm1032_vm1, %v1031_v0  ;;  %v26_v9 = vld [vmem:[%s1314_s0] sm:$0x3] }
   0x3   :  { %v1082_v6 = vpack.c.bf16 %v21_v5, %v20_v3  ;;  %v836_v35 = vld [vmem:[%s1314_s0 + $0x2] sm:$0x3]  ;;  %v841_v60 = vld [vmem:[%s1314_s0 + $0x4] sm:$0x3] }
   0x4   :  { %896 = vmatpush3.bf16.msra.mxu0 %v1073_v4  ;;  %904 = vmatpush3.bf16.msra.mxu1 %v1073_v4 }
   0x5   :  { %897 = vmatprep.subr.bf16.mxu0 %v1031_v0  ;;  %905 = vmatprep.subr.bf16.mxu1 %v1031_v0 }
   0x8   :  { %898 = vmatpush3.bf16.msra.mxu0 %v1082_v6  ;;  %v24_v7 = vld [vmem:[#allocation2] sm:$0x3]  ;;  %906 = vmatpush3.bf16.msra.mxu1 %v1082_v6 }
   0x9   :  { %v27_v8 = vpack.c.bf16 %v24_v7, %v24_v7  ;;  %911 = vmatprep.subr.bf16.mxu0 %v1031_v0  ;;  %919 = vmatprep.subr.bf16.mxu1 %v1031_v0  ;;  %v25_v16 = vld [vmem:[#allocation3] sm:$0x3] }
   0xb   :  { %900 = vmatmul.mubr.msk.bf16.vlgmr.msra.gmra.mrb[0].mxu0 %vm28_vm2, %v27_v8 }
   0xc   :  { %912 = vmatpush3.bf16.msra.mxu0 %v1073_v4  ;;  %915 = vmatprep.mubr.msk.bf16.mxu0 %vm1032_vm1, %v1031_v0 }
   0xd   :  { %913 = vmatprep.subr.bf16.mxu0 %v1031_v0 }
  0x10   :  { %914 = vmatpush3.bf16.msra.mxu0 %v1082_v6 }
  0x11   :  { %927 = vmatprep.subr.bf16.mxu0 %v1031_v0 }
  0xde   :  { %v66_v10 = vpop.f32.mrb[0].mxu0 }
  0xdf   :  { %v72_v11 = vadd.f32 %v66_v10, %v26_v9  ;;  %v901_v12 = vpop.f32.mrb[1].mxu0 }
  0xe0   :  { %v69_v13 = vpop.f32.mrb[2].mxu0 }
  0xe1   :  { %967 = vtanh.f32 %v72_v11  ;;  %v902_v14 = vpop.f32.mrb[3].mxu0  ;;  %v835_v17 = vmul.f32 -1.442695, %v72_v11 }
  0xe3   :  { %969 = vpow2.f32 %v835_v17 }
  0xeb   :  { %v968_v15 = vpop.eup %967 }
  0xec   :  { %86 = vrot.lane.b32.xlu0 %v968_v15, %s1033_s21 }
  0xed   :  { %v970_v18 = vpop.eup %969 }
  0xee   :  { %v76_v19 = vadd.f32 1.0, %v970_v18 }
  0xf0   :  { %81 = vrot.lane.b32.xlu0 %v25_v16, %s1034_s22  ;;  %971 = vrcp.f32 %v76_v19 }
  0xfa   :  { %v972_v20 = vpop.eup %971 }
 0x15e   :  { %v87_v21 = vpop.permute.xlu0 %86 }
 0x15f   :  { %v89_v22 = vmul.f32 %v972_v20, %v87_v21 }
 0x161   :  { %91 = vrot.lane.b32.xlu1 %v89_v22, %s1034_s22 }
 0x162   :  { %v82_v23 = vpop.permute.xlu0 %81 }
 0x163   :  { %v84_v24 = vmul.f32 %v972_v20, %v82_v23 }
 0x1d3   :  { %v92_v25 = vpop.permute.xlu1 %91 }
 0x1d4   :  { %v94_v26 = vadd.f32 %v92_v25, %v84_v24  ;;  %v846_v24 = vld [vmem:[%s1314_s0 + $0x6] sm:$0x3] }
 0x1d6   :  { %973 = vtanh.f32 %v94_v26 }
 0x1e0   :  { %v974_v27 = vpop.eup %973 }
 0x1e1   :  { %97 = vrot.lane.b32.xlu1 %v974_v27, %s1033_s21 }
 0x1e5   :  { %107 = vrot.lane.b32.xlu1 %v94_v26, %s1035_s23 }
 0x253   :  { %v98_v28 = vpop.permute.xlu1 %97 }
 0x254   :  { %v1106_v29 = vmul.f32 %v972_v20, %v98_v28 }
 0x256   :  { %102 = vrot.lane.b32.xlu0 %v1106_v29, %s1034_s22 }
 0x257   :  { %v108_v30 = vpop.permute.xlu1 %107 }
 0x258   :  { %110 = vst.msk [vmem:[#allocation3] sm:$0x3] %vm15_vm0, %v108_v30 }
 0x25f   :  { %v124_v31 = vld [vmem:[#allocation3] sm:$0x3] }
 0x260   :  { %180 = vrot.lane.b32.xlu1 %v124_v31, %s1034_s22 }
 0x2c8   :  { %v103_v32 = vpop.permute.xlu0 %102 }
 0x2c9   :  { %105 = vst.msk [vmem:[#allocation2] sm:$0x3] %vm15_vm0, %v103_v32 }
 0x2d0   :  { %v123_v33 = vld [vmem:[#allocation2] sm:$0x3] }
 0x2d1   :  { %v127_v34 = vpack.c.bf16 %v123_v33, %v123_v33 }
 0x2d2   :  { %v181_v48 = vpop.permute.xlu1 %180 }
 0x2d3   :  { %908 = vmatmul.mubr.msk.bf16.vlgmr.msra.gmra.mrb[0].mxu1 %vm28_vm2, %v127_v34 }
 0x2d4   :  { %920 = vmatpush3.bf16.msra.mxu1 %v1073_v4  ;;  %923 = vmatprep.mubr.msk.bf16.mxu1 %vm1032_vm1, %v1031_v0 }
 0x2d5   :  { %921 = vmatprep.subr.bf16.mxu1 %v1031_v0 }
 0x2d8   :  { %922 = vmatpush3.bf16.msra.mxu1 %v1082_v6 }
 0x2d9   :  { %935 = vmatprep.subr.bf16.mxu1 %v1031_v0 }
 0x3a6   :  { %v165_v36 = vpop.f32.mrb[0].mxu1 }
 0x3a7   :  { %v171_v37 = vadd.f32 %v836_v35, %v165_v36  ;;  %v909_v38 = vpop.f32.mrb[1].mxu1 }
 0x3a8   :  { %v168_v39 = vpop.f32.mrb[2].mxu1 }
 0x3a9   :  { %975 = vtanh.f32 %v171_v37  ;;  %v910_v40 = vpop.f32.mrb[3].mxu1  ;;  %v838_v42 = vmul.f32 -1.442695, %v171_v37 }
 0x3ab   :  { %977 = vpow2.f32 %v838_v42 }
 0x3b3   :  { %v976_v41 = vpop.eup %975 }
 0x3b4   :  { %185 = vrot.lane.b32.xlu0 %v976_v41, %s1033_s21 }
 0x3b5   :  { %v978_v43 = vpop.eup %977 }
 0x3b6   :  { %v175_v44 = vadd.f32 1.0, %v978_v43 }
 0x3b8   :  { %979 = vrcp.f32 %v175_v44 }
 0x3c2   :  { %v980_v45 = vpop.eup %979 }
 0x3c3   :  { %v183_v49 = vmul.f32 %v980_v45, %v181_v48 }
 0x426   :  { %v186_v46 = vpop.permute.xlu0 %185 }
 0x427   :  { %v188_v47 = vmul.f32 %v980_v45, %v186_v46 }
 0x429   :  { %190 = vrot.lane.b32.xlu0 %v188_v47, %s1034_s22 }
 0x49b   :  { %v191_v50 = vpop.permute.xlu0 %190 }
 0x49c   :  { %v193_v51 = vadd.f32 %v191_v50, %v183_v49  ;;  %v851_v50 = vld [vmem:[%s1314_s0 + $0x8] sm:$0x3] }
 0x49e   :  { %981 = vtanh.f32 %v193_v51 }
 0x4a8   :  { %v982_v52 = vpop.eup %981 }
 0x4a9   :  { %196 = vrot.lane.b32.xlu1 %v982_v52, %s1033_s21 }
 0x4ad   :  { %206 = vrot.lane.b32.xlu1 %v193_v51, %s1035_s23 }
 0x51b   :  { %v197_v53 = vpop.permute.xlu1 %196 }
 0x51c   :  { %v1127_v54 = vmul.f32 %v980_v45, %v197_v53 }
 0x51e   :  { %201 = vrot.lane.b32.xlu0 %v1127_v54, %s1034_s22 }
 0x51f   :  { %v207_v55 = vpop.permute.xlu1 %206 }
 0x520   :  { %209 = vst.msk [vmem:[#allocation3] sm:$0x3] %vm15_vm0, %v207_v55 }
 0x527   :  { %v225_v56 = vld [vmem:[#allocation3] sm:$0x3] }
 0x528   :  { %281 = vrot.lane.b32.xlu1 %v225_v56, %s1034_s22 }
 0x590   :  { %v202_v57 = vpop.permute.xlu0 %201 }
 0x591   :  { %204 = vst.msk [vmem:[#allocation2] sm:$0x3] %vm15_vm0, %v202_v57 }
 0x598   :  { %v224_v58 = vld [vmem:[#allocation2] sm:$0x3] }
 0x599   :  { %v228_v59 = vpack.c.bf16 %v224_v58, %v224_v58 }
 0x59a   :  { %v282_v12 = vpop.permute.xlu1 %281 }
 0x59b   :  { %916 = vmatmul.mubr.msk.bf16.vlgmr.msra.gmra.mrb[4].mxu0 %vm28_vm2, %v228_v59 }
 0x59c   :  { %928 = vmatpush3.bf16.msra.mxu0 %v1073_v4  ;;  %931 = vmatprep.mubr.msk.bf16.mxu0 %vm1032_vm1, %v1031_v0 }
 0x59d   :  { %929 = vmatprep.subr.bf16.mxu0 %v1031_v0 }
 0x5a0   :  { %930 = vmatpush3.bf16.msra.mxu0 %v1082_v6 }
 0x5a1   :  { %943 = vmatprep.subr.bf16.mxu0 %v1031_v0 }
 0x66e   :  { %v266_v61 = vpop.f32.mrb[4].mxu0 }
 0x66f   :  { %v272_v62 = vadd.f32 %v841_v60, %v266_v61  ;;  %v917_v63 = vpop.f32.mrb[5].mxu0 }
 0x670   :  { %v269_v1 = vpop.f32.mrb[6].mxu0 }
 0x671   :  { %983 = vtanh.f32 %v272_v62  ;;  %v918_v2 = vpop.f32.mrb[7].mxu0  ;;  %v843_v5 = vmul.f32 -1.442695, %v272_v62 }
 0x673   :  { %985 = vpow2.f32 %v843_v5 }
 0x67b   :  { %v984_v3 = vpop.eup %983 }
 0x67c   :  { %286 = vrot.lane.b32.xlu0 %v984_v3, %s1033_s21 }
 0x67d   :  { %v986_v7 = vpop.eup %985 }
 0x67e   :  { %v276_v8 = vadd.f32 1.0, %v986_v7 }
 0x680   :  { %987 = vrcp.f32 %v276_v8 }
 0x68a   :  { %v988_v9 = vpop.eup %987 }
 0x68b   :  { %v284_v13 = vmul.f32 %v988_v9, %v282_v12 }
 0x6ee   :  { %v287_v10 = vpop.permute.xlu0 %286 }
 0x6ef   :  { %v289_v11 = vmul.f32 %v988_v9, %v287_v10 }
 0x6f1   :  { %291 = vrot.lane.b32.xlu0 %v289_v11, %s1034_s22 }
 0x763   :  { %v292_v14 = vpop.permute.xlu0 %291 }
 0x764   :  { %v294_v15 = vadd.f32 %v292_v14, %v284_v13 }
 0x766   :  { %989 = vtanh.f32 %v294_v15 }
 0x770   :  { %v990_v16 = vpop.eup %989 }
 0x771   :  { %297 = vrot.lane.b32.xlu1 %v990_v16, %s1033_s21 }
 0x775   :  { %307 = vrot.lane.b32.xlu1 %v294_v15, %s1035_s23  ;;  %v856_v15 = vld [vmem:[%s1314_s0 + $0xa] sm:$0x3] }
 0x7e3   :  { %v298_v17 = vpop.permute.xlu1 %297 }
 0x7e4   :  { %v1148_v18 = vmul.f32 %v988_v9, %v298_v17 }
 0x7e6   :  { %302 = vrot.lane.b32.xlu0 %v1148_v18, %s1034_s22 }
 0x7e7   :  { %v308_v19 = vpop.permute.xlu1 %307 }
 0x7e8   :  { %310 = vst.msk [vmem:[#allocation3] sm:$0x3] %vm15_vm0, %v308_v19 }
 0x7ef   :  { %v326_v20 = vld [vmem:[#allocation3] sm:$0x3] }
 0x7f0   :  { %382 = vrot.lane.b32.xlu1 %v326_v20, %s1034_s22 }
 0x858   :  { %v303_v21 = vpop.permute.xlu0 %302 }
 0x859   :  { %305 = vst.msk [vmem:[#allocation2] sm:$0x3] %vm15_vm0, %v303_v21 }
 0x860   :  { %v325_v22 = vld [vmem:[#allocation2] sm:$0x3] }
 0x861   :  { %v329_v23 = vpack.c.bf16 %v325_v22, %v325_v22 }
 0x862   :  { %v383_v38 = vpop.permute.xlu1 %382 }
 0x863   :  { %924 = vmatmul.mubr.msk.bf16.vlgmr.msra.gmra.mrb[4].mxu1 %vm28_vm2, %v329_v23 }
 0x864   :  { %936 = vmatpush3.bf16.msra.mxu1 %v1073_v4  ;;  %939 = vmatprep.mubr.msk.bf16.mxu1 %vm1032_vm1, %v1031_v0 }
 0x865   :  { %937 = vmatprep.subr.bf16.mxu1 %v1031_v0 }
 0x868   :  { %938 = vmatpush3.bf16.msra.mxu1 %v1082_v6 }
 0x869   :  { %951 = vmatprep.subr.bf16.mxu1 %v1031_v0 }
 0x936   :  { %v367_v25 = vpop.f32.mrb[4].mxu1 }
 0x937   :  { %v373_v26 = vadd.f32 %v846_v24, %v367_v25  ;;  %v925_v27 = vpop.f32.mrb[5].mxu1 }
 0x938   :  { %v370_v28 = vpop.f32.mrb[6].mxu1 }
 0x939   :  { %991 = vtanh.f32 %v373_v26  ;;  %v926_v30 = vpop.f32.mrb[7].mxu1  ;;  %v848_v32 = vmul.f32 -1.442695, %v373_v26 }
 0x93b   :  { %993 = vpow2.f32 %v848_v32 }
 0x943   :  { %v992_v31 = vpop.eup %991 }
 0x944   :  { %387 = vrot.lane.b32.xlu0 %v992_v31, %s1033_s21 }
 0x945   :  { %v994_v33 = vpop.eup %993 }
 0x946   :  { %v377_v34 = vadd.f32 1.0, %v994_v33 }
 0x948   :  { %995 = vrcp.f32 %v377_v34 }
 0x952   :  { %v996_v35 = vpop.eup %995 }
 0x953   :  { %v385_v39 = vmul.f32 %v996_v35, %v383_v38 }
 0x9b6   :  { %v388_v36 = vpop.permute.xlu0 %387 }
 0x9b7   :  { %v390_v37 = vmul.f32 %v996_v35, %v388_v36 }
 0x9b9   :  { %392 = vrot.lane.b32.xlu0 %v390_v37, %s1034_s22 }
 0xa2b   :  { %v393_v40 = vpop.permute.xlu0 %392 }
 0xa2c   :  { %v395_v41 = vadd.f32 %v393_v40, %v385_v39  ;;  %v861_v39 = vld [vmem:[%s1314_s0 + $0xc] sm:$0x3] }
 0xa2e   :  { %997 = vtanh.f32 %v395_v41 }
 0xa38   :  { %v998_v42 = vpop.eup %997 }
 0xa39   :  { %398 = vrot.lane.b32.xlu1 %v998_v42, %s1033_s21 }
 0xa3d   :  { %408 = vrot.lane.b32.xlu1 %v395_v41, %s1035_s23 }
 0xaab   :  { %v399_v43 = vpop.permute.xlu1 %398 }
 0xaac   :  { %v1169_v44 = vmul.f32 %v996_v35, %v399_v43 }
 0xaae   :  { %403 = vrot.lane.b32.xlu0 %v1169_v44, %s1034_s22 }
 0xaaf   :  { %v409_v45 = vpop.permute.xlu1 %408 }
 0xab0   :  { %411 = vst.msk [vmem:[#allocation3] sm:$0x3] %vm15_vm0, %v409_v45 }
 0xab7   :  { %v427_v46 = vld [vmem:[#allocation3] sm:$0x3] }
 0xab8   :  { %483 = vrot.lane.b32.xlu1 %v427_v46, %s1034_s22 }
 0xb20   :  { %v404_v47 = vpop.permute.xlu0 %403 }
 0xb21   :  { %406 = vst.msk [vmem:[#allocation2] sm:$0x3] %vm15_vm0, %v404_v47 }
 0xb28   :  { %v426_v48 = vld [vmem:[#allocation2] sm:$0x3] }
 0xb29   :  { %v430_v49 = vpack.c.bf16 %v426_v48, %v426_v48 }
 0xb2a   :  { %v484_v1 = vpop.permute.xlu1 %483 }
 0xb2b   :  { %932 = vmatmul.mubr.msk.bf16.vlgmr.msra.gmra.mrb[8].mxu0 %vm28_vm2, %v430_v49 }
 0xb2c   :  { %944 = vmatpush3.bf16.msra.mxu0 %v1073_v4  ;;  %947 = vmatprep.mubr.msk.bf16.mxu0 %vm1032_vm1, %v1031_v0 }
 0xb2d   :  { %945 = vmatprep.subr.bf16.mxu0 %v1031_v0 }
 0xb30   :  { %946 = vmatpush3.bf16.msra.mxu0 %v1082_v6 }
 0xbfe   :  { %v468_v51 = vpop.f32.mrb[8].mxu0 }
 0xbff   :  { %v474_v52 = vadd.f32 %v851_v50, %v468_v51  ;;  %v933_v53 = vpop.f32.mrb[9].mxu0 }
 0xc00   :  { %v471_v55 = vpop.f32.mrb[10].mxu0 }
 0xc01   :  { %999 = vtanh.f32 %v474_v52  ;;  %v934_v56 = vpop.f32.mrb[11].mxu0  ;;  %v853_v58 = vmul.f32 -1.442695, %v474_v52 }
 0xc03   :  { %1001 = vpow2.f32 %v853_v58 }
 0xc0b   :  { %v1000_v57 = vpop.eup %999 }
 0xc0c   :  { %488 = vrot.lane.b32.xlu0 %v1000_v57, %s1033_s21 }
 0xc0d   :  { %v1002_v59 = vpop.eup %1001 }
 0xc0e   :  { %v478_v60 = vadd.f32 1.0, %v1002_v59  ;;  %v1036_v59 = vmov 0  }
 0xc0f   :  { %966 = vset.pattern.permute.xlu0 %v1036_v59  ;;  %965 = vset.pattern.permute.xlu1 %v1036_v59 }
 0xc10   :  { %1003 = vrcp.f32 %v478_v60 }
 0xc1a   :  { %v1004_v61 = vpop.eup %1003 }
 0xc1b   :  { %v486_v2 = vmul.f32 %v1004_v61, %v484_v1  ;;  %v111_v1 = vld [vmem:[%s1315_s1] sm:$0x3] }
 0xc7e   :  { %v489_v62 = vpop.permute.xlu0 %488 }
 0xc7f   :  { %v491_v63 = vmul.f32 %v1004_v61, %v489_v62 }
 0xc81   :  { %493 = vrot.lane.b32.xlu0 %v491_v63, %s1034_s22 }
 0xcf3   :  { %v494_v3 = vpop.permute.xlu0 %493 }
 0xcf4   :  { %v496_v5 = vadd.f32 %v494_v3, %v486_v2  ;;  %v844_v2 = vld [vmem:[%s1315_s1 + $0x4] sm:$0x3]  ;;  %v849_v3 = vld [vmem:[%s1315_s1 + $0x6] sm:$0x3] }
 0xcf6   :  { %1005 = vtanh.f32 %v496_v5 }
 0xd00   :  { %v1006_v7 = vpop.eup %1005 }
 0xd01   :  { %499 = vrot.lane.b32.xlu1 %v1006_v7, %s1033_s21  ;;  %v869_v7 = vld [vmem:[%s1315_s1 + $0xe] sm:$0x3] }
 0xd05   :  { %509 = vrot.lane.b32.xlu1 %v496_v5, %s1035_s23  ;;  %v859_v5 = vld [vmem:[%s1315_s1 + $0xa] sm:$0x3] }
 0xd73   :  { %v500_v8 = vpop.permute.xlu1 %499 }
 0xd74   :  { %v1189_v9 = vmul.f32 %v1004_v61, %v500_v8 }
 0xd76   :  { %504 = vrot.lane.b32.xlu0 %v1189_v9, %s1034_s22 }
 0xd77   :  { %v510_v10 = vpop.permute.xlu1 %509 }
 0xd78   :  { %512 = vst.msk [vmem:[#allocation3] sm:$0x3] %vm15_vm0, %v510_v10 }
 0xd7f   :  { %v528_v11 = vld [vmem:[#allocation3] sm:$0x3] }
 0xd80   :  { %584 = vrot.lane.b32.xlu1 %v528_v11, %s1034_s22 }
 0xde8   :  { %v505_v12 = vpop.permute.xlu0 %504 }
 0xde9   :  { %507 = vst.msk [vmem:[#allocation2] sm:$0x3] %vm15_vm0, %v505_v12 }
 0xdf0   :  { %v527_v13 = vld [vmem:[#allocation2] sm:$0x3] }
 0xdf1   :  { %v531_v14 = vpack.c.bf16 %v527_v13, %v527_v13 }
 0xdf2   :  { %v585_v26 = vpop.permute.xlu1 %584 }
 0xdf3   :  { %940 = vmatmul.mubr.msk.bf16.vlgmr.msra.gmra.mrb[8].mxu1 %vm28_vm2, %v531_v14 }
 0xdf4   :  { %952 = vmatpush3.bf16.msra.mxu1 %v1073_v4  ;;  %955 = vmatprep.mubr.msk.bf16.mxu1 %vm1032_vm1, %v1031_v0 }
 0xdf5   :  { %953 = vmatprep.subr.bf16.mxu1 %v1031_v0 }
 0xdf8   :  { %954 = vmatpush3.bf16.msra.mxu1 %v1082_v6 }
 0xec6   :  { %v569_v16 = vpop.f32.mrb[8].mxu1 }
 0xec7   :  { %v575_v17 = vadd.f32 %v856_v15, %v569_v16  ;;  %v941_v19 = vpop.f32.mrb[9].mxu1 }
 0xec8   :  { %v572_v20 = vpop.f32.mrb[10].mxu1 }
 0xec9   :  { %1007 = vtanh.f32 %v575_v17  ;;  %v942_v21 = vpop.f32.mrb[11].mxu1  ;;  %v858_v4 = vmul.f32 -1.442695, %v575_v17 }
 0xecb   :  { %1009 = vpow2.f32 %v858_v4 }
 0xed3   :  { %v1008_v22 = vpop.eup %1007 }
 0xed4   :  { %589 = vrot.lane.b32.xlu0 %v1008_v22, %s1033_s21 }
 0xed5   :  { %v1010_v23 = vpop.eup %1009 }
 0xed6   :  { %v579_v24 = vadd.f32 1.0, %v1010_v23 }
 0xed8   :  { %1011 = vrcp.f32 %v579_v24 }
 0xee2   :  { %v1012_v0 = vpop.eup %1011 }
 0xee3   :  { %v587_v27 = vmul.f32 %v1012_v0, %v585_v26 }
 0xf46   :  { %v590_v6 = vpop.permute.xlu0 %589 }
 0xf47   :  { %v592_v25 = vmul.f32 %v1012_v0, %v590_v6 }
 0xf49   :  { %594 = vrot.lane.b32.xlu0 %v592_v25, %s1034_s22 }
 0xfbb   :  { %v595_v28 = vpop.permute.xlu0 %594 }
 0xfbc   :  { %v597_v30 = vadd.f32 %v595_v28, %v587_v27 }
 0xfbe   :  { %1013 = vtanh.f32 %v597_v30 }
 0xfc8   :  { %v1014_v31 = vpop.eup %1013 }
 0xfc9   :  { %600 = vrot.lane.b32.xlu1 %v1014_v31, %s1033_s21 }
 0xfcd   :  { %610 = vrot.lane.b32.xlu1 %v597_v30, %s1035_s23 }
0x103b   :  { %v601_v32 = vpop.permute.xlu1 %600 }
0x103c   :  { %v1209_v33 = vmul.f32 %v1012_v0, %v601_v32  ;;  %v839_v32 = vld [vmem:[%s1315_s1 + $0x2] sm:$0x3] }
0x103e   :  { %605 = vrot.lane.b32.xlu0 %v1209_v33, %s1034_s22 }
0x103f   :  { %v611_v34 = vpop.permute.xlu1 %610 }
0x1040   :  { %613 = vst.msk [vmem:[#allocation3] sm:$0x3] %vm15_vm0, %v611_v34  ;;  %v854_v34 = vld [vmem:[%s1315_s1 + $0x8] sm:$0x3] }
0x1047   :  { %v629_v35 = vld [vmem:[#allocation3] sm:$0x3] }
0x1048   :  { %685 = vrot.lane.b32.xlu1 %v629_v35, %s1034_s22  ;;  %v864_v35 = vld [vmem:[%s1315_s1 + $0xc] sm:$0x3] }
0x10b0   :  { %v606_v36 = vpop.permute.xlu0 %605 }
0x10b1   :  { %608 = vst.msk [vmem:[#allocation2] sm:$0x3] %vm15_vm0, %v606_v36 }
0x10b8   :  { %v628_v37 = vld [vmem:[#allocation2] sm:$0x3] }
0x10b9   :  { %v632_v38 = vpack.c.bf16 %v628_v37, %v628_v37 }
0x10ba   :  { %v686_v53 = vpop.permute.xlu1 %685 }
0x10bb   :  { %948 = vmatmul.mubr.msk.bf16.vlgmr.msra.gmra.mrb[12].mxu0 %vm28_vm2, %v632_v38 }
0x118e   :  { %v670_v40 = vpop.f32.mrb[12].mxu0 }
0x118f   :  { %v676_v41 = vadd.f32 %v861_v39, %v670_v40  ;;  %v949_v42 = vpop.f32.mrb[13].mxu0 }
0x1190   :  { %v673_v43 = vpop.f32.mrb[14].mxu0 }
0x1191   :  { %1015 = vtanh.f32 %v676_v41  ;;  %v950_v45 = vpop.f32.mrb[15].mxu0  ;;  %v863_v47 = vmul.f32 -1.442695, %v676_v41 }
0x1193   :  { %1017 = vpow2.f32 %v863_v47 }
0x119b   :  { %v1016_v46 = vpop.eup %1015 }
0x119c   :  { %690 = vrot.lane.b32.xlu0 %v1016_v46, %s1033_s21 }
0x119d   :  { %v1018_v48 = vpop.eup %1017 }
0x119e   :  { %v680_v49 = vadd.f32 1.0, %v1018_v48 }
0x11a0   :  { %1019 = vrcp.f32 %v680_v49 }
0x11aa   :  { %v1020_v50 = vpop.eup %1019 }
0x11ab   :  { %v688_v55 = vmul.f32 %v1020_v50, %v686_v53 }
0x120e   :  { %v691_v51 = vpop.permute.xlu0 %690 }
0x120f   :  { %v693_v52 = vmul.f32 %v1020_v50, %v691_v51 }
0x1211   :  { %695 = vrot.lane.b32.xlu0 %v693_v52, %s1034_s22 }
0x1283   :  { %v696_v56 = vpop.permute.xlu0 %695 }
0x1284   :  { %v698_v57 = vadd.f32 %v696_v56, %v688_v55 }
0x1286   :  { %1021 = vtanh.f32 %v698_v57 }
0x1290   :  { %v1022_v58 = vpop.eup %1021 }
0x1291   :  { %701 = vrot.lane.b32.xlu1 %v1022_v58, %s1033_s21 }
0x1295   :  { %711 = vrot.lane.b32.xlu1 %v698_v57, %s1035_s23 }
0x1303   :  { %v702_v60 = vpop.permute.xlu1 %701 }
0x1304   :  { %v1224_v61 = vmul.f32 %v1020_v50, %v702_v60 }
0x1306   :  { %706 = vrot.lane.b32.xlu0 %v1224_v61, %s1034_s22 }
0x1307   :  { %v712_v62 = vpop.permute.xlu1 %711 }
0x1308   :  { %714 = vst.msk [vmem:[#allocation3] sm:$0x3] %vm15_vm0, %v712_v62 }
0x130f   :  { %v730_v63 = vld [vmem:[#allocation3] sm:$0x3] }
0x1310   :  { %786 = vrot.lane.b32.xlu1 %v730_v63, %s1034_s22 }
0x1314   :  { %114 = vperm.xlu1 %965, %v111_v1  }
0x1318   :  { %315 = vperm.xlu1 %965, %v844_v2  }
0x131c   :  { %416 = vperm.xlu1 %965, %v849_v3  }
0x1320   :  { %618 = vperm.xlu1 %965, %v859_v5  }
0x1324   :  { %820 = vperm.xlu1 %965, %v869_v7  }
0x1378   :  { %v707_v8 = vpop.permute.xlu0 %706 }
0x1379   :  { %709 = vst.msk [vmem:[#allocation2] sm:$0x3] %vm15_vm0, %v707_v8 }
0x1380   :  { %v729_v10 = vld [vmem:[#allocation2] sm:$0x3] }
0x1381   :  { %v733_v11 = vpack.c.bf16 %v729_v10, %v729_v10 }
0x1382   :  { %v787_v12 = vpop.permute.xlu1 %786 }
0x1383   :  { %956 = vmatmul.mubr.msk.bf16.vlgmr.msra.gmra.mrb[12].mxu1 %vm28_vm2, %v733_v11 }
0x1393   :  { %v115_v13 = vpop.permute.xlu1 %114 }
0x1394   :  { %v117_v14 = vmul.f32 %v115_v13, %v1106_v29  ;;  %v866_v29 = vld [vmem:[%s1314_s0 + $0xe] sm:$0x3] }
0x1396   :  { %119 = vrot.lane.b32.xlu1 %v117_v14, %s1034_s22 }
0x1397   :  { %v316_v15 = vpop.permute.xlu1 %315 }
0x1398   :  { %v318_v16 = vmul.f32 %v316_v15, %v1148_v18 }
0x139a   :  { %320 = vrot.lane.b32.xlu1 %v318_v16, %s1034_s22 }
0x139b   :  { %v417_v17 = vpop.permute.xlu1 %416 }
0x139c   :  { %v419_v43 = vmul.f32 %v417_v17, %v1169_v44 }
0x139f   :  { %v619_v19 = vpop.permute.xlu1 %618 }
0x13a0   :  { %v621_v47 = vmul.f32 %v619_v19, %v1209_v33 }
0x13a3   :  { %v821_v20 = vpop.permute.xlu1 %820 }
0x1408   :  { %v120_v21 = vpop.permute.xlu1 %119 }
0x1409   :  { %122 = vst.msk [vmem:[%s1316_s3] sm:$0x3] %vm15_vm0, %v120_v21 }
0x140c   :  { %v321_v22 = vpop.permute.xlu1 %320 }
0x140d   :  { %845 = vst.msk [vmem:[%s1316_s3 + $0x4] sm:$0x3] %vm15_vm0, %v321_v22 }
0x1456   :  { %v771_v18 = vpop.f32.mrb[12].mxu1 }
0x1457   :  { %v777_v4 = vadd.f32 %v866_v29, %v771_v18  ;;  %v957_v23 = vpop.f32.mrb[13].mxu1 }
0x1458   :  { %v774_v24 = vpop.f32.mrb[14].mxu1 }
0x1459   :  { %1023 = vtanh.f32 %v777_v4  ;;  %v958_v0 = vpop.f32.mrb[15].mxu1  ;;  %v868_v25 = vmul.f32 -1.442695, %v777_v4 }
0x145b   :  { %1025 = vpow2.f32 %v868_v25 }
0x1463   :  { %v1024_v6 = vpop.eup %1023 }
0x1464   :  { %791 = vrot.lane.b32.xlu0 %v1024_v6, %s1033_s21 }
0x1465   :  { %v1026_v26 = vpop.eup %1025 }
0x1466   :  { %v781_v27 = vadd.f32 1.0, %v1026_v26 }
0x1468   :  { %1027 = vrcp.f32 %v781_v27 }
0x1472   :  { %v1028_v28 = vpop.eup %1027 }
0x1473   :  { %v789_v36 = vmul.f32 %v1028_v28, %v787_v12 }
0x14d6   :  { %v792_v30 = vpop.permute.xlu0 %791 }
0x14d7   :  { %v794_v31 = vmul.f32 %v1028_v28, %v792_v30 }
0x14d9   :  { %796 = vrot.lane.b32.xlu0 %v794_v31, %s1034_s22 }
0x14dd   :  { %214 = vperm.xlu0 %966, %v839_v32  }
0x14e1   :  { %517 = vperm.xlu0 %966, %v854_v34  }
0x14e5   :  { %719 = vperm.xlu0 %966, %v864_v35  }
0x154b   :  { %v797_v37 = vpop.permute.xlu0 %796 }
0x154c   :  { %v799_v38 = vadd.f32 %v797_v37, %v789_v36 }
0x154e   :  { %1029 = vtanh.f32 %v799_v38 }
0x1558   :  { %v1030_v39 = vpop.eup %1029 }
0x1559   :  { %802 = vrot.lane.b32.xlu0 %v1030_v39, %s1033_s21 }
0x155c   :  { %v215_v40 = vpop.permute.xlu0 %214 }
0x155d   :  { %v217_v41 = vmul.f32 %v215_v40, %v1127_v54 }
0x155f   :  { %219 = vrot.lane.b32.xlu0 %v217_v41, %s1034_s22 }
0x1560   :  { %v518_v42 = vpop.permute.xlu0 %517 }
0x1561   :  { %v520_v45 = vmul.f32 %v518_v42, %v1189_v9 }
0x1563   :  { %522 = vrot.lane.b32.xlu1 %v520_v45, %s1034_s22  ;;  %421 = vrot.lane.b32.xlu0 %v419_v43, %s1034_s22 }
0x1564   :  { %v720_v46 = vpop.permute.xlu0 %719 }
0x1565   :  { %v722_v48 = vmul.f32 %v720_v46, %v1224_v61 }
0x1567   :  { %724 = vrot.lane.b32.xlu1 %v722_v48, %s1034_s22  ;;  %623 = vrot.lane.b32.xlu0 %v621_v47, %s1034_s22 }
0x156b   :  { %812 = vrot.lane.b32.xlu1 %v799_v38, %s1035_s23 }
0x15cb   :  { %v803_v54 = vpop.permute.xlu0 %802 }
0x15cc   :  { %v805_v49 = vmul.f32 %v1028_v28, %v803_v54 }
0x15ce   :  { %807 = vrot.lane.b32.xlu0 %v805_v49, %s1034_s22  ;;  %v823_v44 = vmul.f32 %v821_v20, %v805_v49 }
0x15d1   :  { %v220_v9 = vpop.permute.xlu0 %219 }
0x15d2   :  { %840 = vst.msk [vmem:[%s1316_s3 + $0x2] sm:$0x3] %vm15_vm0, %v220_v9  ;;  %825 = vrot.lane.b32.xlu0 %v823_v44, %s1034_s22 }
0x15d5   :  { %v422_v33 = vpop.permute.xlu0 %421  ;;  %v523_v50 = vpop.permute.xlu1 %522 }
0x15d6   :  { %850 = vst.msk [vmem:[%s1316_s3 + $0x6] sm:$0x3] %vm15_vm0, %v422_v33  ;;  %855 = vst.msk [vmem:[%s1316_s3 + $0x8] sm:$0x3] %vm15_vm0, %v523_v50 }
0x15d9   :  { %v624_v51 = vpop.permute.xlu0 %623  ;;  %v725_v52 = vpop.permute.xlu1 %724 }
0x15da   :  { %860 = vst.msk [vmem:[%s1316_s3 + $0xa] sm:$0x3] %vm15_vm0, %v624_v51  ;;  %865 = vst.msk [vmem:[%s1316_s3 + $0xc] sm:$0x3] %vm15_vm0, %v725_v52 }
0x15dd   :  { %v813_v53 = vpop.permute.xlu1 %812 }
0x15de   :  { %815 = vst.msk [vmem:[#allocation3] sm:$0x3] %vm15_vm0, %v813_v53 }
0x1640   :  { %v808_v55 = vpop.permute.xlu0 %807 }
0x1641   :  { %810 = vst.msk [vmem:[#allocation2] sm:$0x3] %vm15_vm0, %v808_v55 }
0x1644   :  { %v826_v56 = vpop.permute.xlu0 %825 }
0x1645   :  { %870 = vst.msk [vmem:[%s1316_s3 + $0xe] sm:$0x3] %vm15_vm0, %v826_v56 }

// kernel: ian_btm_forward.10
= control target key start
LH: loop header
LB: loop body
LE: loop exit
PB: predicated region body
PF: predicated region fallthrough
CT: control target
= control target key end

     0   :  { %v1012_v0 = vmov 0   ;;  %v1013_v2 = vmov 0.0   ;;  %vm1014_vm0 = vmmov 0   ;;  %vm78_vm1 = vcmask 259072   ;;  %s1478_s2 = inlined_call_operand.vmem [shape: f32[6,1], index: 2, kind: input, shape index: {}]   ;;  %s1479_s7 = inlined_call_operand.vmem [shape: f32[32,32], index: 7, kind: input, shape index: {}]   ;;  %s1480_s9 = inlined_call_operand.vmem [shape: f32[32,32], index: 9, kind: input, shape index: {}]   ;;  %s1481_s0 = inlined_call_operand.vmem [shape: f32[8,6,32], index: 0, kind: input, shape index: {}]   ;;  %s1482_s5 = inlined_call_operand.vmem [shape: f32[32,32], index: 5, kind: input, shape index: {}]   ;;  %s1483_s8 = inlined_call_operand.vmem [shape: f32[1,32], index: 8, kind: input, shape index: {}]   ;;  %s1484_s1 = inlined_call_operand.vmem [shape: f32[4,6,32], index: 1, kind: input, shape index: {}]   ;;  %s1485_s3 = inlined_call_operand.vmem [shape: f32[6,1], index: 3, kind: input, shape index: {}]   ;;  %s1486_s4 = inlined_call_operand.vmem [shape: f32[32,32], index: 4, kind: input, shape index: {}]   ;;  %s1487_s10 = inlined_call_operand.vmem [shape: f32[32,32], index: 10, kind: input, shape index: {}]   ;;  %s1488_s15 = inlined_call_operand.vmem [shape: f32[32,32], index: 15, kind: input, shape index: {}]   ;;  %s1489_s6 = inlined_call_operand.vmem [shape: f32[1,32], index: 6, kind: input, shape index: {}]   ;;  %s1490_s17 = inlined_call_operand.vmem [shape: f32[32,32], index: 17, kind: input, shape index: {}]   ;;  %s1491_s16 = inlined_call_operand.vmem [shape: f32[1,32], index: 16, kind: input, shape index: {}]   ;;  %s1492_s13 = inlined_call_operand.vmem [shape: f32[32,32], index: 13, kind: input, shape index: {}]   ;;  %s1493_s11 = inlined_call_operand.vmem [shape: f32[1,32], index: 11, kind: input, shape index: {}]   ;;  %s1494_s20 = inlined_call_operand.vmem [shape: f32[6,64], index: 20, kind: output, shape index: {}]   ;;  %s1495_s12 = inlined_call_operand.vmem [shape: f32[32,32], index: 12, kind: input, shape index: {}]   ;;  %s1496_s18 = inlined_call_operand.vmem [shape: f32[32,32], index: 18, kind: input, shape index: {}]   ;;  %s1497_s14 = inlined_call_operand.vmem [shape: f32[1,32], index: 14, kind: input, shape index: {}]   ;;  %s1498_s19 = inlined_call_operand.vmem [shape: f32[1,32], index: 19, kind: input, shape index: {}]  }
   0x1   :  { %1503 = sst [smem:[#allocation2_spill]] %s1478_s2  ;;  %978 = vset.pattern.permute.xlu0 %v1012_v0  ;;  %979 = vset.pattern.permute.xlu1 %v1012_v0  ;;  %vm131_vm2 = vcmask 261120   ;;  %v848_v48 = vld [vmem:[%s1483_s8] ss:$0 sm:$0xff]  ;;  %v1243_v60 = vld [vmem:[%s1484_s1 + $0x8] sm:$0x3f] }
   0x2   :  { %1504 = sst [smem:[#allocation3_spill]] %s1479_s7  ;;  %s1508_s23 = sld [smem:[#allocation2_spill]]  ;;  %894 = vmatprep.subr.bf16.mxu0 %v1013_v2  ;;  %898 = vmatprep.mubr.msk.bf16.mxu0 %vm1014_vm0, %v1013_v2  ;;  %v1248_v61 = vld [vmem:[%s1484_s1] sm:$0x3f]  ;;  %v1253_v63 = vld [vmem:[%s1484_s1 + $0x10] sm:$0x3f] }
   0x3   :  { %1505 = sst [smem:[#allocation4_spill]] %s1480_s9  ;;  %s1509_s25 = sld [smem:[#allocation3_spill]]  ;;  %902 = vmatprep.subr.bf16.mxu1 %v1013_v2  ;;  %906 = vmatprep.mubr.msk.bf16.mxu1 %vm1014_vm0, %v1013_v2  ;;  %vm291_vm3 = vcmask 1045504   ;;  %vm842_vm4 = vcmask 521472  }
   0x4   :  { %1506 = sst [smem:[#allocation5_spill]] %s1481_s0  ;;  %s1510_s21 = sld [smem:[#allocation4_spill]] }
   0x5   :  { %1507 = sst [smem:[#allocation6_spill]] %s1482_s5  ;;  %s1511_s9 = sld [smem:[#allocation5_spill]] }
   0x6   :  { %s1512_s29 = sld [smem:[#allocation6_spill]] }
   0x8   :  { %v94_v1 = vld [vmem:[%s1508_s23] sm:$0x3f] }
   0x9   :  { %97 = vperm.xlu0 %978, %v94_v1   ;;  %v117_v3 = vld [vmem:[%s1509_s25] sm:$0xff]  ;;  %v118_v4 = vld [vmem:[%s1509_s25 + $0x8] sm:$0xff]  ;;  %v119_v5 = vld [vmem:[%s1509_s25 + $0x10] sm:$0xff] }
   0xa   :  { %v122_v6 = vpack.c.bf16 %v118_v4, %v117_v3  ;;  %v120_v7 = vld [vmem:[%s1509_s25 + $0x18] sm:$0xff]  ;;  %v175_v9 = vld [vmem:[%s1510_s21] sm:$0xff]  ;;  %v176_v10 = vld [vmem:[%s1510_s21 + $0x8] sm:$0xff] }
   0xb   :  { %v123_v8 = vpack.c.bf16 %v120_v7, %v119_v5  ;;  %v180_v11 = vpack.c.bf16 %v176_v10, %v175_v9  ;;  %v1154_v12 = vld [vmem:[%s1511_s9] sm:$0x3f]  ;;  %v1159_v13 = vld [vmem:[%s1511_s9 + $0x8] sm:$0x3f]  ;;  %v1168_v16 = vld [vmem:[%s1511_s9 + $0x10] sm:$0x3f] }
   0xc   :  { %895 = vmatpush3.bf16.msra.mxu0 %v122_v6  ;;  %v79_v14 = vsel %vm78_vm1, %v1154_v12, 0.0  ;;  %v80_v15 = vsel %vm78_vm1, %v1159_v13, 0.0  ;;  %v82_v18 = vsel %vm78_vm1, %v1168_v16, 0.0  ;;  %v1175_v19 = vld [vmem:[%s1511_s9 + $0x18] sm:$0x3f]  ;;  %v177_v39 = vld [vmem:[%s1510_s21 + $0x10] sm:$0xff] }
   0xd   :  { %896 = vmatprep.subr.bf16.mxu0 %v1013_v2  ;;  %903 = vmatpush3.bf16.msra.mxu1 %v180_v11  ;;  %v81_v17 = vadd.f32 %v80_v15, %v79_v14  ;;  %v84_v21 = vsel %vm78_vm1, %v1175_v19, 0.0  ;;  %v1182_v22 = vld [vmem:[%s1511_s9 + $0x20] sm:$0x3f]  ;;  %v1189_v25 = vld [vmem:[%s1511_s9 + $0x28] sm:$0x3f]  ;;  %v178_v40 = vld [vmem:[%s1510_s21 + $0x18] sm:$0xff] }
   0xe   :  { %904 = vmatprep.subr.bf16.mxu1 %v1013_v2  ;;  %v86_v24 = vsel %vm78_vm1, %v1182_v22, 0.0  ;;  %v88_v27 = vsel %vm78_vm1, %v1189_v25, 0.0  ;;  %v1196_v28 = vld [vmem:[%s1511_s9 + $0x30] sm:$0x3f]  ;;  %v1203_v32 = vld [vmem:[%s1511_s9 + $0x38] sm:$0x3f]  ;;  %v181_v41 = vpack.c.bf16 %v178_v40, %v177_v39 }
   0xf   :  { %v83_v20 = vadd.f32 %v82_v18, %v81_v17  ;;  %v90_v31 = vsel %vm78_vm1, %v1196_v28, 0.0  ;;  %v92_v34 = vsel %vm78_vm1, %v1203_v32, 0.0  ;;  %v225_v42 = vld [vmem:[%s1512_s29] sm:$0xff]  ;;  %v226_v43 = vld [vmem:[%s1512_s29 + $0x8] sm:$0xff]  ;;  %v227_v44 = vld [vmem:[%s1512_s29 + $0x10] sm:$0xff] }
  0x10   :  { %897 = vmatpush3.bf16.msra.mxu0 %v123_v8  ;;  %v230_v45 = vpack.c.bf16 %v226_v43, %v225_v42  ;;  %v228_v46 = vld [vmem:[%s1512_s29 + $0x18] sm:$0xff]  ;;  %v109_v15 = vld [vmem:[%s1485_s3] sm:$0x3f]  ;;  %v335_v18 = vld [vmem:[%s1486_s4 + $0x8] sm:$0xff] }
  0x11   :  { %910 = vmatprep.subr.bf16.mxu0 %v1013_v2  ;;  %v85_v23 = vadd.f32 %v84_v21, %v83_v20  ;;  %905 = vmatpush3.bf16.msra.mxu1 %v181_v41  ;;  %v231_v47 = vpack.c.bf16 %v228_v46, %v227_v44  ;;  %v1263_v9 = vld [vmem:[%s1484_s1 + $0x18] sm:$0x3f]  ;;  %v334_v17 = vld [vmem:[%s1486_s4] sm:$0xff]  ;;  %v336_v20 = vld [vmem:[%s1486_s4 + $0x10] sm:$0xff] }
  0x12   :  { %918 = vmatprep.subr.bf16.mxu1 %v1013_v2  ;;  %v339_v21 = vpack.c.bf16 %v335_v18, %v334_v17 }
  0x13   :  { %v87_v26 = vadd.f32 %v86_v24, %v85_v23  ;;  %v337_v23 = vld [vmem:[%s1486_s4 + $0x18] sm:$0xff] }
  0x14   :  { %v340_v24 = vpack.c.bf16 %v337_v23, %v336_v20 }
  0x15   :  { %v89_v30 = vadd.f32 %v88_v27, %v87_v26  ;;  %v391_v26 = vld [vmem:[%s1487_s10] sm:$0xff]  ;;  %v392_v27 = vld [vmem:[%s1487_s10 + $0x8] sm:$0xff] }
  0x17   :  { %v91_v33 = vadd.f32 %v90_v31, %v89_v30 }
  0x19   :  { %v93_v35 = vadd.f32 %v92_v34, %v91_v33 }
  0x88   :  { %v98_v29 = vpop.permute.xlu0 %97 }
  0x89   :  { %980 = vrcp.f32 %v98_v29  ;;  %v396_v29 = vpack.c.bf16 %v392_v27, %v391_v26  ;;  %v107_v26 = vsel %vm78_vm1, %v1263_v9, 0.0 }
  0x93   :  { %v981_v36 = vpop.eup %980 }
  0x94   :  { %v101_v37 = vmul.f32 %v981_v36, %v93_v35 }
  0x96   :  { %v121_v38 = vpack.c.bf16 %v101_v37, %v101_v37 }
  0x98   :  { %899 = vmatmul.mubr.msk.bf16.vlgmr.msra.gmra.mrb[0].mxu0 %vm131_vm2, %v121_v38 }
  0x99   :  { %914 = vmatprep.mubr.msk.bf16.mxu0 %vm1014_vm0, %v1013_v2  ;;  %911 = vmatpush3.bf16.msra.mxu0 %v230_v45 }
  0x9a   :  { %912 = vmatprep.subr.bf16.mxu0 %v1013_v2 }
  0x9d   :  { %913 = vmatpush3.bf16.msra.mxu0 %v231_v47 }
  0x9e   :  { %926 = vmatprep.subr.bf16.mxu0 %v1013_v2 }
 0x16b   :  { %v169_v49 = vpop.f32.mrb[0].mxu0 }
 0x16c   :  { %v170_v50 = vadd.f32 %v848_v48, %v169_v49  ;;  %v900_v51 = vpop.f32.mrb[1].mxu0 }
 0x16d   :  { %v172_v52 = vpop.f32.mrb[2].mxu0 }
 0x16e   :  { %v179_v53 = vpack.c.bf16 %v170_v50, %v170_v50  ;;  %v901_v54 = vpop.f32.mrb[3].mxu0 }
 0x170   :  { %907 = vmatmul.mubr.msk.bf16.vlgmr.msra.gmra.mrb[0].mxu1 %vm131_vm2, %v179_v53 }
 0x171   :  { %922 = vmatprep.mubr.msk.bf16.mxu1 %vm1014_vm0, %v1013_v2  ;;  %919 = vmatpush3.bf16.msra.mxu1 %v339_v21 }
 0x172   :  { %920 = vmatprep.subr.bf16.mxu1 %v1013_v2 }
 0x175   :  { %921 = vmatpush3.bf16.msra.mxu1 %v340_v24 }
 0x176   :  { %934 = vmatprep.subr.bf16.mxu1 %v1013_v2 }
 0x243   :  { %v219_v55 = vpop.f32.mrb[0].mxu1 }
 0x244   :  { %v229_v56 = vpack.c.bf16 %v219_v55, %v219_v55  ;;  %v908_v57 = vpop.f32.mrb[1].mxu1 }
 0x245   :  { %v222_v58 = vpop.f32.mrb[2].mxu1 }
 0x246   :  { %v909_v59 = vpop.f32.mrb[3].mxu1  ;;  %915 = vmatmul.mubr.msk.bf16.vlgmr.msra.gmra.mrb[4].mxu0 %vm131_vm2, %v229_v56 }
 0x247   :  { %930 = vmatprep.mubr.msk.bf16.mxu0 %vm1014_vm0, %v1013_v2  ;;  %927 = vmatpush3.bf16.msra.mxu0 %v396_v29 }
 0x248   :  { %928 = vmatprep.subr.bf16.mxu0 %v1013_v2 }
 0x319   :  { %v269_v62 = vpop.f32.mrb[4].mxu0 }
 0x31a   :  { %v916_v0 = vpop.f32.mrb[5].mxu0  ;;  %v276_v1 = vmul.f32 %v269_v62, %v1243_v60  ;;  %v275_v3 = vmul.f32 %v269_v62, %v1248_v61  ;;  %v277_v8 = vmul.f32 %v269_v62, %v1253_v63  ;;  %v278_v11 = vmul.f32 %v269_v62, %v1263_v9 }
 0x31b   :  { %v272_v4 = vpop.f32.mrb[6].mxu0 }
 0x31c   :  { %v917_v5 = vpop.f32.mrb[7].mxu0  ;;  %v282_v6 = vsel %vm78_vm1, %v276_v1, 0.0  ;;  %v279_v7 = vsel %vm78_vm1, %v275_v3, 0.0  ;;  %v285_v10 = vsel %vm78_vm1, %v277_v8, 0.0  ;;  %v288_v14 = vsel %vm78_vm1, %v278_v11, 0.0 }
 0x31d   :  { %283 = vadd.xlane.f32.xlu1 %v282_v6  ;;  %280 = vadd.xlane.f32.xlu0 %v279_v7  ;;  %v103_v1 = vsel %vm78_vm1, %v1243_v60, 0.0  ;;  %v102_v3 = vsel %vm78_vm1, %v1248_v61, 0.0  ;;  %v105_v11 = vsel %vm78_vm1, %v1253_v63, 0.0 }
 0x321   :  { %286 = vadd.xlane.f32.xlu1 %v285_v10  ;;  %v104_v10 = vadd.f32 %v103_v1, %v102_v3  ;;  %v555_v3 = vld [vmem:[%s1492_s13] sm:$0xff] }
 0x323   :  { %v106_v23 = vadd.f32 %v105_v11, %v104_v10  ;;  %v854_v10 = vld [vmem:[%s1493_s11] ss:$0 sm:$0xff] }
 0x325   :  { %289 = vadd.xlane.f32.xlu1 %v288_v14 }
 0x336   :  { %112 = vperm.xlu1 %979, %v109_v15  }
 0x3aa   :  { %v284_v30 = vpop.xlane.xlu1 %283  ;;  %v281_v31 = vpop.xlane.xlu0 %280 }
 0x3ab   :  { %v293_v34 = vsel %vm291_vm3, %v284_v30, -inf  ;;  %v292_v35 = vsel %vm291_vm3, %v281_v31, -inf }
 0x3ac   :  { %v296_v39 = vmax.f32 %v292_v35, %v293_v34 }
 0x3ae   :  { %v287_v33 = vpop.xlane.xlu1 %286 }
 0x3af   :  { %v294_v37 = vsel %vm291_vm3, %v287_v33, -inf }
 0x3b2   :  { %v290_v36 = vpop.xlane.xlu1 %289 }
 0x3b3   :  { %v295_v38 = vsel %vm291_vm3, %v290_v36, -inf }
 0x3b4   :  { %v297_v40 = vmax.f32 %v294_v37, %v295_v38 }
 0x3b6   :  { %v298_v41 = vmax.f32 %v296_v39, %v297_v40  ;;  %v113_v0 = vpop.permute.xlu1 %112  ;;  %v393_v40 = vld [vmem:[%s1487_s10 + $0x10] sm:$0xff] }
 0x3b8   :  { %v299_v42 = vsub.f32 %v281_v31, %v298_v41  ;;  %v300_v43 = vsub.f32 %v284_v30, %v298_v41  ;;  %v301_v44 = vsub.f32 %v287_v33, %v298_v41  ;;  %v302_v45 = vsub.f32 %v290_v36, %v298_v41  ;;  %v451_v36 = vld [vmem:[%s1488_s15 + $0x18] sm:$0xff] }
 0x3b9   :  { %v108_v31 = vadd.f32 %v107_v26, %v106_v23  ;;  %v394_v41 = vld [vmem:[%s1487_s10 + $0x18] sm:$0xff] }
 0x3ba   :  { %v303_v46 = vmul.f32 1.442695, %v299_v42  ;;  %v305_v47 = vmul.f32 1.442695, %v300_v43  ;;  %v307_v48 = vmul.f32 1.442695, %v301_v44  ;;  %v397_v42 = vpack.c.bf16 %v394_v41, %v393_v40 }
 0x3bb   :  { %v309_v49 = vmul.f32 1.442695, %v302_v45  ;;  %v852_v43 = vld [vmem:[%s1489_s6] ss:$0 sm:$0xff]  ;;  %v506_v45 = vld [vmem:[%s1490_s17 + $0x8] sm:$0xff] }
 0x3bc   :  { %982 = vpow2.f32 %v303_v46  ;;  %929 = vmatpush3.bf16.msra.mxu0 %v397_v42  ;;  %v505_v44 = vld [vmem:[%s1490_s17] sm:$0xff] }
 0x3bd   :  { %984 = vpow2.f32 %v305_v47  ;;  %942 = vmatprep.subr.bf16.mxu0 %v1013_v2 }
 0x3be   :  { %986 = vpow2.f32 %v307_v48 }
 0x3bf   :  { %988 = vpow2.f32 %v309_v49 }
 0x3c6   :  { %v983_v50 = vpop.eup %982 }
 0x3c7   :  { %v985_v51 = vpop.eup %984  ;;  %v311_v52 = vsel %vm291_vm3, %v983_v50, 0.0 }
 0x3c8   :  { %v987_v53 = vpop.eup %986  ;;  %v312_v54 = vsel %vm291_vm3, %v985_v51, 0.0 }
 0x3c9   :  { %v989_v55 = vpop.eup %988  ;;  %v313_v56 = vadd.f32 %v312_v54, %v311_v52  ;;  %v314_v57 = vsel %vm291_vm3, %v987_v53, 0.0  ;;  %v508_v54 = vld [vmem:[%s1490_s17 + $0x18] sm:$0xff] }
 0x3ca   :  { %v316_v59 = vsel %vm291_vm3, %v989_v55, 0.0 }
 0x3cb   :  { %v315_v58 = vadd.f32 %v314_v57, %v313_v56 }
 0x3cd   :  { %v317_v62 = vadd.f32 %v316_v59, %v315_v58 }
 0x3cf   :  { %990 = vrcp.f32 %v317_v62 }
 0x3d0   :  { %992 = vrcp.f32 %v113_v0 }
 0x3d9   :  { %v991_v4 = vpop.eup %990 }
 0x3da   :  { %v322_v5 = vmul.f32 %v991_v4, %v989_v55  ;;  %v319_v6 = vmul.f32 %v991_v4, %v983_v50  ;;  %v320_v7 = vmul.f32 %v991_v4, %v985_v51  ;;  %v321_v8 = vmul.f32 %v991_v4, %v987_v53  ;;  %v993_v30 = vpop.eup %992  ;;  %v507_v53 = vld [vmem:[%s1490_s17 + $0x10] sm:$0xff]  ;;  %v856_v55 = vld [vmem:[%s1491_s16] ss:$0 sm:$0xff]  ;;  %v556_v4 = vld [vmem:[%s1492_s13 + $0x8] sm:$0xff] }
 0x3db   :  { %v116_v37 = vmul.f32 %v993_v30, %v108_v31  ;;  %v510_v50 = vpack.c.bf16 %v506_v45, %v505_v44  ;;  %v511_v56 = vpack.c.bf16 %v508_v54, %v507_v53  ;;  %v723_v45 = vld [vmem:[%s1495_s12] sm:$0xff] }
 0x3dc   :  { %v323_v14 = vmul.f32 %v319_v6, %v1248_v61  ;;  %v324_v15 = vmul.f32 %v320_v7, %v1243_v60  ;;  %v325_v17 = vmul.f32 %v321_v8, %v1253_v63  ;;  %v326_v18 = vmul.f32 %v322_v5, %v1263_v9  ;;  %v448_v60 = vld [vmem:[%s1488_s15] sm:$0xff]  ;;  %v449_v61 = vld [vmem:[%s1488_s15 + $0x8] sm:$0xff]  ;;  %v450_v9 = vld [vmem:[%s1488_s15 + $0x10] sm:$0xff] }
 0x3dd   :  { %v453_v34 = vpack.c.bf16 %v449_v61, %v448_v60  ;;  %v454_v38 = vpack.c.bf16 %v451_v36, %v450_v9  ;;  %v452_v39 = vpack.c.bf16 %v116_v37, %v116_v37  ;;  %v557_v5 = vld [vmem:[%s1492_s13 + $0x10] sm:$0xff]  ;;  %v560_v6 = vpack.c.bf16 %v556_v4, %v555_v3  ;;  %v558_v7 = vld [vmem:[%s1492_s13 + $0x18] sm:$0xff] }
 0x3de   :  { %v327_v20 = vsel %vm78_vm1, %v323_v14, 0.0  ;;  %v328_v21 = vsel %vm78_vm1, %v324_v15, 0.0  ;;  %v330_v27 = vsel %vm78_vm1, %v325_v17, 0.0  ;;  %v332_v63 = vsel %vm78_vm1, %v326_v18, 0.0 }
 0x3df   :  { %v329_v24 = vadd.f32 %v328_v21, %v327_v20  ;;  %v561_v8 = vpack.c.bf16 %v558_v7, %v557_v5 }
 0x3e1   :  { %v331_v29 = vadd.f32 %v330_v27, %v329_v24 }
 0x3e3   :  { %v333_v33 = vadd.f32 %v332_v63, %v331_v29 }
 0x3e5   :  { %v338_v35 = vpack.c.bf16 %v333_v33, %v333_v33 }
 0x3e7   :  { %923 = vmatmul.mubr.msk.bf16.vlgmr.msra.gmra.mrb[4].mxu1 %vm131_vm2, %v338_v35 }
 0x3e8   :  { %935 = vmatpush3.bf16.msra.mxu1 %v453_v34  ;;  %938 = vmatprep.mubr.msk.bf16.mxu1 %vm1014_vm0, %v1013_v2 }
 0x3e9   :  { %936 = vmatprep.subr.bf16.mxu1 %v1013_v2 }
 0x3ec   :  { %937 = vmatpush3.bf16.msra.mxu1 %v454_v38 }
 0x3ed   :  { %950 = vmatprep.subr.bf16.mxu1 %v1013_v2 }
 0x3ef   :  { %939 = vmatmul.mubr.msk.bf16.vlgmr.msra.gmra.mrb[8].mxu1 %vm131_vm2, %v452_v39 }
 0x3f0   :  { %954 = vmatprep.mubr.msk.bf16.mxu1 %vm1014_vm0, %v1013_v2  ;;  %951 = vmatpush3.bf16.msra.mxu1 %v560_v6 }
 0x3f1   :  { %952 = vmatprep.subr.bf16.mxu1 %v1013_v2 }
 0x3f4   :  { %953 = vmatpush3.bf16.msra.mxu1 %v561_v8 }
 0x3f5   :  { %966 = vmatprep.subr.bf16.mxu1 %v1013_v2 }
 0x4ba   :  { %v385_v46 = vpop.f32.mrb[4].mxu1 }
 0x4bb   :  { %v386_v47 = vadd.f32 %v852_v43, %v385_v46  ;;  %v924_v48 = vpop.f32.mrb[5].mxu1  ;;  %v724_v46 = vld [vmem:[%s1495_s12 + $0x8] sm:$0xff] }
 0x4bc   :  { %v388_v49 = vpop.f32.mrb[6].mxu1  ;;  %v728_v48 = vpack.c.bf16 %v724_v46, %v723_v45 }
 0x4bd   :  { %v395_v51 = vpack.c.bf16 %v386_v47, %v386_v47  ;;  %v925_v52 = vpop.f32.mrb[7].mxu1  ;;  %v725_v47 = vld [vmem:[%s1495_s12 + $0x10] sm:$0xff]  ;;  %v726_v49 = vld [vmem:[%s1495_s12 + $0x18] sm:$0xff] }
 0x4be   :  { %v781_v52 = vld [vmem:[%s1496_s18 + $0x8] sm:$0xff] }
 0x4bf   :  { %931 = vmatmul.mubr.msk.bf16.vlgmr.msra.gmra.mrb[8].mxu0 %vm131_vm2, %v395_v51  ;;  %v780_v51 = vld [vmem:[%s1496_s18] sm:$0xff] }
 0x4c0   :  { %943 = vmatpush3.bf16.msra.mxu0 %v510_v50  ;;  %946 = vmatprep.mubr.msk.bf16.mxu0 %vm1014_vm0, %v1013_v2  ;;  %v729_v50 = vpack.c.bf16 %v726_v49, %v725_v47  ;;  %v785_v53 = vpack.c.bf16 %v781_v52, %v780_v51 }
 0x4c1   :  { %944 = vmatprep.subr.bf16.mxu0 %v1013_v2 }
 0x4c2   :  { %v499_v57 = vpop.f32.mrb[8].mxu1 }
 0x4c3   :  { %v500_v58 = vadd.f32 %v856_v55, %v499_v57  ;;  %v940_v59 = vpop.f32.mrb[9].mxu1 }
 0x4c4   :  { %945 = vmatpush3.bf16.msra.mxu0 %v511_v56  ;;  %v502_v62 = vpop.f32.mrb[10].mxu1 }
 0x4c5   :  { %v509_v0 = vpack.c.bf16 %v500_v58, %v500_v58  ;;  %v941_v1 = vpop.f32.mrb[11].mxu1  ;;  %958 = vmatprep.subr.bf16.mxu0 %v1013_v2 }
 0x4c7   :  { %947 = vmatmul.mubr.msk.bf16.vlgmr.msra.gmra.mrb[12].mxu0 %vm131_vm2, %v509_v0 }
 0x4c8   :  { %962 = vmatprep.mubr.msk.bf16.mxu0 %vm1014_vm0, %v1013_v2  ;;  %959 = vmatpush3.bf16.msra.mxu0 %v728_v48 }
 0x4c9   :  { %960 = vmatprep.subr.bf16.mxu0 %v1013_v2 }
 0x4cc   :  { %961 = vmatpush3.bf16.msra.mxu0 %v729_v50 }
 0x592   :  { %v442_v11 = vpop.f32.mrb[8].mxu0 }
 0x593   :  { %v443_v14 = vadd.f32 %v854_v10, %v442_v11  ;;  %v932_v15 = vpop.f32.mrb[9].mxu0 }
 0x594   :  { %v445_v17 = vpop.f32.mrb[10].mxu0 }
 0x595   :  { %837 = vst.msk [vmem:[%s1494_s20] sm:$0x3f] %vm78_vm1, %v443_v14  ;;  %v933_v18 = vpop.f32.mrb[11].mxu0 }
 0x59a   :  { %v549_v20 = vpop.f32.mrb[12].mxu0 }
 0x59b   :  { %v559_v21 = vpack.c.bf16 %v549_v20, %v549_v20  ;;  %v948_v23 = vpop.f32.mrb[13].mxu0 }
 0x59c   :  { %v552_v24 = vpop.f32.mrb[14].mxu0 }
 0x59d   :  { %v949_v26 = vpop.f32.mrb[15].mxu0  ;;  %955 = vmatmul.mubr.msk.bf16.vlgmr.msra.gmra.mrb[12].mxu1 %vm131_vm2, %v559_v21 }
 0x59e   :  { %970 = vmatprep.mubr.msk.bf16.mxu1 %vm1014_vm0, %v1013_v2  ;;  %967 = vmatpush3.bf16.msra.mxu1 %v785_v53 }
 0x59f   :  { %968 = vmatprep.subr.bf16.mxu1 %v1013_v2 }
 0x670   :  { %v599_v27 = vpop.f32.mrb[12].mxu1 }
 0x671   :  { %v956_v29 = vpop.f32.mrb[13].mxu1  ;;  %v606_v60 = vmul.f32 %v599_v27, %v1159_v13  ;;  %v605_v61 = vmul.f32 %v599_v27, %v1154_v12  ;;  %v607_v34 = vmul.f32 %v599_v27, %v1168_v16  ;;  %v608_v9 = vmul.f32 %v599_v27, %v1175_v19 }
 0x672   :  { %v602_v63 = vpop.f32.mrb[14].mxu1  ;;  %v609_v37 = vmul.f32 %v599_v27, %v1182_v22  ;;  %v610_v39 = vmul.f32 %v599_v27, %v1189_v25  ;;  %v611_v41 = vmul.f32 %v599_v27, %v1196_v28  ;;  %v612_v43 = vmul.f32 %v599_v27, %v1203_v32 }
 0x673   :  { %v957_v30 = vpop.f32.mrb[15].mxu1  ;;  %v616_v31 = vsel %vm78_vm1, %v606_v60, 0.0  ;;  %v613_v33 = vsel %vm78_vm1, %v605_v61, 0.0  ;;  %v619_v35 = vsel %vm78_vm1, %v607_v34, 0.0  ;;  %v622_v36 = vsel %vm78_vm1, %v608_v9, 0.0 }
 0x674   :  { %617 = vadd.xlane.f32.xlu0 %v616_v31  ;;  %614 = vadd.xlane.f32.xlu1 %v613_v33  ;;  %v625_v38 = vsel %vm78_vm1, %v609_v37, 0.0  ;;  %v628_v40 = vsel %vm78_vm1, %v610_v39, 0.0  ;;  %v631_v42 = vsel %vm78_vm1, %v611_v41, 0.0  ;;  %v634_v44 = vsel %vm78_vm1, %v612_v43, 0.0 }
 0x678   :  { %620 = vadd.xlane.f32.xlu0 %v619_v35 }
 0x67c   :  { %623 = vadd.xlane.f32.xlu0 %v622_v36 }
 0x680   :  { %626 = vadd.xlane.f32.xlu0 %v625_v38 }
 0x684   :  { %629 = vadd.xlane.f32.xlu0 %v628_v40 }
 0x688   :  { %632 = vadd.xlane.f32.xlu0 %v631_v42 }
 0x68c   :  { %635 = vadd.xlane.f32.xlu0 %v634_v44 }
 0x701   :  { %v618_v54 = vpop.xlane.xlu0 %617  ;;  %v615_v0 = vpop.xlane.xlu1 %614 }
 0x702   :  { %v638_v1 = vsel %vm291_vm3, %v618_v54, -inf  ;;  %v637_v7 = vsel %vm291_vm3, %v615_v0, -inf }
 0x705   :  { %v621_v55 = vpop.xlane.xlu0 %620 }
 0x706   :  { %v639_v2 = vsel %vm291_vm3, %v621_v55, -inf }
 0x709   :  { %v624_v56 = vpop.xlane.xlu0 %623 }
 0x70a   :  { %v640_v8 = vsel %vm291_vm3, %v624_v56, -inf }
 0x70d   :  { %v627_v57 = vpop.xlane.xlu0 %626 }
 0x70e   :  { %v641_v3 = vsel %vm291_vm3, %v627_v57, -inf }
 0x70f   :  { %v642_v11 = vmax.f32 %v637_v7, %v641_v3 }
 0x711   :  { %v630_v58 = vpop.xlane.xlu0 %629 }
 0x712   :  { %v643_v62 = vsel %vm291_vm3, %v630_v58, -inf }
 0x713   :  { %v644_v5 = vmax.f32 %v638_v1, %v643_v62 }
 0x715   :  { %v633_v59 = vpop.xlane.xlu0 %632  ;;  %v649_v17 = vmax.f32 %v642_v11, %v644_v5 }
 0x716   :  { %v645_v4 = vsel %vm291_vm3, %v633_v59, -inf }
 0x717   :  { %v646_v14 = vmax.f32 %v639_v2, %v645_v4 }
 0x719   :  { %v636_v6 = vpop.xlane.xlu0 %635 }
 0x71a   :  { %v647_v10 = vsel %vm291_vm3, %v636_v6, -inf }
 0x71b   :  { %v648_v15 = vmax.f32 %v640_v8, %v647_v10 }
 0x71d   :  { %v650_v18 = vmax.f32 %v646_v14, %v648_v15 }
 0x71f   :  { %v651_v20 = vmax.f32 %v649_v17, %v650_v18 }
 0x721   :  { %v652_v21 = vsub.f32 %v615_v0, %v651_v20  ;;  %v653_v23 = vsub.f32 %v618_v54, %v651_v20  ;;  %v654_v24 = vsub.f32 %v621_v55, %v651_v20  ;;  %v655_v26 = vsub.f32 %v624_v56, %v651_v20 }
 0x722   :  { %v656_v27 = vsub.f32 %v627_v57, %v651_v20  ;;  %v657_v63 = vsub.f32 %v630_v58, %v651_v20  ;;  %v658_v31 = vsub.f32 %v633_v59, %v651_v20  ;;  %v659_v34 = vsub.f32 %v636_v6, %v651_v20 }
 0x723   :  { %v660_v29 = vmul.f32 1.442695, %v652_v21  ;;  %v662_v60 = vmul.f32 1.442695, %v653_v23  ;;  %v664_v61 = vmul.f32 1.442695, %v654_v24 }
 0x724   :  { %v666_v30 = vmul.f32 1.442695, %v655_v26  ;;  %v668_v33 = vmul.f32 1.442695, %v656_v27  ;;  %v670_v35 = vmul.f32 1.442695, %v657_v63 }
 0x725   :  { %994 = vpow2.f32 %v660_v29  ;;  %v672_v9 = vmul.f32 1.442695, %v658_v31  ;;  %v674_v36 = vmul.f32 1.442695, %v659_v34 }
 0x726   :  { %996 = vpow2.f32 %v662_v60 }
 0x727   :  { %998 = vpow2.f32 %v664_v61 }
 0x728   :  { %1000 = vpow2.f32 %v666_v30 }
 0x729   :  { %1002 = vpow2.f32 %v668_v33  ;;  %v860_v33 = vld [vmem:[%s1497_s14] ss:$0 sm:$0xff] }
 0x72a   :  { %1004 = vpow2.f32 %v670_v35 }
 0x72b   :  { %1006 = vpow2.f32 %v672_v9 }
 0x72c   :  { %1008 = vpow2.f32 %v674_v36 }
 0x72f   :  { %v995_v37 = vpop.eup %994 }
 0x730   :  { %v997_v38 = vpop.eup %996  ;;  %v676_v39 = vsel %vm291_vm3, %v995_v37, 0.0 }
 0x731   :  { %v999_v40 = vpop.eup %998  ;;  %v677_v41 = vsel %vm291_vm3, %v997_v38, 0.0 }
 0x732   :  { %v1001_v42 = vpop.eup %1000  ;;  %v678_v43 = vadd.f32 %v677_v41, %v676_v39  ;;  %v679_v44 = vsel %vm291_vm3, %v999_v40, 0.0  ;;  %v862_v39 = vld [vmem:[%s1498_s19] ss:$0 sm:$0xff] }
 0x733   :  { %v1003_v45 = vpop.eup %1002  ;;  %v681_v47 = vsel %vm291_vm3, %v1001_v42, 0.0 }
 0x734   :  { %v680_v46 = vadd.f32 %v679_v44, %v678_v43  ;;  %v1005_v48 = vpop.eup %1004  ;;  %v683_v50 = vsel %vm291_vm3, %v1003_v45, 0.0 }
 0x735   :  { %v1007_v51 = vpop.eup %1006  ;;  %v685_v53 = vsel %vm291_vm3, %v1005_v48, 0.0 }
 0x736   :  { %v682_v49 = vadd.f32 %v681_v47, %v680_v46  ;;  %v1009_v54 = vpop.eup %1008  ;;  %v687_v56 = vsel %vm291_vm3, %v1007_v51, 0.0 }
 0x737   :  { %v689_v58 = vsel %vm291_vm3, %v1009_v54, 0.0 }
 0x738   :  { %v684_v52 = vadd.f32 %v683_v50, %v682_v49 }
 0x73a   :  { %v686_v55 = vadd.f32 %v685_v53, %v684_v52 }
 0x73c   :  { %v688_v57 = vadd.f32 %v687_v56, %v686_v55 }
 0x73e   :  { %v690_v59 = vadd.f32 %v689_v58, %v688_v57 }
 0x740   :  { %1010 = vrcp.f32 %v690_v59 }
 0x74a   :  { %v1011_v62 = vpop.eup %1010 }
 0x74b   :  { %v692_v0 = vmul.f32 %v1011_v62, %v995_v37  ;;  %v693_v1 = vmul.f32 %v1011_v62, %v997_v38  ;;  %v694_v3 = vmul.f32 %v1011_v62, %v999_v40  ;;  %v695_v4 = vmul.f32 %v1011_v62, %v1001_v42 }
 0x74c   :  { %v696_v5 = vmul.f32 %v1011_v62, %v1003_v45  ;;  %v697_v8 = vmul.f32 %v1011_v62, %v1005_v48  ;;  %v698_v17 = vmul.f32 %v1011_v62, %v1007_v51  ;;  %v699_v23 = vmul.f32 %v1011_v62, %v1009_v54 }
 0x74d   :  { %v700_v6 = vmul.f32 %v692_v0, %v1154_v12  ;;  %v701_v7 = vmul.f32 %v693_v1, %v1159_v13  ;;  %v702_v2 = vmul.f32 %v694_v3, %v1168_v16  ;;  %v703_v10 = vmul.f32 %v695_v4, %v1175_v19 }
 0x74e   :  { %v704_v18 = vmul.f32 %v696_v5, %v1182_v22  ;;  %v705_v12 = vmul.f32 %v697_v8, %v1189_v25  ;;  %v706_v24 = vmul.f32 %v698_v17, %v1196_v28  ;;  %v707_v27 = vmul.f32 %v699_v23, %v1203_v32  ;;  %v782_v28 = vld [vmem:[%s1496_s18 + $0x10] sm:$0xff]  ;;  %v783_v32 = vld [vmem:[%s1496_s18 + $0x18] sm:$0xff]  ;;  %s1015_s18 = smov 32  }
 0x74f   :  { %v708_v11 = vsel %vm78_vm1, %v700_v6, 0.0  ;;  %v709_v14 = vsel %vm78_vm1, %v701_v7, 0.0  ;;  %v711_v20 = vsel %vm78_vm1, %v702_v2, 0.0  ;;  %v713_v13 = vsel %vm78_vm1, %v703_v10, 0.0 }
 0x750   :  { %v710_v15 = vadd.f32 %v709_v14, %v708_v11  ;;  %v715_v19 = vsel %vm78_vm1, %v704_v18, 0.0  ;;  %v717_v29 = vsel %vm78_vm1, %v705_v12, 0.0  ;;  %v719_v22 = vsel %vm78_vm1, %v706_v24, 0.0 }
 0x751   :  { %v721_v63 = vsel %vm78_vm1, %v707_v27, 0.0  ;;  %v786_v31 = vpack.c.bf16 %v783_v32, %v782_v28 }
 0x752   :  { %v712_v21 = vadd.f32 %v711_v20, %v710_v15 }
 0x753   :  { %969 = vmatpush3.bf16.msra.mxu1 %v786_v31 }
 0x754   :  { %v714_v16 = vadd.f32 %v713_v13, %v712_v21 }
 0x756   :  { %v716_v26 = vadd.f32 %v715_v19, %v714_v16 }
 0x758   :  { %v718_v60 = vadd.f32 %v717_v29, %v716_v26 }
 0x75a   :  { %v720_v61 = vadd.f32 %v719_v22, %v718_v60 }
 0x75c   :  { %v722_v30 = vadd.f32 %v721_v63, %v720_v61 }
 0x75e   :  { %v727_v25 = vpack.c.bf16 %v722_v30, %v722_v30 }
 0x760   :  { %963 = vmatmul.mubr.msk.bf16.vlgmr.msra.gmra.mrb[16].mxu0 %vm131_vm2, %v727_v25 }
 0x833   :  { %v774_v34 = vpop.f32.mrb[16].mxu0 }
 0x834   :  { %v775_v35 = vadd.f32 %v860_v33, %v774_v34  ;;  %v964_v9 = vpop.f32.mrb[17].mxu0 }
 0x835   :  { %v777_v36 = vpop.f32.mrb[18].mxu0 }
 0x836   :  { %v784_v37 = vpack.c.bf16 %v775_v35, %v775_v35  ;;  %v965_v38 = vpop.f32.mrb[19].mxu0 }
 0x838   :  { %971 = vmatmul.mubr.msk.bf16.vlgmr.msra.gmra.mrb[16].mxu1 %vm131_vm2, %v784_v37 }
 0x90b   :  { %v831_v40 = vpop.f32.mrb[16].mxu1 }
 0x90c   :  { %v832_v41 = vadd.f32 %v862_v39, %v831_v40  ;;  %v972_v42 = vpop.f32.mrb[17].mxu1 }
 0x90d   :  { %v834_v43 = vpop.f32.mrb[18].mxu1 }
 0x90e   :  { %839 = vrot.lane.b32.xlu0 %v832_v41, %s1015_s18  ;;  %v973_v44 = vpop.f32.mrb[19].mxu1 }
 0x980   :  { %v840_v45 = vpop.permute.xlu0 %839 }
 0x981   :  { %843 = vst.msk [vmem:[%s1494_s20] sm:$0x3f] %vm842_vm4, %v840_v45 }

</bundles_post_ra>
